<compile_context>
chip_gen: v7x
topology: tpu7x:2x2x1
jax: 0.10.0
libtpu: 0.0.40
codegen_flags: <defaults>
</compile_context>

<pallas_src>
import functools

import jax
import jax.numpy as jnp
from jax import lax
from jax.experimental import pallas as pl
from jax.experimental.pallas import tpu as pltpu


def _vmem_limit_bytes():
    """~3/4 of physical VMEM: ~96 MiB on v5e/v6e (128 MiB), ~48 MiB on v7x (64 MiB)."""
    try:
        cap = pltpu.get_tpu_info().vmem_capacity_bytes
    except Exception:                      # conservative fallback (v7x-safe)
        cap = 64 * 1024 * 1024
    return int(cap * 3 // 4)


# -----------------------------------------------------------------------------
# In-kernel fused im2col + conv: K*K static unit-stride windows of the phase
# slab, each matmul'd (bf16 operands, f32 MXU accumulation) against its weight tap.
# -----------------------------------------------------------------------------
def _conv_accumulate(xph_ref, w_ref, *, kernel_size, stride, Ho, Wo, C_in, C_out):
    K, s = kernel_size, stride
    acc = jnp.zeros((Ho * Wo, C_out), jnp.float32)
    for kh in range(K):
        for kw in range(K):
            p = (kh % s) * s + (kw % s)            # which stride-phase holds this tap
            qh, qw = kh // s, kw // s              # unit-stride offset inside the phase
            win = xph_ref[p, qh:qh + Ho, qw:qw + Wo, :]       # (Ho, Wo, C_in) bf16
            acc = acc + jnp.dot(win.reshape(Ho * Wo, C_in), w_ref[kh * K + kw],
                                preferred_element_type=jnp.float32)
    return acc


# -----------------------------------------------------------------------------
# Pass 1 (only when batch_normalize): per-image partial BN statistics.
# -----------------------------------------------------------------------------
def _stats_kernel(xph_ref, w_ref, stats_ref, *, kernel_size, stride, Ho, Wo,
                  C_in, C_out):
    acc = _conv_accumulate(xph_ref, w_ref, kernel_size=kernel_size, stride=stride,
                           Ho=Ho, Wo=Wo, C_in=C_in, C_out=C_out)
    s1 = jnp.sum(acc, axis=0, keepdims=True)                 # (1, C_out)
    s2 = jnp.sum(acc * acc, axis=0, keepdims=True)           # (1, C_out)
    stats_ref[...] = jnp.concatenate([s1, s2], axis=0)       # single (2, C_out) store


# -----------------------------------------------------------------------------
# Pass 2: conv recompute + folded-BN affine + LeakyReLU, written as NHWC.
# -----------------------------------------------------------------------------
def _conv_bn_act_kernel(xph_ref, w_ref, scale_ref, shift_ref, out_ref, *,
                        kernel_size, stride, Ho, Wo, C_in, C_out,
                        leaky_relu, neg_slope):
    acc = _conv_accumulate(xph_ref, w_ref, kernel_size=kernel_size, stride=stride,
                           Ho=Ho, Wo=Wo, C_in=C_in, C_out=C_out)
    y = acc * scale_ref[...] + shift_ref[...]
    if leaky_relu:
        y = jnp.where(y > 0, y, neg_slope * y)
    out_ref[...] = y.reshape(1, Ho, Wo, C_out).astype(out_ref.dtype)


# -----------------------------------------------------------------------------
# Host-side glue: reflect pad + pixel-unshuffle into stride^2 phases (NHWC, bf16).
# Phase (a, b) holds x_pad[:, a::s, b::s, :]; every (kh, kw) tap of the conv is a
# unit-stride (Ho, Wo) window of phase (kh%s, kw%s) at static offset (kh//s, kw//s).
# -----------------------------------------------------------------------------
def _to_phases(x_pad_nchw, kernel_size, stride):
    N, C, Hp, Wp = x_pad_nchw.shape
    K, s = kernel_size, stride
    Ho = (Hp - K) // s + 1
    Wo = (Wp - K) // s + 1
    Hph = Ho + (K - 1) // s
    Wph = Wo + (K - 1) // s
    x_nhwc = jnp.transpose(x_pad_nchw, (0, 2, 3, 1)).astype(jnp.bfloat16)
    phases = []
    for a in range(s):
        for b in range(s):
            ph = x_nhwc[:, a::s, b::s, :][:, :Hph, :Wph, :]
            # Pad short phases with zeros; padded rows/cols are never read.
            ph = jnp.pad(ph, ((0, 0), (0, Hph - ph.shape[1]),
                              (0, Wph - ph.shape[2]), (0, 0)))
            phases.append(ph)
    xph = jnp.stack(phases, axis=1)                          # (N, s*s, Hph, Wph, C)
    return xph.reshape(N * s * s, Hph, Wph, C), Ho, Wo, Hph, Wph


def discriminator_cnn_block(x, weight, gamma, beta, *, stride, padding,
                            kernel_size=4, batch_normalize=True, leaky_relu=True,
                            eps=1e-5, neg_slope=0.2):
    """x: (N, C_in, H, W) f32; weight: (C_out, C_in, K, K); gamma/beta: (C_out,)."""
    N, C_in, H, W = x.shape
    C_out = weight.shape[0]
    K, s = kernel_size, stride

    # Reflect padding (Conv2d padding_mode='reflect').
    if padding > 0:
        x_pad = jnp.pad(x, ((0, 0), (0, 0), (padding, padding), (padding, padding)),
                        mode="reflect")
    else:
        x_pad = x

    xph, Ho, Wo, Hph, Wph = _to_phases(x_pad, K, s)          # (N*s*s, Hph, Wph, C_in)
    s2 = s * s
    # Per-tap weight slabs (K*K, C_in, C_out), bf16 operands / f32 accumulation.
    w_taps = jnp.transpose(weight, (2, 3, 1, 0)).reshape(K * K, C_in, C_out)
    w_taps = w_taps.astype(jnp.bfloat16)

    cparams = pltpu.CompilerParams(dimension_semantics=("parallel",),
                                   vmem_limit_bytes=_vmem_limit_bytes())
    # TODO(synk): when N == 1 (or N < 2*num_cores on v7x) additionally tile over
    # output rows so both TensorCores stay busy.

    xph_spec = pl.BlockSpec((s2, Hph, Wph, C_in), lambda n: (n, 0, 0, 0))
    # TODO(synk): the weight block's index never changes; single-buffer it
    # (pipeline_mode=pl.Buffered(1)) once that is robust across jax versions.
    w_spec = pl.BlockSpec((K * K, C_in, C_out), lambda n: (0, 0, 0))

    M = N * Ho * Wo
    conv_flops = 2 * N * Ho * Wo * K * K * C_in * C_out
    in_bytes = xph.size * 2 + w_taps.size * 2

    # ---------------- pass 1: per-image partial statistics -------------------
    if batch_normalize:
        stats = pl.pallas_call(
            functools.partial(_stats_kernel, kernel_size=K, stride=s, Ho=Ho, Wo=Wo,
                              C_in=C_in, C_out=C_out),
            out_shape=jax.ShapeDtypeStruct((N, 2, C_out), jnp.float32),
            grid=(N,),
            in_specs=[xph_spec, w_spec],
            out_specs=pl.BlockSpec((None, 2, C_out), lambda n: (n, 0, 0)),
            compiler_params=cparams,
            cost_estimate=pl.CostEstimate(flops=conv_flops, transcendentals=0,
                                          bytes_accessed=in_bytes + N * 2 * C_out * 4),
        )(xph, w_taps)

        sums = jnp.sum(stats, axis=0)                        # (2, C_out)
        mean = sums[0] / M                                   # exact: no padded rows
        # TODO(synk): E[x^2]-E[x]^2 in f32 can cancel for very large M; a per-image
        # Welford merge would be more robust (PyTorch running stats also not updated).
        var = jnp.maximum(sums[1] / M - mean * mean, 0.0)    # biased var (BN forward)
        inv_std = lax.rsqrt(var + eps)
        g = gamma.astype(jnp.float32)
        b = beta.astype(jnp.float32)
        scale = (g * inv_std).reshape(1, C_out)
        shift = (b - mean * g * inv_std).reshape(1, C_out)
    else:
        scale = jnp.ones((1, C_out), jnp.float32)
        shift = jnp.zeros((1, C_out), jnp.float32)

    # -------- pass 2: conv recompute + scale/shift + LeakyReLU (NHWC out) ----
    # TODO(synk): for deep MXU-bound layers, optionally store a bf16 conv
    # intermediate in pass 1 instead of recomputing the matmul here.
    out_nhwc = pl.pallas_call(
        functools.partial(_conv_bn_act_kernel, kernel_size=K, stride=s, Ho=Ho, Wo=Wo,
                          C_in=C_in, C_out=C_out, leaky_relu=leaky_relu,
                          neg_slope=neg_slope),
        out_shape=jax.ShapeDtypeStruct((N, Ho, Wo, C_out), jnp.float32),
        grid=(N,),
        in_specs=[xph_spec, w_spec,
                  pl.BlockSpec((1, C_out), lambda n: (0, 0)),
                  pl.BlockSpec((1, C_out), lambda n: (0, 0))],
        out_specs=pl.BlockSpec((1, Ho, Wo, C_out), lambda n: (n, 0, 0, 0)),
        compiler_params=cparams,
        cost_estimate=pl.CostEstimate(flops=conv_flops + 4 * M * C_out,
                                      transcendentals=0,
                                      bytes_accessed=in_bytes + M * C_out * 4),
    )(xph, w_taps, scale, shift)

    # Only the NHWC->NCHW transpose remains (PyTorch API parity); no slice / unpad.
    # TODO(synk): in a chained discriminator, hand bf16 NHWC directly to the next
    # block's fused im2col and drop this transpose too.
    return jnp.transpose(out_nhwc, (0, 3, 1, 2))


# -----------------------------------------------------------------------------
# Pure-JAX reference (for correctness check)
# -----------------------------------------------------------------------------
def reference(x, weight, gamma, beta, *, stride, padding, kernel_size=4,
              batch_normalize=True, leaky_relu=True, eps=1e-5, neg_slope=0.2):
    if padding > 0:
        x = jnp.pad(x, ((0, 0), (0, 0), (padding, padding), (padding, padding)),
                    mode="reflect")
    y = lax.conv_general_dilated(
        x, weight, window_strides=(stride, stride), padding="VALID",
        dimension_numbers=("NCHW", "OIHW", "NCHW"))
    if batch_normalize:
        mean = jnp.mean(y, axis=(0, 2, 3), keepdims=True)
        var = jnp.mean((y - mean) ** 2, axis=(0, 2, 3), keepdims=True)
        y = (y - mean) * lax.rsqrt(var + eps)
        y = y * gamma.reshape(1, -1, 1, 1) + beta.reshape(1, -1, 1, 1)
    if leaky_relu:
        y = jnp.where(y > 0, y, neg_slope * y)
    return y


if __name__ == "__main__":
    in_channels, out_channels = 4, 8
    stride, padding, kernel_size = 2, 1, 4
    N, H, W = 2, 16, 16

    key = jax.random.PRNGKey(0)
    k_x, k_w = jax.random.split(key)
    x = jax.random.normal(k_x, (N, in_channels, H, W), dtype=jnp.float32)
    # Conv2d bias=False; BatchNorm2d affine defaults: gamma=1, beta=0.
    weight = 0.1 * jax.random.normal(
        k_w, (out_channels, in_channels, kernel_size, kernel_size), dtype=jnp.float32)
    gamma = jnp.ones((out_channels,), jnp.float32)
    beta = jnp.zeros((out_channels,), jnp.float32)

    fwd = jax.jit(functools.partial(
        discriminator_cnn_block, stride=stride, padding=padding,
        kernel_size=kernel_size, batch_normalize=True, leaky_relu=True))
    out = jax.block_until_ready(fwd(x, weight, gamma, beta))

    # Reference with the same bf16 conv-operand precision as the kernel's MXU path.
    x_bf = x.astype(jnp.bfloat16).astype(jnp.float32)
    w_bf = weight.astype(jnp.bfloat16).astype(jnp.float32)
    ref_bf = reference(x_bf, w_bf, gamma, beta, stride=stride, padding=padding,
                       kernel_size=kernel_size)
    # Full-f32 reference (the PyTorch module's math) with a bf16-appropriate tol.
    ref_f32 = reference(x, weight, gamma, beta, stride=stride, padding=padding,
                        kernel_size=kernel_size)

    assert out.shape == (N, out_channels, 8, 8), out.shape
    err_bf = float(jnp.max(jnp.abs(out - ref_bf)))
    err_f32 = float(jnp.max(jnp.abs(out - ref_f32)))
    assert jnp.allclose(out, ref_bf, atol=5e-3, rtol=5e-3), err_bf
    assert jnp.allclose(out, ref_f32, atol=5e-2, rtol=5e-2), err_f32
    print("KERNEL_OK")
</pallas_src>

<mosaic_0001>
module attributes {stable_mosaic.version = 11 : i64} {
  func.func @_stats_kernel(%arg0: i32, %arg1: memref<4x9x9x4xbf16, #tpu.memory_space<vmem>>, %arg2: memref<16x4x8xbf16, #tpu.memory_space<vmem>>, %arg3: memref<1x2x8xf32, #tpu.memory_space<vmem>>) attributes {dimension_semantics = [#tpu.dimension_semantics<parallel>], iteration_bounds = array<i64: 2>, scalar_prefetch = 0 : i64, scratch_operands = 0 : i64, tpu.core_type = #tpu.core_type<tc>, window_params = [{transform_indices = @transform_0, window_bounds = array<i64: 4, 9, 9, 4>}, {pipeline_mode = #tpu.pipeline_mode<synchronous>, transform_indices = @transform_1, window_bounds = array<i64: 16, 4, 8>}, {transform_indices = @transform_2, window_bounds = array<i64: 1, 2, 8>}]} {
    %cst = arith.constant 0.000000e+00 : f32
    %0 = vector.broadcast %cst : f32 to vector<64x8xf32>
    %c0 = arith.constant 0 : index
    %c0_0 = arith.constant 0 : index
    %c0_1 = arith.constant 0 : index
    %c0_2 = arith.constant 0 : index
    %1 = vector.load %arg1[%c0, %c0_0, %c0_1, %c0_2] : memref<4x9x9x4xbf16, #tpu.memory_space<vmem>>, vector<1x8x8x4xbf16>
    %2 = vector.shape_cast %1 : vector<1x8x8x4xbf16> to vector<8x8x4xbf16>
    %3 = vector.shape_cast %2 : vector<8x8x4xbf16> to vector<64x4xbf16>
    %c0_3 = arith.constant 0 : index
    %c0_4 = arith.constant 0 : index
    %c0_5 = arith.constant 0 : index
    %4 = vector.load %arg2[%c0_3, %c0_4, %c0_5] : memref<16x4x8xbf16, #tpu.memory_space<vmem>>, vector<1x4x8xbf16>
    %5 = vector.shape_cast %4 : vector<1x4x8xbf16> to vector<4x8xbf16>
    %cst_6 = arith.constant dense<0.000000e+00> : vector<64x8xf32>
    %6 = tpu.matmul %3, %5, %cst_6 {dimension_numbers = #tpu.dot_dimension_numbers<[1], [0], [0], [1], [0, 0, 1, 1], [], []>} : vector<64x4xbf16>, vector<4x8xbf16>, vector<64x8xf32> -> vector<64x8xf32>
    %7 = arith.addf %0, %6 : vector<64x8xf32>
    %c1 = arith.constant 1 : index
    %c0_7 = arith.constant 0 : index
    %c0_8 = arith.constant 0 : index
    %c0_9 = arith.constant 0 : index
    %8 = vector.load %arg1[%c1, %c0_7, %c0_8, %c0_9] : memref<4x9x9x4xbf16, #tpu.memory_space<vmem>>, vector<1x8x8x4xbf16>
    %9 = vector.shape_cast %8 : vector<1x8x8x4xbf16> to vector<8x8x4xbf16>
    %10 = vector.shape_cast %9 : vector<8x8x4xbf16> to vector<64x4xbf16>
    %c1_10 = arith.constant 1 : index
    %c0_11 = arith.constant 0 : index
    %c0_12 = arith.constant 0 : index
    %11 = vector.load %arg2[%c1_10, %c0_11, %c0_12] : memref<16x4x8xbf16, #tpu.memory_space<vmem>>, vector<1x4x8xbf16>
    %12 = vector.shape_cast %11 : vector<1x4x8xbf16> to vector<4x8xbf16>
    %cst_13 = arith.constant dense<0.000000e+00> : vector<64x8xf32>
    %13 = tpu.matmul %10, %12, %cst_13 {dimension_numbers = #tpu.dot_dimension_numbers<[1], [0], [0], [1], [0, 0, 1, 1], [], []>} : vector<64x4xbf16>, vector<4x8xbf16>, vector<64x8xf32> -> vector<64x8xf32>
    %14 = arith.addf %7, %13 : vector<64x8xf32>
    %c0_14 = arith.constant 0 : index
    %c0_15 = arith.constant 0 : index
    %c1_16 = arith.constant 1 : index
    %c0_17 = arith.constant 0 : index
    %15 = vector.load %arg1[%c0_14, %c0_15, %c1_16, %c0_17] : memref<4x9x9x4xbf16, #tpu.memory_space<vmem>>, vector<1x8x8x4xbf16>
    %16 = vector.shape_cast %15 : vector<1x8x8x4xbf16> to vector<8x8x4xbf16>
    %17 = vector.shape_cast %16 : vector<8x8x4xbf16> to vector<64x4xbf16>
    %c2 = arith.constant 2 : index
    %c0_18 = arith.constant 0 : index
    %c0_19 = arith.constant 0 : index
    %18 = vector.load %arg2[%c2, %c0_18, %c0_19] : memref<16x4x8xbf16, #tpu.memory_space<vmem>>, vector<1x4x8xbf16>
    %19 = vector.shape_cast %18 : vector<1x4x8xbf16> to vector<4x8xbf16>
    %cst_20 = arith.constant dense<0.000000e+00> : vector<64x8xf32>
    %20 = tpu.matmul %17, %19, %cst_20 {dimension_numbers = #tpu.dot_dimension_numbers<[1], [0], [0], [1], [0, 0, 1, 1], [], []>} : vector<64x4xbf16>, vector<4x8xbf16>, vector<64x8xf32> -> vector<64x8xf32>
    %21 = arith.addf %14, %20 : vector<64x8xf32>
    %c1_21 = arith.constant 1 : index
    %c0_22 = arith.constant 0 : index
    %c1_23 = arith.constant 1 : index
    %c0_24 = arith.constant 0 : index
    %22 = vector.load %arg1[%c1_21, %c0_22, %c1_23, %c0_24] : memref<4x9x9x4xbf16, #tpu.memory_space<vmem>>, vector<1x8x8x4xbf16>
    %23 = vector.shape_cast %22 : vector<1x8x8x4xbf16> to vector<8x8x4xbf16>
    %24 = vector.shape_cast %23 : vector<8x8x4xbf16> to vector<64x4xbf16>
    %c3 = arith.constant 3 : index
    %c0_25 = arith.constant 0 : index
    %c0_26 = arith.constant 0 : index
    %25 = vector.load %arg2[%c3, %c0_25, %c0_26] : memref<16x4x8xbf16, #tpu.memory_space<vmem>>, vector<1x4x8xbf16>
    %26 = vector.shape_cast %25 : vector<1x4x8xbf16> to vector<4x8xbf16>
    %cst_27 = arith.constant dense<0.000000e+00> : vector<64x8xf32>
    %27 = tpu.matmul %24, %26, %cst_27 {dimension_numbers = #tpu.dot_dimension_numbers<[1], [0], [0], [1], [0, 0, 1, 1], [], []>} : vector<64x4xbf16>, vector<4x8xbf16>, vector<64x8xf32> -> vector<64x8xf32>
    %28 = arith.addf %21, %27 : vector<64x8xf32>
    %c2_28 = arith.constant 2 : index
    %c0_29 = arith.constant 0 : index
    %c0_30 = arith.constant 0 : index
    %c0_31 = arith.constant 0 : index
    %29 = vector.load %arg1[%c2_28, %c0_29, %c0_30, %c0_31] : memref<4x9x9x4xbf16, #tpu.memory_space<vmem>>, vector<1x8x8x4xbf16>
    %30 = vector.shape_cast %29 : vector<1x8x8x4xbf16> to vector<8x8x4xbf16>
    %31 = vector.shape_cast %30 : vector<8x8x4xbf16> to vector<64x4xbf16>
    %c4 = arith.constant 4 : index
    %c0_32 = arith.constant 0 : index
    %c0_33 = arith.constant 0 : index
    %32 = vector.load %arg2[%c4, %c0_32, %c0_33] : memref<16x4x8xbf16, #tpu.memory_space<vmem>>, vector<1x4x8xbf16>
    %33 = vector.shape_cast %32 : vector<1x4x8xbf16> to vector<4x8xbf16>
    %cst_34 = arith.constant dense<0.000000e+00> : vector<64x8xf32>
    %34 = tpu.matmul %31, %33, %cst_34 {dimension_numbers = #tpu.dot_dimension_numbers<[1], [0], [0], [1], [0, 0, 1, 1], [], []>} : vector<64x4xbf16>, vector<4x8xbf16>, vector<64x8xf32> -> vector<64x8xf32>
    %35 = arith.addf %28, %34 : vector<64x8xf32>
    %c3_35 = arith.constant 3 : index
    %c0_36 = arith.constant 0 : index
    %c0_37 = arith.constant 0 : index
    %c0_38 = arith.constant 0 : index
    %36 = vector.load %arg1[%c3_35, %c0_36, %c0_37, %c0_38] : memref<4x9x9x4xbf16, #tpu.memory_space<vmem>>, vector<1x8x8x4xbf16>
    %37 = vector.shape_cast %36 : vector<1x8x8x4xbf16> to vector<8x8x4xbf16>
    %38 = vector.shape_cast %37 : vector<8x8x4xbf16> to vector<64x4xbf16>
    %c5 = arith.constant 5 : index
    %c0_39 = arith.constant 0 : index
    %c0_40 = arith.constant 0 : index
    %39 = vector.load %arg2[%c5, %c0_39, %c0_40] : memref<16x4x8xbf16, #tpu.memory_space<vmem>>, vector<1x4x8xbf16>
    %40 = vector.shape_cast %39 : vector<1x4x8xbf16> to vector<4x8xbf16>
    %cst_41 = arith.constant dense<0.000000e+00> : vector<64x8xf32>
    %41 = tpu.matmul %38, %40, %cst_41 {dimension_numbers = #tpu.dot_dimension_numbers<[1], [0], [0], [1], [0, 0, 1, 1], [], []>} : vector<64x4xbf16>, vector<4x8xbf16>, vector<64x8xf32> -> vector<64x8xf32>
    %42 = arith.addf %35, %41 : vector<64x8xf32>
    %c2_42 = arith.constant 2 : index
    %c0_43 = arith.constant 0 : index
    %c1_44 = arith.constant 1 : index
    %c0_45 = arith.constant 0 : index
    %43 = vector.load %arg1[%c2_42, %c0_43, %c1_44, %c0_45] : memref<4x9x9x4xbf16, #tpu.memory_space<vmem>>, vector<1x8x8x4xbf16>
    %44 = vector.shape_cast %43 : vector<1x8x8x4xbf16> to vector<8x8x4xbf16>
    %45 = vector.shape_cast %44 : vector<8x8x4xbf16> to vector<64x4xbf16>
    %c6 = arith.constant 6 : index
    %c0_46 = arith.constant 0 : index
    %c0_47 = arith.constant 0 : index
    %46 = vector.load %arg2[%c6, %c0_46, %c0_47] : memref<16x4x8xbf16, #tpu.memory_space<vmem>>, vector<1x4x8xbf16>
    %47 = vector.shape_cast %46 : vector<1x4x8xbf16> to vector<4x8xbf16>
    %cst_48 = arith.constant dense<0.000000e+00> : vector<64x8xf32>
    %48 = tpu.matmul %45, %47, %cst_48 {dimension_numbers = #tpu.dot_dimension_numbers<[1], [0], [0], [1], [0, 0, 1, 1], [], []>} : vector<64x4xbf16>, vector<4x8xbf16>, vector<64x8xf32> -> vector<64x8xf32>
    %49 = arith.addf %42, %48 : vector<64x8xf32>
    %c3_49 = arith.constant 3 : index
    %c0_50 = arith.constant 0 : index
    %c1_51 = arith.constant 1 : index
    %c0_52 = arith.constant 0 : index
    %50 = vector.load %arg1[%c3_49, %c0_50, %c1_51, %c0_52] : memref<4x9x9x4xbf16, #tpu.memory_space<vmem>>, vector<1x8x8x4xbf16>
    %51 = vector.shape_cast %50 : vector<1x8x8x4xbf16> to vector<8x8x4xbf16>
    %52 = vector.shape_cast %51 : vector<8x8x4xbf16> to vector<64x4xbf16>
    %c7 = arith.constant 7 : index
    %c0_53 = arith.constant 0 : index
    %c0_54 = arith.constant 0 : index
    %53 = vector.load %arg2[%c7, %c0_53, %c0_54] : memref<16x4x8xbf16, #tpu.memory_space<vmem>>, vector<1x4x8xbf16>
    %54 = vector.shape_cast %53 : vector<1x4x8xbf16> to vector<4x8xbf16>
    %cst_55 = arith.constant dense<0.000000e+00> : vector<64x8xf32>
    %55 = tpu.matmul %52, %54, %cst_55 {dimension_numbers = #tpu.dot_dimension_numbers<[1], [0], [0], [1], [0, 0, 1, 1], [], []>} : vector<64x4xbf16>, vector<4x8xbf16>, vector<64x8xf32> -> vector<64x8xf32>
    %56 = arith.addf %49, %55 : vector<64x8xf32>
    %c0_56 = arith.constant 0 : index
    %c1_57 = arith.constant 1 : index
    %c0_58 = arith.constant 0 : index
    %c0_59 = arith.constant 0 : index
    %57 = vector.load %arg1[%c0_56, %c1_57, %c0_58, %c0_59] : memref<4x9x9x4xbf16, #tpu.memory_space<vmem>>, vector<1x8x8x4xbf16>
    %58 = vector.shape_cast %57 : vector<1x8x8x4xbf16> to vector<8x8x4xbf16>
    %59 = vector.shape_cast %58 : vector<8x8x4xbf16> to vector<64x4xbf16>
    %c8 = arith.constant 8 : index
    %c0_60 = arith.constant 0 : index
    %c0_61 = arith.constant 0 : index
    %60 = vector.load %arg2[%c8, %c0_60, %c0_61] : memref<16x4x8xbf16, #tpu.memory_space<vmem>>, vector<1x4x8xbf16>
    %61 = vector.shape_cast %60 : vector<1x4x8xbf16> to vector<4x8xbf16>
    %cst_62 = arith.constant dense<0.000000e+00> : vector<64x8xf32>
    %62 = tpu.matmul %59, %61, %cst_62 {dimension_numbers = #tpu.dot_dimension_numbers<[1], [0], [0], [1], [0, 0, 1, 1], [], []>} : vector<64x4xbf16>, vector<4x8xbf16>, vector<64x8xf32> -> vector<64x8xf32>
    %63 = arith.addf %56, %62 : vector<64x8xf32>
    %c1_63 = arith.constant 1 : index
    %c1_64 = arith.constant 1 : index
    %c0_65 = arith.constant 0 : index
    %c0_66 = arith.constant 0 : index
    %64 = vector.load %arg1[%c1_63, %c1_64, %c0_65, %c0_66] : memref<4x9x9x4xbf16, #tpu.memory_space<vmem>>, vector<1x8x8x4xbf16>
    %65 = vector.shape_cast %64 : vector<1x8x8x4xbf16> to vector<8x8x4xbf16>
    %66 = vector.shape_cast %65 : vector<8x8x4xbf16> to vector<64x4xbf16>
    %c9 = arith.constant 9 : index
    %c0_67 = arith.constant 0 : index
    %c0_68 = arith.constant 0 : index
    %67 = vector.load %arg2[%c9, %c0_67, %c0_68] : memref<16x4x8xbf16, #tpu.memory_space<vmem>>, vector<1x4x8xbf16>
    %68 = vector.shape_cast %67 : vector<1x4x8xbf16> to vector<4x8xbf16>
    %cst_69 = arith.constant dense<0.000000e+00> : vector<64x8xf32>
    %69 = tpu.matmul %66, %68, %cst_69 {dimension_numbers = #tpu.dot_dimension_numbers<[1], [0], [0], [1], [0, 0, 1, 1], [], []>} : vector<64x4xbf16>, vector<4x8xbf16>, vector<64x8xf32> -> vector<64x8xf32>
    %70 = arith.addf %63, %69 : vector<64x8xf32>
    %c0_70 = arith.constant 0 : index
    %c1_71 = arith.constant 1 : index
    %c1_72 = arith.constant 1 : index
    %c0_73 = arith.constant 0 : index
    %71 = vector.load %arg1[%c0_70, %c1_71, %c1_72, %c0_73] : memref<4x9x9x4xbf16, #tpu.memory_space<vmem>>, vector<1x8x8x4xbf16>
    %72 = vector.shape_cast %71 : vector<1x8x8x4xbf16> to vector<8x8x4xbf16>
    %73 = vector.shape_cast %72 : vector<8x8x4xbf16> to vector<64x4xbf16>
    %c10 = arith.constant 10 : index
    %c0_74 = arith.constant 0 : index
    %c0_75 = arith.constant 0 : index
    %74 = vector.load %arg2[%c10, %c0_74, %c0_75] : memref<16x4x8xbf16, #tpu.memory_space<vmem>>, vector<1x4x8xbf16>
    %75 = vector.shape_cast %74 : vector<1x4x8xbf16> to vector<4x8xbf16>
    %cst_76 = arith.constant dense<0.000000e+00> : vector<64x8xf32>
    %76 = tpu.matmul %73, %75, %cst_76 {dimension_numbers = #tpu.dot_dimension_numbers<[1], [0], [0], [1], [0, 0, 1, 1], [], []>} : vector<64x4xbf16>, vector<4x8xbf16>, vector<64x8xf32> -> vector<64x8xf32>
    %77 = arith.addf %70, %76 : vector<64x8xf32>
    %c1_77 = arith.constant 1 : index
    %c1_78 = arith.constant 1 : index
    %c1_79 = arith.constant 1 : index
    %c0_80 = arith.constant 0 : index
    %78 = vector.load %arg1[%c1_77, %c1_78, %c1_79, %c0_80] : memref<4x9x9x4xbf16, #tpu.memory_space<vmem>>, vector<1x8x8x4xbf16>
    %79 = vector.shape_cast %78 : vector<1x8x8x4xbf16> to vector<8x8x4xbf16>
    %80 = vector.shape_cast %79 : vector<8x8x4xbf16> to vector<64x4xbf16>
    %c11 = arith.constant 11 : index
    %c0_81 = arith.constant 0 : index
    %c0_82 = arith.constant 0 : index
    %81 = vector.load %arg2[%c11, %c0_81, %c0_82] : memref<16x4x8xbf16, #tpu.memory_space<vmem>>, vector<1x4x8xbf16>
    %82 = vector.shape_cast %81 : vector<1x4x8xbf16> to vector<4x8xbf16>
    %cst_83 = arith.constant dense<0.000000e+00> : vector<64x8xf32>
    %83 = tpu.matmul %80, %82, %cst_83 {dimension_numbers = #tpu.dot_dimension_numbers<[1], [0], [0], [1], [0, 0, 1, 1], [], []>} : vector<64x4xbf16>, vector<4x8xbf16>, vector<64x8xf32> -> vector<64x8xf32>
    %84 = arith.addf %77, %83 : vector<64x8xf32>
    %c2_84 = arith.constant 2 : index
    %c1_85 = arith.constant 1 : index
    %c0_86 = arith.constant 0 : index
    %c0_87 = arith.constant 0 : index
    %85 = vector.load %arg1[%c2_84, %c1_85, %c0_86, %c0_87] : memref<4x9x9x4xbf16, #tpu.memory_space<vmem>>, vector<1x8x8x4xbf16>
    %86 = vector.shape_cast %85 : vector<1x8x8x4xbf16> to vector<8x8x4xbf16>
    %87 = vector.shape_cast %86 : vector<8x8x4xbf16> to vector<64x4xbf16>
    %c12 = arith.constant 12 : index
    %c0_88 = arith.constant 0 : index
    %c0_89 = arith.constant 0 : index
    %88 = vector.load %arg2[%c12, %c0_88, %c0_89] : memref<16x4x8xbf16, #tpu.memory_space<vmem>>, vector<1x4x8xbf16>
    %89 = vector.shape_cast %88 : vector<1x4x8xbf16> to vector<4x8xbf16>
    %cst_90 = arith.constant dense<0.000000e+00> : vector<64x8xf32>
    %90 = tpu.matmul %87, %89, %cst_90 {dimension_numbers = #tpu.dot_dimension_numbers<[1], [0], [0], [1], [0, 0, 1, 1], [], []>} : vector<64x4xbf16>, vector<4x8xbf16>, vector<64x8xf32> -> vector<64x8xf32>
    %91 = arith.addf %84, %90 : vector<64x8xf32>
    %c3_91 = arith.constant 3 : index
    %c1_92 = arith.constant 1 : index
    %c0_93 = arith.constant 0 : index
    %c0_94 = arith.constant 0 : index
    %92 = vector.load %arg1[%c3_91, %c1_92, %c0_93, %c0_94] : memref<4x9x9x4xbf16, #tpu.memory_space<vmem>>, vector<1x8x8x4xbf16>
    %93 = vector.shape_cast %92 : vector<1x8x8x4xbf16> to vector<8x8x4xbf16>
    %94 = vector.shape_cast %93 : vector<8x8x4xbf16> to vector<64x4xbf16>
    %c13 = arith.constant 13 : index
    %c0_95 = arith.constant 0 : index
    %c0_96 = arith.constant 0 : index
    %95 = vector.load %arg2[%c13, %c0_95, %c0_96] : memref<16x4x8xbf16, #tpu.memory_space<vmem>>, vector<1x4x8xbf16>
    %96 = vector.shape_cast %95 : vector<1x4x8xbf16> to vector<4x8xbf16>
    %cst_97 = arith.constant dense<0.000000e+00> : vector<64x8xf32>
    %97 = tpu.matmul %94, %96, %cst_97 {dimension_numbers = #tpu.dot_dimension_numbers<[1], [0], [0], [1], [0, 0, 1, 1], [], []>} : vector<64x4xbf16>, vector<4x8xbf16>, vector<64x8xf32> -> vector<64x8xf32>
    %98 = arith.addf %91, %97 : vector<64x8xf32>
    %c2_98 = arith.constant 2 : index
    %c1_99 = arith.constant 1 : index
    %c1_100 = arith.constant 1 : index
    %c0_101 = arith.constant 0 : index
    %99 = vector.load %arg1[%c2_98, %c1_99, %c1_100, %c0_101] : memref<4x9x9x4xbf16, #tpu.memory_space<vmem>>, vector<1x8x8x4xbf16>
    %100 = vector.shape_cast %99 : vector<1x8x8x4xbf16> to vector<8x8x4xbf16>
    %101 = vector.shape_cast %100 : vector<8x8x4xbf16> to vector<64x4xbf16>
    %c14 = arith.constant 14 : index
    %c0_102 = arith.constant 0 : index
    %c0_103 = arith.constant 0 : index
    %102 = vector.load %arg2[%c14, %c0_102, %c0_103] : memref<16x4x8xbf16, #tpu.memory_space<vmem>>, vector<1x4x8xbf16>
    %103 = vector.shape_cast %102 : vector<1x4x8xbf16> to vector<4x8xbf16>
    %cst_104 = arith.constant dense<0.000000e+00> : vector<64x8xf32>
    %104 = tpu.matmul %101, %103, %cst_104 {dimension_numbers = #tpu.dot_dimension_numbers<[1], [0], [0], [1], [0, 0, 1, 1], [], []>} : vector<64x4xbf16>, vector<4x8xbf16>, vector<64x8xf32> -> vector<64x8xf32>
    %105 = arith.addf %98, %104 : vector<64x8xf32>
    %c3_105 = arith.constant 3 : index
    %c1_106 = arith.constant 1 : index
    %c1_107 = arith.constant 1 : index
    %c0_108 = arith.constant 0 : index
    %106 = vector.load %arg1[%c3_105, %c1_106, %c1_107, %c0_108] : memref<4x9x9x4xbf16, #tpu.memory_space<vmem>>, vector<1x8x8x4xbf16>
    %107 = vector.shape_cast %106 : vector<1x8x8x4xbf16> to vector<8x8x4xbf16>
    %108 = vector.shape_cast %107 : vector<8x8x4xbf16> to vector<64x4xbf16>
    %c15 = arith.constant 15 : index
    %c0_109 = arith.constant 0 : index
    %c0_110 = arith.constant 0 : index
    %109 = vector.load %arg2[%c15, %c0_109, %c0_110] : memref<16x4x8xbf16, #tpu.memory_space<vmem>>, vector<1x4x8xbf16>
    %110 = vector.shape_cast %109 : vector<1x4x8xbf16> to vector<4x8xbf16>
    %cst_111 = arith.constant dense<0.000000e+00> : vector<64x8xf32>
    %111 = tpu.matmul %108, %110, %cst_111 {dimension_numbers = #tpu.dot_dimension_numbers<[1], [0], [0], [1], [0, 0, 1, 1], [], []>} : vector<64x4xbf16>, vector<4x8xbf16>, vector<64x8xf32> -> vector<64x8xf32>
    %112 = arith.addf %105, %111 : vector<64x8xf32>
    %cst_112 = arith.constant dense<0.000000e+00> : vector<8xf32>
    %113 = vector.multi_reduction <add>, %112, %cst_112 [0] : vector<64x8xf32> to vector<8xf32>
    %114 = vector.shape_cast %113 : vector<8xf32> to vector<1x8xf32>
    %115 = arith.mulf %112, %112 : vector<64x8xf32>
    %cst_113 = arith.constant dense<0.000000e+00> : vector<8xf32>
    %116 = vector.multi_reduction <add>, %115, %cst_113 [0] : vector<64x8xf32> to vector<8xf32>
    %117 = vector.shape_cast %116 : vector<8xf32> to vector<1x8xf32>
    %118 = tpu.concatenate %114, %117 in 0 : vector<1x8xf32>, vector<1x8xf32> -> vector<2x8xf32>
    %c0_114 = arith.constant 0 : index
    %c0_115 = arith.constant 0 : index
    %c0_116 = arith.constant 0 : index
    %119 = vector.load %arg3[%c0_114, %c0_115, %c0_116] : memref<1x2x8xf32, #tpu.memory_space<vmem>>, vector<1x2x8xf32>
    %120 = vector.shape_cast %119 : vector<1x2x8xf32> to vector<2x8xf32>
    %121 = vector.shape_cast %118 : vector<2x8xf32> to vector<1x2x8xf32>
    tpu.vector_store %arg3[%c0_114, %c0_115, %c0_116], %121 {strides = array<i32>} : memref<1x2x8xf32, #tpu.memory_space<vmem>>, vector<1x2x8xf32>,
    return
  }
  func.func @transform_0(%arg0: i32) -> (i32, i32, i32, i32) {
    %c0_i32 = arith.constant 0 : i32
    %c0_i32_0 = arith.constant 0 : i32
    %c0_i32_1 = arith.constant 0 : i32
    %c0_i32_2 = arith.constant 0 : i32
    return %arg0, %c0_i32, %c0_i32_0, %c0_i32_1 : i32, i32, i32, i32
  }
  func.func @transform_1(%arg0: i32) -> (i32, i32, i32) {
    %c0_i32 = arith.constant 0 : i32
    %c0_i32_0 = arith.constant 0 : i32
    %c0_i32_1 = arith.constant 0 : i32
    %c0_i32_2 = arith.constant 0 : i32
    return %c0_i32, %c0_i32_0, %c0_i32_1 : i32, i32, i32
  }
  func.func @transform_2(%arg0: i32) -> (i32, i32, i32) {
    %c0_i32 = arith.constant 0 : i32
    %c0_i32_0 = arith.constant 0 : i32
    %c0_i32_1 = arith.constant 0 : i32
    return %arg0, %c0_i32, %c0_i32_0 : i32, i32, i32
  }
}

module attributes {stable_mosaic.version = 11 : i64} {
  func.func @_conv_bn_act_kernel(%arg0: i32, %arg1: memref<4x9x9x4xbf16, #tpu.memory_space<vmem>>, %arg2: memref<16x4x8xbf16, #tpu.memory_space<vmem>>, %arg3: memref<1x8xf32, #tpu.memory_space<vmem>>, %arg4: memref<1x8xf32, #tpu.memory_space<vmem>>, %arg5: memref<1x8x8x8xf32, #tpu.memory_space<vmem>>) attributes {dimension_semantics = [#tpu.dimension_semantics<parallel>], iteration_bounds = array<i64: 2>, scalar_prefetch = 0 : i64, scratch_operands = 0 : i64, tpu.core_type = #tpu.core_type<tc>, window_params = [{transform_indices = @transform_0, window_bounds = array<i64: 4, 9, 9, 4>}, {pipeline_mode = #tpu.pipeline_mode<synchronous>, transform_indices = @transform_1, window_bounds = array<i64: 16, 4, 8>}, {pipeline_mode = #tpu.pipeline_mode<synchronous>, transform_indices = @transform_2, window_bounds = array<i64: 1, 8>}, {pipeline_mode = #tpu.pipeline_mode<synchronous>, transform_indices = @transform_3, window_bounds = array<i64: 1, 8>}, {transform_indices = @transform_4, window_bounds = array<i64: 1, 8, 8, 8>}]} {
    %cst = arith.constant 0.000000e+00 : f32
    %0 = vector.broadcast %cst : f32 to vector<64x8xf32>
    %c0 = arith.constant 0 : index
    %c0_0 = arith.constant 0 : index
    %c0_1 = arith.constant 0 : index
    %c0_2 = arith.constant 0 : index
    %1 = vector.load %arg1[%c0, %c0_0, %c0_1, %c0_2] : memref<4x9x9x4xbf16, #tpu.memory_space<vmem>>, vector<1x8x8x4xbf16>
    %2 = vector.shape_cast %1 : vector<1x8x8x4xbf16> to vector<8x8x4xbf16>
    %3 = vector.shape_cast %2 : vector<8x8x4xbf16> to vector<64x4xbf16>
    %c0_3 = arith.constant 0 : index
    %c0_4 = arith.constant 0 : index
    %c0_5 = arith.constant 0 : index
    %4 = vector.load %arg2[%c0_3, %c0_4, %c0_5] : memref<16x4x8xbf16, #tpu.memory_space<vmem>>, vector<1x4x8xbf16>
    %5 = vector.shape_cast %4 : vector<1x4x8xbf16> to vector<4x8xbf16>
    %cst_6 = arith.constant dense<0.000000e+00> : vector<64x8xf32>
    %6 = tpu.matmul %3, %5, %cst_6 {dimension_numbers = #tpu.dot_dimension_numbers<[1], [0], [0], [1], [0, 0, 1, 1], [], []>} : vector<64x4xbf16>, vector<4x8xbf16>, vector<64x8xf32> -> vector<64x8xf32>
    %7 = arith.addf %0, %6 : vector<64x8xf32>
    %c1 = arith.constant 1 : index
    %c0_7 = arith.constant 0 : index
    %c0_8 = arith.constant 0 : index
    %c0_9 = arith.constant 0 : index
    %8 = vector.load %arg1[%c1, %c0_7, %c0_8, %c0_9] : memref<4x9x9x4xbf16, #tpu.memory_space<vmem>>, vector<1x8x8x4xbf16>
    %9 = vector.shape_cast %8 : vector<1x8x8x4xbf16> to vector<8x8x4xbf16>
    %10 = vector.shape_cast %9 : vector<8x8x4xbf16> to vector<64x4xbf16>
    %c1_10 = arith.constant 1 : index
    %c0_11 = arith.constant 0 : index
    %c0_12 = arith.constant 0 : index
    %11 = vector.load %arg2[%c1_10, %c0_11, %c0_12] : memref<16x4x8xbf16, #tpu.memory_space<vmem>>, vector<1x4x8xbf16>
    %12 = vector.shape_cast %11 : vector<1x4x8xbf16> to vector<4x8xbf16>
    %cst_13 = arith.constant dense<0.000000e+00> : vector<64x8xf32>
    %13 = tpu.matmul %10, %12, %cst_13 {dimension_numbers = #tpu.dot_dimension_numbers<[1], [0], [0], [1], [0, 0, 1, 1], [], []>} : vector<64x4xbf16>, vector<4x8xbf16>, vector<64x8xf32> -> vector<64x8xf32>
    %14 = arith.addf %7, %13 : vector<64x8xf32>
    %c0_14 = arith.constant 0 : index
    %c0_15 = arith.constant 0 : index
    %c1_16 = arith.constant 1 : index
    %c0_17 = arith.constant 0 : index
    %15 = vector.load %arg1[%c0_14, %c0_15, %c1_16, %c0_17] : memref<4x9x9x4xbf16, #tpu.memory_space<vmem>>, vector<1x8x8x4xbf16>
    %16 = vector.shape_cast %15 : vector<1x8x8x4xbf16> to vector<8x8x4xbf16>
    %17 = vector.shape_cast %16 : vector<8x8x4xbf16> to vector<64x4xbf16>
    %c2 = arith.constant 2 : index
    %c0_18 = arith.constant 0 : index
    %c0_19 = arith.constant 0 : index
    %18 = vector.load %arg2[%c2, %c0_18, %c0_19] : memref<16x4x8xbf16, #tpu.memory_space<vmem>>, vector<1x4x8xbf16>
    %19 = vector.shape_cast %18 : vector<1x4x8xbf16> to vector<4x8xbf16>
    %cst_20 = arith.constant dense<0.000000e+00> : vector<64x8xf32>
    %20 = tpu.matmul %17, %19, %cst_20 {dimension_numbers = #tpu.dot_dimension_numbers<[1], [0], [0], [1], [0, 0, 1, 1], [], []>} : vector<64x4xbf16>, vector<4x8xbf16>, vector<64x8xf32> -> vector<64x8xf32>
    %21 = arith.addf %14, %20 : vector<64x8xf32>
    %c1_21 = arith.constant 1 : index
    %c0_22 = arith.constant 0 : index
    %c1_23 = arith.constant 1 : index
    %c0_24 = arith.constant 0 : index
    %22 = vector.load %arg1[%c1_21, %c0_22, %c1_23, %c0_24] : memref<4x9x9x4xbf16, #tpu.memory_space<vmem>>, vector<1x8x8x4xbf16>
    %23 = vector.shape_cast %22 : vector<1x8x8x4xbf16> to vector<8x8x4xbf16>
    %24 = vector.shape_cast %23 : vector<8x8x4xbf16> to vector<64x4xbf16>
    %c3 = arith.constant 3 : index
    %c0_25 = arith.constant 0 : index
    %c0_26 = arith.constant 0 : index
    %25 = vector.load %arg2[%c3, %c0_25, %c0_26] : memref<16x4x8xbf16, #tpu.memory_space<vmem>>, vector<1x4x8xbf16>
    %26 = vector.shape_cast %25 : vector<1x4x8xbf16> to vector<4x8xbf16>
    %cst_27 = arith.constant dense<0.000000e+00> : vector<64x8xf32>
    %27 = tpu.matmul %24, %26, %cst_27 {dimension_numbers = #tpu.dot_dimension_numbers<[1], [0], [0], [1], [0, 0, 1, 1], [], []>} : vector<64x4xbf16>, vector<4x8xbf16>, vector<64x8xf32> -> vector<64x8xf32>
    %28 = arith.addf %21, %27 : vector<64x8xf32>
    %c2_28 = arith.constant 2 : index
    %c0_29 = arith.constant 0 : index
    %c0_30 = arith.constant 0 : index
    %c0_31 = arith.constant 0 : index
    %29 = vector.load %arg1[%c2_28, %c0_29, %c0_30, %c0_31] : memref<4x9x9x4xbf16, #tpu.memory_space<vmem>>, vector<1x8x8x4xbf16>
    %30 = vector.shape_cast %29 : vector<1x8x8x4xbf16> to vector<8x8x4xbf16>
    %31 = vector.shape_cast %30 : vector<8x8x4xbf16> to vector<64x4xbf16>
    %c4 = arith.constant 4 : index
    %c0_32 = arith.constant 0 : index
    %c0_33 = arith.constant 0 : index
    %32 = vector.load %arg2[%c4, %c0_32, %c0_33] : memref<16x4x8xbf16, #tpu.memory_space<vmem>>, vector<1x4x8xbf16>
    %33 = vector.shape_cast %32 : vector<1x4x8xbf16> to vector<4x8xbf16>
    %cst_34 = arith.constant dense<0.000000e+00> : vector<64x8xf32>
    %34 = tpu.matmul %31, %33, %cst_34 {dimension_numbers = #tpu.dot_dimension_numbers<[1], [0], [0], [1], [0, 0, 1, 1], [], []>} : vector<64x4xbf16>, vector<4x8xbf16>, vector<64x8xf32> -> vector<64x8xf32>
    %35 = arith.addf %28, %34 : vector<64x8xf32>
    %c3_35 = arith.constant 3 : index
    %c0_36 = arith.constant 0 : index
    %c0_37 = arith.constant 0 : index
    %c0_38 = arith.constant 0 : index
    %36 = vector.load %arg1[%c3_35, %c0_36, %c0_37, %c0_38] : memref<4x9x9x4xbf16, #tpu.memory_space<vmem>>, vector<1x8x8x4xbf16>
    %37 = vector.shape_cast %36 : vector<1x8x8x4xbf16> to vector<8x8x4xbf16>
    %38 = vector.shape_cast %37 : vector<8x8x4xbf16> to vector<64x4xbf16>
    %c5 = arith.constant 5 : index
    %c0_39 = arith.constant 0 : index
    %c0_40 = arith.constant 0 : index
    %39 = vector.load %arg2[%c5, %c0_39, %c0_40] : memref<16x4x8xbf16, #tpu.memory_space<vmem>>, vector<1x4x8xbf16>
    %40 = vector.shape_cast %39 : vector<1x4x8xbf16> to vector<4x8xbf16>
    %cst_41 = arith.constant dense<0.000000e+00> : vector<64x8xf32>
    %41 = tpu.matmul %38, %40, %cst_41 {dimension_numbers = #tpu.dot_dimension_numbers<[1], [0], [0], [1], [0, 0, 1, 1], [], []>} : vector<64x4xbf16>, vector<4x8xbf16>, vector<64x8xf32> -> vector<64x8xf32>
    %42 = arith.addf %35, %41 : vector<64x8xf32>
    %c2_42 = arith.constant 2 : index
    %c0_43 = arith.constant 0 : index
    %c1_44 = arith.constant 1 : index
    %c0_45 = arith.constant 0 : index
    %43 = vector.load %arg1[%c2_42, %c0_43, %c1_44, %c0_45] : memref<4x9x9x4xbf16, #tpu.memory_space<vmem>>, vector<1x8x8x4xbf16>
    %44 = vector.shape_cast %43 : vector<1x8x8x4xbf16> to vector<8x8x4xbf16>
    %45 = vector.shape_cast %44 : vector<8x8x4xbf16> to vector<64x4xbf16>
    %c6 = arith.constant 6 : index
    %c0_46 = arith.constant 0 : index
    %c0_47 = arith.constant 0 : index
    %46 = vector.load %arg2[%c6, %c0_46, %c0_47] : memref<16x4x8xbf16, #tpu.memory_space<vmem>>, vector<1x4x8xbf16>
    %47 = vector.shape_cast %46 : vector<1x4x8xbf16> to vector<4x8xbf16>
    %cst_48 = arith.constant dense<0.000000e+00> : vector<64x8xf32>
    %48 = tpu.matmul %45, %47, %cst_48 {dimension_numbers = #tpu.dot_dimension_numbers<[1], [0], [0], [1], [0, 0, 1, 1], [], []>} : vector<64x4xbf16>, vector<4x8xbf16>, vector<64x8xf32> -> vector<64x8xf32>
    %49 = arith.addf %42, %48 : vector<64x8xf32>
    %c3_49 = arith.constant 3 : index
    %c0_50 = arith.constant 0 : index
    %c1_51 = arith.constant 1 : index
    %c0_52 = arith.constant 0 : index
    %50 = vector.load %arg1[%c3_49, %c0_50, %c1_51, %c0_52] : memref<4x9x9x4xbf16, #tpu.memory_space<vmem>>, vector<1x8x8x4xbf16>
    %51 = vector.shape_cast %50 : vector<1x8x8x4xbf16> to vector<8x8x4xbf16>
    %52 = vector.shape_cast %51 : vector<8x8x4xbf16> to vector<64x4xbf16>
    %c7 = arith.constant 7 : index
    %c0_53 = arith.constant 0 : index
    %c0_54 = arith.constant 0 : index
    %53 = vector.load %arg2[%c7, %c0_53, %c0_54] : memref<16x4x8xbf16, #tpu.memory_space<vmem>>, vector<1x4x8xbf16>
    %54 = vector.shape_cast %53 : vector<1x4x8xbf16> to vector<4x8xbf16>
    %cst_55 = arith.constant dense<0.000000e+00> : vector<64x8xf32>
    %55 = tpu.matmul %52, %54, %cst_55 {dimension_numbers = #tpu.dot_dimension_numbers<[1], [0], [0], [1], [0, 0, 1, 1], [], []>} : vector<64x4xbf16>, vector<4x8xbf16>, vector<64x8xf32> -> vector<64x8xf32>
    %56 = arith.addf %49, %55 : vector<64x8xf32>
    %c0_56 = arith.constant 0 : index
    %c1_57 = arith.constant 1 : index
    %c0_58 = arith.constant 0 : index
    %c0_59 = arith.constant 0 : index
    %57 = vector.load %arg1[%c0_56, %c1_57, %c0_58, %c0_59] : memref<4x9x9x4xbf16, #tpu.memory_space<vmem>>, vector<1x8x8x4xbf16>
    %58 = vector.shape_cast %57 : vector<1x8x8x4xbf16> to vector<8x8x4xbf16>
    %59 = vector.shape_cast %58 : vector<8x8x4xbf16> to vector<64x4xbf16>
    %c8 = arith.constant 8 : index
    %c0_60 = arith.constant 0 : index
    %c0_61 = arith.constant 0 : index
    %60 = vector.load %arg2[%c8, %c0_60, %c0_61] : memref<16x4x8xbf16, #tpu.memory_space<vmem>>, vector<1x4x8xbf16>
    %61 = vector.shape_cast %60 : vector<1x4x8xbf16> to vector<4x8xbf16>
    %cst_62 = arith.constant dense<0.000000e+00> : vector<64x8xf32>
    %62 = tpu.matmul %59, %61, %cst_62 {dimension_numbers = #tpu.dot_dimension_numbers<[1], [0], [0], [1], [0, 0, 1, 1], [], []>} : vector<64x4xbf16>, vector<4x8xbf16>, vector<64x8xf32> -> vector<64x8xf32>
    %63 = arith.addf %56, %62 : vector<64x8xf32>
    %c1_63 = arith.constant 1 : index
    %c1_64 = arith.constant 1 : index
    %c0_65 = arith.constant 0 : index
    %c0_66 = arith.constant 0 : index
    %64 = vector.load %arg1[%c1_63, %c1_64, %c0_65, %c0_66] : memref<4x9x9x4xbf16, #tpu.memory_space<vmem>>, vector<1x8x8x4xbf16>
    %65 = vector.shape_cast %64 : vector<1x8x8x4xbf16> to vector<8x8x4xbf16>
    %66 = vector.shape_cast %65 : vector<8x8x4xbf16> to vector<64x4xbf16>
    %c9 = arith.constant 9 : index
    %c0_67 = arith.constant 0 : index
    %c0_68 = arith.constant 0 : index
    %67 = vector.load %arg2[%c9, %c0_67, %c0_68] : memref<16x4x8xbf16, #tpu.memory_space<vmem>>, vector<1x4x8xbf16>
    %68 = vector.shape_cast %67 : vector<1x4x8xbf16> to vector<4x8xbf16>
    %cst_69 = arith.constant dense<0.000000e+00> : vector<64x8xf32>
    %69 = tpu.matmul %66, %68, %cst_69 {dimension_numbers = #tpu.dot_dimension_numbers<[1], [0], [0], [1], [0, 0, 1, 1], [], []>} : vector<64x4xbf16>, vector<4x8xbf16>, vector<64x8xf32> -> vector<64x8xf32>
    %70 = arith.addf %63, %69 : vector<64x8xf32>
    %c0_70 = arith.constant 0 : index
    %c1_71 = arith.constant 1 : index
    %c1_72 = arith.constant 1 : index
    %c0_73 = arith.constant 0 : index
    %71 = vector.load %arg1[%c0_70, %c1_71, %c1_72, %c0_73] : memref<4x9x9x4xbf16, #tpu.memory_space<vmem>>, vector<1x8x8x4xbf16>
    %72 = vector.shape_cast %71 : vector<1x8x8x4xbf16> to vector<8x8x4xbf16>
    %73 = vector.shape_cast %72 : vector<8x8x4xbf16> to vector<64x4xbf16>
    %c10 = arith.constant 10 : index
    %c0_74 = arith.constant 0 : index
    %c0_75 = arith.constant 0 : index
    %74 = vector.load %arg2[%c10, %c0_74, %c0_75] : memref<16x4x8xbf16, #tpu.memory_space<vmem>>, vector<1x4x8xbf16>
    %75 = vector.shape_cast %74 : vector<1x4x8xbf16> to vector<4x8xbf16>
    %cst_76 = arith.constant dense<0.000000e+00> : vector<64x8xf32>
    %76 = tpu.matmul %73, %75, %cst_76 {dimension_numbers = #tpu.dot_dimension_numbers<[1], [0], [0], [1], [0, 0, 1, 1], [], []>} : vector<64x4xbf16>, vector<4x8xbf16>, vector<64x8xf32> -> vector<64x8xf32>
    %77 = arith.addf %70, %76 : vector<64x8xf32>
    %c1_77 = arith.constant 1 : index
    %c1_78 = arith.constant 1 : index
    %c1_79 = arith.constant 1 : index
    %c0_80 = arith.constant 0 : index
    %78 = vector.load %arg1[%c1_77, %c1_78, %c1_79, %c0_80] : memref<4x9x9x4xbf16, #tpu.memory_space<vmem>>, vector<1x8x8x4xbf16>
    %79 = vector.shape_cast %78 : vector<1x8x8x4xbf16> to vector<8x8x4xbf16>
    %80 = vector.shape_cast %79 : vector<8x8x4xbf16> to vector<64x4xbf16>
    %c11 = arith.constant 11 : index
    %c0_81 = arith.constant 0 : index
    %c0_82 = arith.constant 0 : index
    %81 = vector.load %arg2[%c11, %c0_81, %c0_82] : memref<16x4x8xbf16, #tpu.memory_space<vmem>>, vector<1x4x8xbf16>
    %82 = vector.shape_cast %81 : vector<1x4x8xbf16> to vector<4x8xbf16>
    %cst_83 = arith.constant dense<0.000000e+00> : vector<64x8xf32>
    %83 = tpu.matmul %80, %82, %cst_83 {dimension_numbers = #tpu.dot_dimension_numbers<[1], [0], [0], [1], [0, 0, 1, 1], [], []>} : vector<64x4xbf16>, vector<4x8xbf16>, vector<64x8xf32> -> vector<64x8xf32>
    %84 = arith.addf %77, %83 : vector<64x8xf32>
    %c2_84 = arith.constant 2 : index
    %c1_85 = arith.constant 1 : index
    %c0_86 = arith.constant 0 : index
    %c0_87 = arith.constant 0 : index
    %85 = vector.load %arg1[%c2_84, %c1_85, %c0_86, %c0_87] : memref<4x9x9x4xbf16, #tpu.memory_space<vmem>>, vector<1x8x8x4xbf16>
    %86 = vector.shape_cast %85 : vector<1x8x8x4xbf16> to vector<8x8x4xbf16>
    %87 = vector.shape_cast %86 : vector<8x8x4xbf16> to vector<64x4xbf16>
    %c12 = arith.constant 12 : index
    %c0_88 = arith.constant 0 : index
    %c0_89 = arith.constant 0 : index
    %88 = vector.load %arg2[%c12, %c0_88, %c0_89] : memref<16x4x8xbf16, #tpu.memory_space<vmem>>, vector<1x4x8xbf16>
    %89 = vector.shape_cast %88 : vector<1x4x8xbf16> to vector<4x8xbf16>
    %cst_90 = arith.constant dense<0.000000e+00> : vector<64x8xf32>
    %90 = tpu.matmul %87, %89, %cst_90 {dimension_numbers = #tpu.dot_dimension_numbers<[1], [0], [0], [1], [0, 0, 1, 1], [], []>} : vector<64x4xbf16>, vector<4x8xbf16>, vector<64x8xf32> -> vector<64x8xf32>
    %91 = arith.addf %84, %90 : vector<64x8xf32>
    %c3_91 = arith.constant 3 : index
    %c1_92 = arith.constant 1 : index
    %c0_93 = arith.constant 0 : index
    %c0_94 = arith.constant 0 : index
    %92 = vector.load %arg1[%c3_91, %c1_92, %c0_93, %c0_94] : memref<4x9x9x4xbf16, #tpu.memory_space<vmem>>, vector<1x8x8x4xbf16>
    %93 = vector.shape_cast %92 : vector<1x8x8x4xbf16> to vector<8x8x4xbf16>
    %94 = vector.shape_cast %93 : vector<8x8x4xbf16> to vector<64x4xbf16>
    %c13 = arith.constant 13 : index
    %c0_95 = arith.constant 0 : index
    %c0_96 = arith.constant 0 : index
    %95 = vector.load %arg2[%c13, %c0_95, %c0_96] : memref<16x4x8xbf16, #tpu.memory_space<vmem>>, vector<1x4x8xbf16>
    %96 = vector.shape_cast %95 : vector<1x4x8xbf16> to vector<4x8xbf16>
    %cst_97 = arith.constant dense<0.000000e+00> : vector<64x8xf32>
    %97 = tpu.matmul %94, %96, %cst_97 {dimension_numbers = #tpu.dot_dimension_numbers<[1], [0], [0], [1], [0, 0, 1, 1], [], []>} : vector<64x4xbf16>, vector<4x8xbf16>, vector<64x8xf32> -> vector<64x8xf32>
    %98 = arith.addf %91, %97 : vector<64x8xf32>
    %c2_98 = arith.constant 2 : index
    %c1_99 = arith.constant 1 : index
    %c1_100 = arith.constant 1 : index
    %c0_101 = arith.constant 0 : index
    %99 = vector.load %arg1[%c2_98, %c1_99, %c1_100, %c0_101] : memref<4x9x9x4xbf16, #tpu.memory_space<vmem>>, vector<1x8x8x4xbf16>
    %100 = vector.shape_cast %99 : vector<1x8x8x4xbf16> to vector<8x8x4xbf16>
    %101 = vector.shape_cast %100 : vector<8x8x4xbf16> to vector<64x4xbf16>
    %c14 = arith.constant 14 : index
    %c0_102 = arith.constant 0 : index
    %c0_103 = arith.constant 0 : index
    %102 = vector.load %arg2[%c14, %c0_102, %c0_103] : memref<16x4x8xbf16, #tpu.memory_space<vmem>>, vector<1x4x8xbf16>
    %103 = vector.shape_cast %102 : vector<1x4x8xbf16> to vector<4x8xbf16>
    %cst_104 = arith.constant dense<0.000000e+00> : vector<64x8xf32>
    %104 = tpu.matmul %101, %103, %cst_104 {dimension_numbers = #tpu.dot_dimension_numbers<[1], [0], [0], [1], [0, 0, 1, 1], [], []>} : vector<64x4xbf16>, vector<4x8xbf16>, vector<64x8xf32> -> vector<64x8xf32>
    %105 = arith.addf %98, %104 : vector<64x8xf32>
    %c3_105 = arith.constant 3 : index
    %c1_106 = arith.constant 1 : index
    %c1_107 = arith.constant 1 : index
    %c0_108 = arith.constant 0 : index
    %106 = vector.load %arg1[%c3_105, %c1_106, %c1_107, %c0_108] : memref<4x9x9x4xbf16, #tpu.memory_space<vmem>>, vector<1x8x8x4xbf16>
    %107 = vector.shape_cast %106 : vector<1x8x8x4xbf16> to vector<8x8x4xbf16>
    %108 = vector.shape_cast %107 : vector<8x8x4xbf16> to vector<64x4xbf16>
    %c15 = arith.constant 15 : index
    %c0_109 = arith.constant 0 : index
    %c0_110 = arith.constant 0 : index
    %109 = vector.load %arg2[%c15, %c0_109, %c0_110] : memref<16x4x8xbf16, #tpu.memory_space<vmem>>, vector<1x4x8xbf16>
    %110 = vector.shape_cast %109 : vector<1x4x8xbf16> to vector<4x8xbf16>
    %cst_111 = arith.constant dense<0.000000e+00> : vector<64x8xf32>
    %111 = tpu.matmul %108, %110, %cst_111 {dimension_numbers = #tpu.dot_dimension_numbers<[1], [0], [0], [1], [0, 0, 1, 1], [], []>} : vector<64x4xbf16>, vector<4x8xbf16>, vector<64x8xf32> -> vector<64x8xf32>
    %112 = arith.addf %105, %111 : vector<64x8xf32>
    %c0_112 = arith.constant 0 : index
    %c0_113 = arith.constant 0 : index
    %113 = vector.load %arg3[%c0_112, %c0_113] : memref<1x8xf32, #tpu.memory_space<vmem>>, vector<1x8xf32>
    %114 = vector.broadcast %113 : vector<1x8xf32> to vector<64x8xf32>
    %115 = arith.mulf %112, %114 : vector<64x8xf32>
    %c0_114 = arith.constant 0 : index
    %c0_115 = arith.constant 0 : index
    %116 = vector.load %arg4[%c0_114, %c0_115] : memref<1x8xf32, #tpu.memory_space<vmem>>, vector<1x8xf32>
    %117 = vector.broadcast %116 : vector<1x8xf32> to vector<64x8xf32>
    %118 = arith.addf %115, %117 : vector<64x8xf32>
    %cst_116 = arith.constant 0.000000e+00 : f32
    %119 = vector.broadcast %cst_116 : f32 to vector<64x8xf32>
    %120 = arith.cmpf ogt, %118, %119 : vector<64x8xf32>
    %cst_117 = arith.constant 2.000000e-01 : f32
    %121 = vector.broadcast %cst_117 : f32 to vector<64x8xf32>
    %122 = arith.mulf %121, %118 : vector<64x8xf32>
    %123 = arith.select %120, %118, %122 : vector<64x8xi1>, vector<64x8xf32>
    %124 = vector.shape_cast %123 : vector<64x8xf32> to vector<1x8x8x8xf32>
    %c0_118 = arith.constant 0 : index
    %c0_119 = arith.constant 0 : index
    %c0_120 = arith.constant 0 : index
    %c0_121 = arith.constant 0 : index
    %125 = vector.load %arg5[%c0_118, %c0_119, %c0_120, %c0_121] : memref<1x8x8x8xf32, #tpu.memory_space<vmem>>, vector<1x8x8x8xf32>
    tpu.vector_store %arg5[%c0_118, %c0_119, %c0_120, %c0_121], %124 {strides = array<i32>} : memref<1x8x8x8xf32, #tpu.memory_space<vmem>>, vector<1x8x8x8xf32>,
    return
  }
  func.func @transform_0(%arg0: i32) -> (i32, i32, i32, i32) {
    %c0_i32 = arith.constant 0 : i32
    %c0_i32_0 = arith.constant 0 : i32
    %c0_i32_1 = arith.constant 0 : i32
    %c0_i32_2 = arith.constant 0 : i32
    return %arg0, %c0_i32, %c0_i32_0, %c0_i32_1 : i32, i32, i32, i32
  }
  func.func @transform_1(%arg0: i32) -> (i32, i32, i32) {
    %c0_i32 = arith.constant 0 : i32
    %c0_i32_0 = arith.constant 0 : i32
    %c0_i32_1 = arith.constant 0 : i32
    %c0_i32_2 = arith.constant 0 : i32
    return %c0_i32, %c0_i32_0, %c0_i32_1 : i32, i32, i32
  }
  func.func @transform_2(%arg0: i32) -> (i32, i32) {
    %c0_i32 = arith.constant 0 : i32
    %c0_i32_0 = arith.constant 0 : i32
    %c0_i32_1 = arith.constant 0 : i32
    return %c0_i32, %c0_i32_0 : i32, i32
  }
  func.func @transform_3(%arg0: i32) -> (i32, i32) {
    %c0_i32 = arith.constant 0 : i32
    %c0_i32_0 = arith.constant 0 : i32
    %c0_i32_1 = arith.constant 0 : i32
    return %c0_i32, %c0_i32_0 : i32, i32
  }
  func.func @transform_4(%arg0: i32) -> (i32, i32, i32, i32) {
    %c0_i32 = arith.constant 0 : i32
    %c0_i32_0 = arith.constant 0 : i32
    %c0_i32_1 = arith.constant 0 : i32
    %c0_i32_2 = arith.constant 0 : i32
    return %arg0, %c0_i32, %c0_i32_0, %c0_i32_1 : i32, i32, i32, i32
  }
}

</mosaic_0001>

<bundles_post_ra>
// kernel: discriminator_cnn_block.2
= control target key start
LH: loop header
LB: loop body
LE: loop exit
PB: predicated region body
PF: predicated region fallthrough
CT: control target
= control target key end

     0   :  { %s3796_s9 = smov 0   ;;  %s4345_s0 = inlined_call_operand.vmem [shape: bf16[8,9,9,4], index: 0, kind: input, shape index: {}]   ;;  %s4346_s1 = inlined_call_operand.vmem [shape: bf16[16,4,8], index: 1, kind: input, shape index: {}]   ;;  %s4347_s2 = inlined_call_operand.vmem [shape: f32[2,2,8], index: 2, kind: output, shape index: {}]  }
   0x1 LB: > { %s3802_s10 = sadd.s32 4294967295, %s3779_s9   ;;  %p3039_p0 = scmp.ge.s32.totalorder %s3779_s9, 1  ;;  %s3779_s9 = sphi %s3796_s9, %s12_s9  }
   0x2   : > { %p114_p1 = scmp.lt.s32.totalorder %s3779_s9, 3 }
   0x4   : > { %p115_p2 = pnand %p3039_p0, %p114_p1 }
   0x5   : > { %v3051_v0 = vld [vmem:[%s4346_s1 + $0x2] sm:$0x3] (!%p115_p2)  ;;  %vm201_vm0 = vcmask (!%p115_p2), 1041408   ;;  %v3194_v1 = vld [vmem:[%s4346_s1 + $0x10] sm:$0x3] (!%p115_p2)  ;;  %s3040_s15 = sshll.u32 (!%p115_p2), %s3802_s10, 2 }
   0x6   : > { %118 = sbr.rel (%p115_p2) target bundleno = 425 (0x1a9), region = 28  ;;  %3716 = vmatprep.subr.msk.bf16.mxu1 (!%p115_p2), %vm201_vm0, %v3051_v0  ;;  %3724 = vmatprep.subr.msk.bf16.mxu0 (!%p115_p2), %vm201_vm0, %v3194_v1  ;;  %v203_v2 = vsel (!%p115_p2), %vm201_vm0, %v3051_v0, 0  ;;  %v1575_v3 = vsel (!%p115_p2), %vm201_vm0, %v3194_v1, 0  ;;  %p137_p3 = scmp.lt.s32.totalorder (!%p115_p2), %s3040_s15, 7  ;;  %v156_v4 = vld [vmem:[%s4346_s1] sm:$0x3] (!%p115_p2) }
   0x7   : > { %3437 = vmatpush3.bf16.msra.mxu1 (!%p115_p2), %v203_v2  ;;  %3517 = vmatpush3.bf16.msra.mxu0 (!%p115_p2), %v1575_v3  ;;  %v3211_v5 = vld [vmem:[%s4346_s1 + $0x12] sm:$0x3] (!%p115_p2)  ;;  %vm188_vm1 = vcmask (!%p115_p2), 31744   ;;  %v303_v6 = vsel (!%p115_p2), %vm201_vm0, %v156_v4, 0  ;;  %v3068_v10 = vld [vmem:[%s4346_s1 + $0x4] sm:$0x3] (!%p115_p2) }
   0x8   : > { %3717 = vmatprep.subr.msk.bf16.mxu1 (!%p115_p2), %vm201_vm0, %v156_v4  ;;  %3725 = vmatprep.subr.msk.bf16.mxu0 (!%p115_p2), %vm201_vm0, %v3211_v5  ;;  %v1694_v7 = vsel (!%p115_p2), %vm201_vm0, %v3211_v5, 0  ;;  %v3236_v13 = vld [vmem:[%s4346_s1 + $0x14] sm:$0x3] (!%p115_p2)  ;;  %v528_v16 = vsel (!%p115_p2), %vm201_vm0, %v3068_v10, 0  ;;  %v3093_v18 = vld [vmem:[%s4346_s1 + $0x6] sm:$0x3] (!%p115_p2) }
   0x9   : > { %v3861_v20 = vld [vmem:[%s4346_s1 + $0x16] sm:$0x3] (!%p115_p2)  ;;  %v3866_v21 = vld [vmem:[%s4346_s1 + $0x8] sm:$0x3] (!%p115_p2)  ;;  %vm386_vm2 = vsmask.f32 (!%p115_p2), 3328 }
   0xa   : > { %vm387_vm3 = vsmask.f32 (!%p115_p2), 7440  ;;  %v1924_v24 = vsel (!%p115_p2), %vm201_vm0, %v3236_v13, 0  ;;  %v3873_v25 = vsel (!%p115_p2), %vm201_vm0, %v3093_v18, 0  ;;  %v3879_v26 = vsel (!%p115_p2), %vm201_vm0, %v3861_v20, 0  ;;  %p143_p4 = scmp.lt.s32.totalorder (!%p115_p2), %s3802_s10, 1 }
   0xb   : > { %v3883_v27 = vsel (!%p115_p2), %vm201_vm0, %v3866_v21, 0  ;;  %vm3904_vm4 = vmor (!%p115_p2), %vm386_vm2, %vm387_vm3  ;;  %vm2927_vm5 = vcmask (!%p115_p2), 64512   ;;  %vm2978_vm6 = vcmask (!%p115_p2), 1040384   ;;  %vm2980_vm7 = vcmask (!%p115_p2), 58368  }
   0xd   : > { %s4351_s15 = smov (!%p137_p3, %s3040_s15), 7  ;;  %s4353_s10 = smov (!%p143_p4, %s3802_s10), 1 }
   0xe   : > { %s3732_s20 = smul.u32 72, %s4351_s15  ;;  %s3042_s22 = sshll.u32 %s4353_s10, 1 }
   0xf   : > { %s146_s25 = scalar_lea.vmem %s4347_s2, %s3042_s22 }
  0x10   : > { %s3828_s23 = scalar_lea.vmem %s4345_s0, %s3732_s20 }
  0x11   : > { %v3741_v8 = vld [vmem:[%s3828_s23 + $0x48] ss:$8 sps:$4 sm:$0xff]   ;;  %v3743_v11 = vld [vmem:[%s3828_s23 + $0x58] ss:$8 sps:$4 sm:$0xff]   ;;  %v371_v32 = vld [vmem:[%s3828_s23 + $0x4] sm:$0x1] }
  0x12   : > { %v3742_v9 = vld [vmem:[%s3828_s23 + $0x8] ss:$8 sps:$4 sm:$0xff]   ;;  %3438 = vmatprep.mubr.msk.bf16.mxu1 %vm188_vm1, %v3741_v8  ;;  %v3744_v12 = vld [vmem:[%s3828_s23 + $0x18] ss:$8 sps:$4 sm:$0xff]   ;;  %v373_v35 = vld [vmem:[%s3828_s23 + $0xc] sm:$0x1] }
  0x13   : > { %3518 = vmatprep.mubr.msk.bf16.mxu0 %vm188_vm1, %v3742_v9  ;;  %3439 = vmatmul.mubr.msk.bf16.vlgmr.msra.gmra.mrb[0].mxu1 %vm188_vm1, %v3743_v11  ;;  %v3745_v14 = vld [vmem:[%s3828_s23 + $0x68] ss:$8 sps:$4 sm:$0xff]   ;;  %v3747_v17 = vld [vmem:[%s3828_s23 + $0x78] ss:$8 sps:$4 sm:$0xff]   ;;  %v399_v38 = vshll.u32 %v371_v32, 16  ;;  %v413_v41 = vshll.u32 %v373_v35, 16 }
  0x14   : > { %3447 = vmatpush3.bf16.msra.mxu1 %v303_v6  ;;  %3519 = vmatmul.mubr.msk.bf16.vlgmr.msra.gmra.mrb[0].mxu0 %vm188_vm1, %v3744_v12  ;;  %v3746_v15 = vld [vmem:[%s3828_s23 + $0x28] ss:$8 sps:$4 sm:$0xff]   ;;  %v3748_v19 = vld [vmem:[%s3828_s23 + $0x38] ss:$8 sps:$4 sm:$0xff]   ;;  %v3221_v43 = vld [vmem:[%s3828_s23 + $0xc] sm:$0x1] }
  0x15   : > { %3527 = vmatpush3.bf16.msra.mxu0 %v1694_v7  ;;  %3442 = vmatprep.mubr.msk.bf16.mxu1 %vm188_vm1, %v3745_v14  ;;  %v3749_v22 = vld [vmem:[%s3828_s23] ss:$8 sps:$4 sm:$0xff]   ;;  %v3750_v23 = vld [vmem:[%s3828_s23 + $0x50] ss:$8 sps:$4 sm:$0xff]   ;;  %v401_v46 = vrot.slane %v399_v38, 5  ;;  %v415_v50 = vrot.slane %v413_v41, 5 }
  0x16   : > { %3522 = vmatprep.mubr.msk.bf16.mxu0 %vm188_vm1, %v3746_v15  ;;  %3718 = vmatprep.subr.msk.bf16.mxu1 %vm201_vm0, %v3068_v10  ;;  %v3751_v28 = vld [vmem:[%s3828_s23 + $0x10] ss:$8 sps:$4 sm:$0xff]   ;;  %v3752_v29 = vld [vmem:[%s3828_s23 + $0x60] ss:$8 sps:$4 sm:$0xff]   ;;  %v3223_v51 = vld [vmem:[%s3828_s23 + $0x14] sm:$0x1] }
  0x17   : > { %3726 = vmatprep.subr.msk.bf16.mxu0 %vm201_vm0, %v3236_v13  ;;  %v3753_v30 = vld [vmem:[%s3828_s23 + $0x20] ss:$8 sps:$4 sm:$0xff]   ;;  %v3754_v34 = vld [vmem:[%s3828_s23 + $0x70] ss:$8 sps:$4 sm:$0xff]   ;;  %v1795_v55 = vshll.u32 %v3221_v43, 16  ;;  %v1809_v63 = vshll.u32 %v3223_v51, 16 }
  0x18   : > { %v370_v31 = vld [vmem:[%s3828_s23] sm:$0xf]  ;;  %v372_v33 = vld [vmem:[%s3828_s23 + $0x8] sm:$0xf]  ;;  %v3222_v48 = vld [vmem:[%s3828_s23 + $0x10] sm:$0xf] }
  0x19   : > { %v390_v36 = vshrl.u32 %v370_v31, 16  ;;  %v393_v37 = vshll.u32 %v370_v31, 16  ;;  %v404_v39 = vshrl.u32 %v372_v33, 16  ;;  %v407_v40 = vshll.u32 %v372_v33, 16  ;;  %v3220_v42 = vld [vmem:[%s3828_s23 + $0x8] sm:$0xf] }
  0x1a   : > { %v1786_v52 = vshrl.u32 %v3220_v42, 16  ;;  %v1789_v53 = vshll.u32 %v3220_v42, 16  ;;  %v1800_v56 = vshrl.u32 %v3222_v48, 16  ;;  %v1803_v57 = vshll.u32 %v3222_v48, 16  ;;  %v374_v58 = vld [vmem:[%s3828_s23 + $0x10] sm:$0xf] }
  0x1b   : > { %3443 = vmatmul.mubr.msk.bf16.gmra.mrb[4].mxu1 %vm188_vm1, %v3747_v17  ;;  %v392_v44 = vrot.slane %v390_v36, 4  ;;  %v395_v45 = vrot.slane %v393_v37, 5  ;;  %v406_v47 = vrot.slane %v404_v39, 4  ;;  %v409_v49 = vrot.slane %v407_v40, 5  ;;  %v375_v0 = vld [vmem:[%s3828_s23 + $0x14] sm:$0x1] }
  0x1c   : > { %3523 = vmatmul.mubr.msk.bf16.gmra.mrb[4].mxu0 %vm188_vm1, %v3748_v19  ;;  %3448 = vmatprep.mubr.msk.bf16.mxu1 %vm188_vm1, %v3749_v22  ;;  %v1788_v61 = vrot.slane %v1786_v52, 4  ;;  %v1791_v62 = vrot.slane %v1789_v53, 5  ;;  %v1797_v2 = vrot.slane %v1795_v55, 5  ;;  %v1802_v3 = vrot.slane %v1800_v56, 4  ;;  %v376_v5 = vld [vmem:[%s3828_s23 + $0x18] sm:$0xf] }
  0x1d   : > { %3528 = vmatprep.mubr.msk.bf16.mxu0 %vm188_vm1, %v3750_v23  ;;  %v396_v54 = vor.u32 %v395_v45, %v392_v44  ;;  %v410_v60 = vor.u32 %v409_v49, %v406_v47  ;;  %v1805_v4 = vrot.slane %v1803_v57, 5  ;;  %v3755_v6 = vld [vmem:[%s3828_s23 + $0x30] ss:$8 sps:$4 sm:$0xff]   ;;  %v1811_v9 = vrot.slane %v1809_v63, 5  ;;  %v3756_v11 = vld [vmem:[%s3828_s23 + $0x80] ss:$8 sps:$4 sm:$0xff]  }
  0x1e   : > { %v1792_v8 = vor.u32 %v1791_v62, %v1788_v61  ;;  %v418_v10 = vshrl.u32 %v374_v58, 16  ;;  %v377_v14 = vld [vmem:[%s3828_s23 + $0x1c] sm:$0x1]  ;;  %v421_v15 = vshll.u32 %v374_v58, 16  ;;  %v432_v22 = vshrl.u32 %v376_v5, 16 }
  0x1f   : > { %v397_v1 = vrot.slane %v396_v54, 4  ;;  %v411_v7 = vrot.slane %v410_v60, 4  ;;  %v1806_v13 = vor.u32 %v1805_v4, %v1802_v3  ;;  %v3224_v23 = vld [vmem:[%s3828_s23 + $0x18] sm:$0xf]  ;;  %v435_v33 = vshll.u32 %v376_v5, 16 }
  0x20   : > { %v420_v19 = vrot.slane %v418_v10, 4  ;;  %v434_v32 = vrot.slane %v432_v22, 4  ;;  %v3226_v35 = vld [vmem:[%s3828_s23 + $0x20] sm:$0xf]  ;;  %v3227_v38 = vld [vmem:[%s3828_s23 + $0x24] sm:$0x1] }
  0x21   : > { %v402_v12 = vsel %vm3904_vm4, %v397_v1, %v401_v46  ;;  %v416_v17 = vsel %vm3904_vm4, %v411_v7, %v415_v50  ;;  %v1814_v39 = vshrl.u32 %v3224_v23, 16  ;;  %v1817_v40 = vshll.u32 %v3224_v23, 16  ;;  %v378_v45 = vld [vmem:[%s3828_s23 + $0x20] sm:$0xf]  ;;  %v379_v50 = vld [vmem:[%s3828_s23 + $0x24] sm:$0x1] }
  0x22   : > { %v437_v42 = vrot.slane %v435_v33, 5  ;;  %v1828_v49 = vshrl.u32 %v3226_v35, 16  ;;  %v1831_v53 = vshll.u32 %v3226_v35, 16  ;;  %v1837_v54 = vshll.u32 %v3227_v38, 16  ;;  %v380_v55 = vld [vmem:[%s3828_s23 + $0x28] sm:$0xf] }
  0x23   : > { %3449 = vmatmul.mubr.msk.bf16.vlgmr.msra.gmra.mrb[0].mxu1 %vm188_vm1, %v3751_v28  ;;  %v423_v28 = vrot.slane %v421_v15, 5  ;;  %v1816_v47 = vrot.slane %v1814_v39, 4  ;;  %v1819_v48 = vrot.slane %v1817_v40, 5  ;;  %v446_v60 = vshrl.u32 %v378_v45, 16  ;;  %v3231_v23 = vld [vmem:[%s3828_s23 + $0x34] sm:$0x1] }
  0x24   : > { %3457 = vmatpush3.bf16.msra.mxu1 %v528_v16  ;;  %3529 = vmatmul.mubr.msk.bf16.vlgmr.msra.gmra.mrb[0].mxu0 %vm188_vm1, %v3752_v29  ;;  %v427_v16 = vshll.u32 %v375_v0, 16  ;;  %v438_v51 = vor.u32 %v437_v42, %v434_v32  ;;  %v1830_v58 = vrot.slane %v1828_v49, 4  ;;  %v1833_v62 = vrot.slane %v1831_v53, 5  ;;  %v381_v0 = vld [vmem:[%s3828_s23 + $0x2c] sm:$0x1] }
  0x25   : > { %3537 = vmatpush3.bf16.msra.mxu0 %v1924_v24  ;;  %3452 = vmatprep.mubr.msk.bf16.mxu1 %vm188_vm1, %v3753_v30  ;;  %v1807_v24 = vrot.slane %v1806_v13, 4  ;;  %v3225_v30 = vld [vmem:[%s3828_s23 + $0x1c] sm:$0x1]  ;;  %v424_v37 = vor.u32 %v423_v28, %v420_v19  ;;  %v1820_v57 = vor.u32 %v1819_v48, %v1816_v47  ;;  %v1839_v63 = vrot.slane %v1837_v54, 5  ;;  %v383_v35 = vld [vmem:[%s3828_s23 + $0x34] sm:$0x1] }
  0x26   : > { %3532 = vmatprep.mubr.msk.bf16.mxu0 %vm188_vm1, %v3754_v34  ;;  %3719 = vmatprep.subr.msk.bf16.mxu1 %vm201_vm0, %v3093_v18  ;;  %v1793_v18 = vrot.slane %v1792_v8, 4  ;;  %v429_v29 = vrot.slane %v427_v16, 5  ;;  %v441_v34 = vshll.u32 %v377_v14, 16  ;;  %v1823_v44 = vshll.u32 %v3225_v30, 16  ;;  %v384_v40 = vld [vmem:[%s3828_s23 + $0x38] sm:$0xf] }
  0x27   : > { %3727 = vmatprep.subr.msk.bf16.mxu0 %vm201_vm0, %v3861_v20  ;;  %v3069_v20 = vcombine.low %v402_v12, %v416_v17  ;;  %v1812_v36 = vsel %vm3904_vm4, %v1807_v24, %v1811_v9  ;;  %v425_v46 = vrot.slane %v424_v37, 4  ;;  %v439_v61 = vrot.slane %v438_v51, 4  ;;  %v3230_v12 = vld [vmem:[%s3828_s23 + $0x30] sm:$0xf]  ;;  %v385_v47 = vld [vmem:[%s3828_s23 + $0x3c] sm:$0x1] }
  0x28   : > { %v1798_v31 = vsel %vm3904_vm4, %v1793_v18, %v1797_v2  ;;  %v443_v43 = vrot.slane %v441_v34, 5  ;;  %v1825_v52 = vrot.slane %v1823_v44, 5  ;;  %v449_v1 = vshll.u32 %v378_v45, 16  ;;  %v382_v34 = vld [vmem:[%s3828_s23 + $0x30] sm:$0xf] }
  0x29   : > { %v3237_v41 = vcombine.low %v1798_v31, %v1812_v36  ;;  %v430_v56 = vsel %vm3904_vm4, %v425_v46, %v429_v29  ;;  %v1821_v2 = vrot.slane %v1820_v57, 4  ;;  %v448_v3 = vrot.slane %v446_v60, 4  ;;  %v3961_v44 = vld [vmem:[%s4346_s1 + $0x18] sm:$0x3] }
  0x2a   : > { %v455_v4 = vshll.u32 %v379_v50, 16  ;;  %v460_v5 = vshrl.u32 %v380_v55, 16  ;;  %v444_v7 = vsel %vm3904_vm4, %v439_v61, %v443_v43  ;;  %v1834_v8 = vor.u32 %v1833_v62, %v1830_v58  ;;  %v3232_v53 = vld [vmem:[%s3828_s23 + $0x38] sm:$0xf]  ;;  %v3233_v58 = vld [vmem:[%s3828_s23 + $0x3c] sm:$0x1] }
  0x2b   : > { %3453 = vmatmul.mubr.msk.bf16.gmra.mrb[4].mxu1 %vm188_vm1, %v3755_v6  ;;  %v3228_v6 = vld [vmem:[%s3828_s23 + $0x28] sm:$0xf]  ;;  %v451_v9 = vrot.slane %v449_v1, 5  ;;  %v463_v10 = vshll.u32 %v380_v55, 16  ;;  %v3070_v13 = vcombine.low %v430_v56, %v444_v7  ;;  %v1826_v14 = vsel %vm3904_vm4, %v1821_v2, %v1825_v52 }
  0x2c   : > { %3533 = vmatmul.mubr.msk.bf16.gmra.mrb[4].mxu0 %vm188_vm1, %v3756_v11  ;;  %3458 = vmatprep.mubr.msk.bf16.mxu1 %vm188_vm1, %v3069_v20  ;;  %v3229_v11 = vld [vmem:[%s3828_s23 + $0x2c] sm:$0x1]  ;;  %v457_v15 = vrot.slane %v455_v4, 5  ;;  %v462_v16 = vrot.slane %v460_v5, 4  ;;  %v1835_v17 = vrot.slane %v1834_v8, 4  ;;  %v469_v22 = vshll.u32 %v381_v0, 16 }
  0x2d   : > { %3538 = vmatprep.mubr.msk.bf16.mxu0 %vm188_vm1, %v3237_v41  ;;  %v452_v18 = vor.u32 %v451_v9, %v448_v3  ;;  %v465_v19 = vrot.slane %v463_v10, 5  ;;  %v1842_v20 = vshrl.u32 %v3228_v6, 16  ;;  %v1845_v24 = vshll.u32 %v3228_v6, 16  ;;  %v3235_v6 = vld [vmem:[%s3828_s23 + $0x44] sm:$0x1] }
  0x2e   : > { %v1851_v28 = vshll.u32 %v3229_v11, 16  ;;  %v1856_v29 = vshrl.u32 %v3230_v12, 16  ;;  %v1840_v30 = vsel %vm3904_vm4, %v1835_v17, %v1839_v63  ;;  %v471_v33 = vrot.slane %v469_v22, 5  ;;  %v3234_v63 = vld [vmem:[%s3828_s23 + $0x40] sm:$0xf] }
  0x2f   : > { %v453_v31 = vrot.slane %v452_v18, 4  ;;  %v466_v32 = vor.u32 %v465_v19, %v462_v16  ;;  %v3238_v36 = vcombine.low %v1826_v14, %v1840_v30  ;;  %v1844_v37 = vrot.slane %v1842_v20, 4  ;;  %v3078_v18 = vld [vmem:[%s3828_s23 + $0x4c] sm:$0x1] }
  0x30   : > { %v1847_v38 = vrot.slane %v1845_v24, 5  ;;  %v1853_v39 = vrot.slane %v1851_v28, 5  ;;  %v1858_v42 = vrot.slane %v1856_v29, 4  ;;  %v1859_v43 = vshll.u32 %v3230_v12, 16  ;;  %v3079_v24 = vld [vmem:[%s3828_s23 + $0x50] sm:$0xf] }
  0x31   : > { %v467_v41 = vrot.slane %v466_v32, 4  ;;  %v1865_v46 = vshll.u32 %v3231_v23, 16  ;;  %v474_v48 = vshrl.u32 %v382_v34, 16  ;;  %v483_v51 = vshll.u32 %v383_v35, 16 }
  0x32   : > { %v1848_v45 = vor.u32 %v1847_v38, %v1844_v37  ;;  %v1861_v50 = vrot.slane %v1859_v43, 5  ;;  %v488_v52 = vshrl.u32 %v384_v40, 16  ;;  %v491_v1 = vshll.u32 %v384_v40, 16 }
  0x33   : > { %3459 = vmatmul.mubr.msk.bf16.vlgmr.msra.gmra.mrb[0].mxu1 %vm188_vm1, %v3070_v13  ;;  %v472_v49 = vsel %vm3904_vm4, %v467_v41, %v471_v33  ;;  %v1867_v56 = vrot.slane %v1865_v46, 5  ;;  %v476_v57 = vrot.slane %v474_v48, 4  ;;  %v497_v2 = vshll.u32 %v385_v47, 16  ;;  %v3077_v13 = vld [vmem:[%s3828_s23 + $0x48] sm:$0xf] }
  0x34   : > { %3467 = vmatpush3.bf16.msra.mxu1 %v3873_v25  ;;  %v458_v25 = vsel %vm3904_vm4, %v453_v31, %v457_v15  ;;  %3539 = vmatmul.mubr.msk.bf16.vlgmr.msra.gmra.mrb[0].mxu0 %vm188_vm1, %v3238_v36  ;;  %v1849_v55 = vrot.slane %v1848_v45, 4  ;;  %v1862_v60 = vor.u32 %v1861_v50, %v1858_v42  ;;  %v490_v62 = vrot.slane %v488_v52, 4  ;;  %v3247_v46 = vld [vmem:[%s3828_s23 + $0x58] sm:$0xf]  ;;  %v3246_v50 = vld [vmem:[%s3828_s23 + $0x54] sm:$0x1] }
  0x35   : > { %3720 = vmatprep.subr.msk.bf16.mxu1 %vm201_vm0, %v3866_v21  ;;  %v477_v21 = vshll.u32 %v382_v34, 16  ;;  %3547 = vmatpush3.bf16.msra.mxu0 %v3879_v26  ;;  %v3071_v54 = vcombine.low %v458_v25, %v472_v49  ;;  %v485_v26 = vrot.slane %v483_v51, 5  ;;  %v1870_v3 = vshrl.u32 %v3232_v53, 16  ;;  %v3080_v34 = vld [vmem:[%s3828_s23 + $0x54] sm:$0x1] }
  0x36   : > { %3728 = vmatprep.subr.msk.bf16.mxu0 %vm201_vm0, %v3961_v44  ;;  %v1854_v0 = vsel %vm3904_vm4, %v1849_v55, %v1853_v39  ;;  %v1863_v4 = vrot.slane %v1862_v60, 4  ;;  %v1873_v7 = vshll.u32 %v3232_v53, 16  ;;  %v1879_v8 = vshll.u32 %v3233_v58, 16  ;;  %v3245_v25 = vld [vmem:[%s3828_s23 + $0x50] sm:$0xf] }
  0x37   : > { %v479_v61 = vrot.slane %v477_v21, 5  ;;  %3462 = vmatprep.mubr.msk.bf16.mxu1 %vm188_vm1, %v3071_v54  ;;  %v493_v9 = vrot.slane %v491_v1, 5  ;;  %v499_v10 = vrot.slane %v497_v2, 5  ;;  %v1872_v11 = vrot.slane %v1870_v3, 4 }
  0x38   : > { %v1884_v12 = vshrl.u32 %v3234_v63, 16  ;;  %v1868_v14 = vsel %vm3904_vm4, %v1863_v4, %v1867_v56  ;;  %v1875_v16 = vrot.slane %v1873_v7, 5  ;;  %v1881_v17 = vrot.slane %v1879_v8, 5  ;;  %v3248_v56 = vld [vmem:[%s3828_s23 + $0x5c] sm:$0x1] }
  0x39   : > { %v480_v5 = vor.u32 %v479_v61, %v476_v57  ;;  %v3239_v19 = vcombine.low %v1854_v0, %v1868_v14  ;;  %v494_v22 = vor.u32 %v493_v9, %v490_v62  ;;  %v1887_v20 = vshll.u32 %v3234_v63, 16  ;;  %v3081_v0 = vld [vmem:[%s3828_s23 + $0x58] sm:$0xf] }
  0x3a   : > { %v1886_v23 = vrot.slane %v1884_v12, 4  ;;  %v1876_v29 = vor.u32 %v1875_v16, %v1872_v11  ;;  %v1893_v30 = vshll.u32 %v3235_v6, 16  ;;  %v620_v31 = vshrl.u32 %v3077_v13, 16  ;;  %v3083_v6 = vld [vmem:[%s3828_s23 + $0x60] sm:$0xf] }
  0x3b   : > { %v481_v15 = vrot.slane %v480_v5, 4  ;;  %3542 = vmatprep.mubr.msk.bf16.mxu0 %vm188_vm1, %v3239_v19  ;;  %v495_v32 = vrot.slane %v494_v22, 4  ;;  %v1889_v33 = vrot.slane %v1887_v20, 5  ;;  %v623_v35 = vshll.u32 %v3077_v13, 16  ;;  %v3082_v5 = vld [vmem:[%s3828_s23 + $0x5c] sm:$0x1] }
  0x3c   : > { %v629_v36 = vshll.u32 %v3078_v18, 16  ;;  %v1877_v37 = vrot.slane %v1876_v29, 4  ;;  %v1895_v38 = vrot.slane %v1893_v30, 5  ;;  %v622_v39 = vrot.slane %v620_v31, 4  ;;  %v3084_v12 = vld [vmem:[%s3828_s23 + $0x64] sm:$0x1] }
  0x3d   : > { %v486_v28 = vsel %vm3904_vm4, %v481_v15, %v485_v26  ;;  %v634_v40 = vshrl.u32 %v3079_v24, 16  ;;  %v500_v41 = vsel %vm3904_vm4, %v495_v32, %v499_v10  ;;  %v1890_v42 = vor.u32 %v1889_v33, %v1886_v23  ;;  %v3249_v19 = vld [vmem:[%s3828_s23 + $0x60] sm:$0xf]  ;;  %v3251_v33 = vld [vmem:[%s3828_s23 + $0x68] sm:$0xf] }
  0x3e   : > { %v625_v43 = vrot.slane %v623_v35, 5  ;;  %v631_v45 = vrot.slane %v629_v36, 5  ;;  %v3072_v47 = vcombine.low %v486_v28, %v500_v41  ;;  %v1882_v48 = vsel %vm3904_vm4, %v1877_v37, %v1881_v17  ;;  %v3250_v28 = vld [vmem:[%s3828_s23 + $0x64] sm:$0x1] }
  0x3f   : > { %v636_v21 = vrot.slane %v634_v40, 4  ;;  %v637_v49 = vshll.u32 %v3079_v24, 16  ;;  %v1891_v51 = vrot.slane %v1890_v42, 4  ;;  %v643_v53 = vshll.u32 %v3080_v34, 16 }
  0x40   : > { %v626_v52 = vor.u32 %v625_v43, %v622_v39  ;;  %v2016_v54 = vshrl.u32 %v3245_v25, 16  ;;  %3463 = vmatmul.mubr.msk.bf16.gmra.mrb[4].mxu1 %vm188_vm1, %v3072_v47  ;;  %v2019_v57 = vshll.u32 %v3245_v25, 16  ;;  %v2030_v58 = vshrl.u32 %v3247_v46, 16  ;;  %v3085_v39 = vld [vmem:[%s3828_s23 + $0x68] sm:$0xf] }
  0x41   : > { %v639_v55 = vrot.slane %v637_v49, 5  ;;  %v3997_v60 = vsel %vm201_vm0, %v3961_v44, 0  ;;  %v1896_v61 = vsel %vm3904_vm4, %v1891_v51, %v1895_v38  ;;  %v2025_v63 = vshll.u32 %v3246_v50, 16  ;;  %v3252_v38 = vld [vmem:[%s3828_s23 + $0x6c] sm:$0x1] }
  0x42   : > { %v627_v26 = vrot.slane %v626_v52, 4  ;;  %v2018_v62 = vrot.slane %v2016_v54, 4  ;;  %v3240_v1 = vcombine.low %v1882_v48, %v1896_v61  ;;  %v645_v3 = vrot.slane %v643_v53, 5  ;;  %v3086_v43 = vld [vmem:[%s3828_s23 + $0x6c] sm:$0x1] }
  0x43   : > { %v640_v2 = vor.u32 %v639_v55, %v636_v21  ;;  %v2021_v4 = vrot.slane %v2019_v57, 5  ;;  %v2032_v44 = vrot.slane %v2030_v58, 4  ;;  %v2033_v8 = vshll.u32 %v3247_v46, 16  ;;  %v3087_v52 = vld [vmem:[%s3828_s23 + $0x70] sm:$0xf] }
  0x44   : > { %v632_v7 = vsel %vm3904_vm4, %v627_v26, %v631_v45  ;;  %v2039_v9 = vshll.u32 %v3248_v56, 16  ;;  %3543 = vmatmul.mubr.msk.bf16.gmra.mrb[4].mxu0 %vm188_vm1, %v3240_v1  ;;  %v648_v13 = vshrl.u32 %v3081_v0, 16  ;;  %v651_v14 = vshll.u32 %v3081_v0, 16  ;;  %v3088_v26 = vld [vmem:[%s3828_s23 + $0x74] sm:$0x1] }
  0x45   : > { %v641_v10 = vrot.slane %v640_v2, 4  ;;  %v2022_v11 = vor.u32 %v2021_v4, %v2018_v62  ;;  %v2027_v15 = vrot.slane %v2025_v63, 5  ;;  %v2035_v16 = vrot.slane %v2033_v8, 5  ;;  %v3253_v63 = vld [vmem:[%s3828_s23 + $0x70] sm:$0xf] }
  0x46   : > { %v657_v17 = vshll.u32 %v3082_v5, 16  ;;  %v662_v18 = vshrl.u32 %v3083_v6, 16  ;;  %v650_v20 = vrot.slane %v648_v13, 4  ;;  %v653_v24 = vrot.slane %v651_v14, 5  ;;  %v4034_v13 = vld [vmem:[%s4346_s1 + $0xa] sm:$0x3] }
  0x47   : > { %v646_v22 = vsel %vm3904_vm4, %v641_v10, %v645_v3  ;;  %v2023_v23 = vrot.slane %v2022_v11, 4  ;;  %v2036_v30 = vor.u32 %v2035_v16, %v2032_v44  ;;  %v2041_v31 = vrot.slane %v2039_v9, 5  ;;  %v3254_v44 = vld [vmem:[%s3828_s23 + $0x74] sm:$0x1] }
  0x48   : > { %v3094_v29 = vcombine.low %v632_v7, %v646_v22  ;;  %v659_v32 = vrot.slane %v657_v17, 5  ;;  %v654_v34 = vor.u32 %v653_v24, %v650_v20  ;;  %v664_v35 = vrot.slane %v662_v18, 4  ;;  %v3256_v22 = vld [vmem:[%s3828_s23 + $0x7c] sm:$0x1]  ;;  %v3089_v24 = vld [vmem:[%s3828_s23 + $0x78] sm:$0xf] }
  0x49   : > { %v665_v36 = vshll.u32 %v3083_v6, 16  ;;  %v671_v37 = vshll.u32 %v3084_v12, 16  ;;  %v2028_v40 = vsel %vm3904_vm4, %v2023_v23, %v2027_v15  ;;  %v2037_v25 = vrot.slane %v2036_v30, 4  ;;  %v3255_v12 = vld [vmem:[%s3828_s23 + $0x78] sm:$0xf] }
  0x4a   : > { %3468 = vmatprep.mubr.msk.bf16.mxu1 %vm188_vm1, %v3094_v29  ;;  %v2044_v41 = vshrl.u32 %v3249_v19, 16  ;;  %v2047_v42 = vshll.u32 %v3249_v19, 16  ;;  %v655_v45 = vrot.slane %v654_v34, 4  ;;  %v2053_v47 = vshll.u32 %v3250_v28, 16 }
  0x4b   : > { %v667_v46 = vrot.slane %v665_v36, 5  ;;  %v2058_v48 = vshrl.u32 %v3251_v33, 16  ;;  %v2042_v21 = vsel %vm3904_vm4, %v2037_v25, %v2041_v31  ;;  %v673_v49 = vrot.slane %v671_v37, 5  ;;  %v3090_v36 = vld [vmem:[%s3828_s23 + $0x7c] sm:$0x1] }
  0x4c   : > { %v2046_v50 = vrot.slane %v2044_v41, 4  ;;  %v2049_v51 = vrot.slane %v2047_v42, 5  ;;  %v3262_v53 = vcombine.low %v2028_v40, %v2042_v21  ;;  %v660_v54 = vsel %vm3904_vm4, %v655_v45, %v659_v32  ;;  %v3091_v25 = vld [vmem:[%s3828_s23 + $0x80] sm:$0xf] }
  0x4d   : > { %v668_v55 = vor.u32 %v667_v46, %v664_v35  ;;  %v2060_v56 = vrot.slane %v2058_v48, 4  ;;  %v2061_v58 = vshll.u32 %v3251_v33, 16  ;;  %v2067_v61 = vshll.u32 %v3252_v38, 16  ;;  %v3092_v46 = vld [vmem:[%s3828_s23 + $0x84] sm:$0x1] }
  0x4e   : > { %v2050_v57 = vor.u32 %v2049_v51, %v2046_v50  ;;  %v676_v62 = vshrl.u32 %v3085_v39, 16  ;;  %3548 = vmatprep.mubr.msk.bf16.mxu0 %vm188_vm1, %v3262_v53  ;;  %v679_v1 = vshll.u32 %v3085_v39, 16  ;;  %v685_v2 = vshll.u32 %v3086_v43, 16  ;;  %v3257_v50 = vld [vmem:[%s3828_s23 + $0x80] sm:$0xf] }
  0x4f   : > { %v669_v0 = vrot.slane %v668_v55, 4  ;;  %v690_v3 = vshrl.u32 %v3087_v52, 16  ;;  %v2055_v5 = vrot.slane %v2053_v47, 5  ;;  %v2063_v6 = vrot.slane %v2061_v58, 5 }
  0x50   : > { %v2051_v4 = vrot.slane %v2050_v57, 4  ;;  %v678_v7 = vrot.slane %v676_v62, 4  ;;  %v2069_v9 = vrot.slane %v2067_v61, 5  ;;  %v681_v10 = vrot.slane %v679_v1, 5  ;;  %v3259_v61 = vld [vmem:[%s3828_s23 + $0x88] sm:$0xf] }
  0x51   : > { %v674_v8 = vsel %vm3904_vm4, %v669_v0, %v673_v49  ;;  %v687_v11 = vrot.slane %v685_v2, 5  ;;  %v2064_v15 = vor.u32 %v2063_v6, %v2060_v56  ;;  %v692_v16 = vrot.slane %v690_v3, 4  ;;  %v3260_v6 = vld [vmem:[%s3828_s23 + $0x8c] sm:$0x1] }
  0x52   : > { %v3095_v14 = vcombine.low %v660_v54, %v674_v8  ;;  %v693_v17 = vshll.u32 %v3087_v52, 16  ;;  %v682_v18 = vor.u32 %v681_v10, %v678_v7  ;;  %v699_v19 = vshll.u32 %v3088_v26, 16 }
  0x53   : > { %v2072_v23 = vshrl.u32 %v3253_v63, 16  ;;  %v2075_v20 = vshll.u32 %v3253_v63, 16  ;;  %v2056_v28 = vsel %vm3904_vm4, %v2051_v4, %v2055_v5  ;;  %v2065_v29 = vrot.slane %v2064_v15, 4  ;;  %v3258_v4 = vld [vmem:[%s3828_s23 + $0x84] sm:$0x1] }
  0x54   : > { %3469 = vmatmul.mubr.msk.bf16.vlgmr.msra.gmra.mrb[0].mxu1 %vm188_vm1, %v3095_v14  ;;  %v695_v30 = vrot.slane %v693_v17, 5  ;;  %v2086_v31 = vshrl.u32 %v3255_v12, 16  ;;  %v683_v32 = vrot.slane %v682_v18, 4  ;;  %v2081_v35 = vshll.u32 %v3254_v44, 16 }
  0x55   : > { %3477 = vmatpush3.bf16.msra.mxu1 %v3883_v27  ;;  %v2074_v33 = vrot.slane %v2072_v23, 4  ;;  %v2077_v34 = vrot.slane %v2075_v20, 5  ;;  %v2070_v37 = vsel %vm3904_vm4, %v2065_v29, %v2069_v9  ;;  %v701_v39 = vrot.slane %v699_v19, 5  ;;  %v4051_v27 = vld [vmem:[%s4346_s1 + $0x1a] sm:$0x3] }
  0x56   : > { %v696_v38 = vor.u32 %v695_v30, %v692_v16  ;;  %v2088_v40 = vrot.slane %v2086_v31, 4  ;;  %3721 = vmatprep.subr.msk.bf16.mxu1 %vm201_vm0, %v4034_v13  ;;  %v3263_v41 = vcombine.low %v2056_v28, %v2070_v37  ;;  %v688_v42 = vsel %vm3904_vm4, %v683_v32, %v687_v11 }
  0x57   : > { %v2078_v43 = vor.u32 %v2077_v34, %v2074_v33  ;;  %v2089_v45 = vshll.u32 %v3255_v12, 16  ;;  %v2095_v48 = vshll.u32 %v3256_v22, 16  ;;  %v704_v21 = vshrl.u32 %v3089_v24, 16  ;;  %v3757_v34 = vld [vmem:[%s3828_s23 + $0x90] ss:$8 sps:$4 sm:$0xff]  }
  0x58   : > { %v697_v47 = vrot.slane %v696_v38, 4  ;;  %v707_v49 = vshll.u32 %v3089_v24, 16  ;;  %3549 = vmatmul.mubr.msk.bf16.vlgmr.msra.gmra.mrb[0].mxu0 %vm188_vm1, %v3263_v41  ;;  %v2083_v52 = vrot.slane %v2081_v35, 5  ;;  %v718_v54 = vshrl.u32 %v3091_v25, 16  ;;  %v3152_v35 = vld [vmem:[%s4346_s1 + $0xc] sm:$0x3] }
  0x59   : > { %v2079_v51 = vrot.slane %v2078_v43, 4  ;;  %v2091_v53 = vrot.slane %v2089_v45, 5  ;;  %3557 = vmatpush3.bf16.msra.mxu0 %v3997_v60  ;;  %v706_v56 = vrot.slane %v704_v21, 4  ;;  %v713_v58 = vshll.u32 %v3090_v36, 16  ;;  %v3758_v41 = vld [vmem:[%s3828_s23 + $0x98] ss:$8 sps:$4 sm:$0xff]  }
  0x5a   : > { %v702_v55 = vsel %vm3904_vm4, %v697_v47, %v701_v39  ;;  %v709_v57 = vrot.slane %v707_v49, 5  ;;  %v2097_v63 = vrot.slane %v2095_v48, 5  ;;  %3729 = vmatprep.subr.msk.bf16.mxu0 %vm201_vm0, %v4051_v27  ;;  %v720_v1 = vrot.slane %v718_v54, 4  ;;  %v4083_v39 = vld [vmem:[%s4346_s1 + $0x1c] sm:$0x3] }
  0x5b   : > { %v3096_v26 = vcombine.low %v688_v42, %v702_v55  ;;  %v2092_v62 = vor.u32 %v2091_v53, %v2088_v40  ;;  %v721_v2 = vshll.u32 %v3091_v25, 16  ;;  %v727_v3 = vshll.u32 %v3092_v46, 16  ;;  %v3759_v46 = vld [vmem:[%s3828_s23 + $0xa0] ss:$8 sps:$4 sm:$0xff]   ;;  %v3136_v21 = vld [vmem:[%s3828_s23 + $0x90] sm:$0xf] }
  0x5c   : > { %v710_v0 = vor.u32 %v709_v57, %v706_v56  ;;  %v2084_v60 = vsel %vm3904_vm4, %v2079_v51, %v2083_v52  ;;  %v2100_v7 = vshrl.u32 %v3257_v50, 16  ;;  %v2103_v44 = vshll.u32 %v3257_v50, 16  ;;  %v3137_v49 = vld [vmem:[%s3828_s23 + $0x94] sm:$0x1]  ;;  %v3138_v50 = vld [vmem:[%s3828_s23 + $0x98] sm:$0xf] }
  0x5d   : > { %3472 = vmatprep.mubr.msk.bf16.mxu1 %vm188_vm1, %v3096_v26  ;;  %v2093_v5 = vrot.slane %v2092_v62, 4  ;;  %v715_v9 = vrot.slane %v713_v58, 5  ;;  %v723_v10 = vrot.slane %v721_v2, 5  ;;  %v2114_v11 = vshrl.u32 %v3259_v61, 16  ;;  %v3139_v51 = vld [vmem:[%s3828_s23 + $0x9c] sm:$0x1] }
  0x5e   : > { %v711_v8 = vrot.slane %v710_v0, 4  ;;  %v2102_v14 = vrot.slane %v2100_v7, 4  ;;  %v2105_v15 = vrot.slane %v2103_v44, 5  ;;  %v2109_v16 = vshll.u32 %v3258_v4, 16  ;;  %v3761_v53 = vld [vmem:[%s3828_s23 + $0xb0] ss:$8 sps:$4 sm:$0xff]  }
  0x5f   : > { %v2098_v12 = vsel %vm3904_vm4, %v2093_v5, %v2097_v63  ;;  %v724_v18 = vor.u32 %v723_v10, %v720_v1  ;;  %v729_v19 = vrot.slane %v727_v3, 5  ;;  %v2116_v23 = vrot.slane %v2114_v11, 4  ;;  %v3304_v26 = vld [vmem:[%s3828_s23 + $0x98] sm:$0xf]  ;;  %v3305_v62 = vld [vmem:[%s3828_s23 + $0x9c] sm:$0x1] }
  0x60   : > { %v3264_v17 = vcombine.low %v2084_v60, %v2098_v12  ;;  %v2106_v22 = vor.u32 %v2105_v15, %v2102_v14  ;;  %v2117_v20 = vshll.u32 %v3259_v61, 16  ;;  %v2123_v24 = vshll.u32 %v3260_v6, 16  ;;  %v3306_v3 = vld [vmem:[%s3828_s23 + $0xa0] sm:$0xf]  ;;  %v3760_v4 = vld [vmem:[%s3828_s23 + $0xa8] ss:$8 sps:$4 sm:$0xff]  }
  0x61   : > { %v716_v28 = vsel %vm3904_vm4, %v711_v8, %v715_v9  ;;  %v725_v29 = vrot.slane %v724_v18, 4  ;;  %v2111_v31 = vrot.slane %v2109_v16, 5  ;;  %v996_v42 = vsel %vm201_vm0, %v4034_v13, 0  ;;  %v3307_v5 = vld [vmem:[%s3828_s23 + $0xa4] sm:$0x1] }
  0x62   : > { %3552 = vmatprep.mubr.msk.bf16.mxu0 %vm188_vm1, %v3264_v17  ;;  %v2107_v30 = vrot.slane %v2106_v22, 4  ;;  %v2119_v32 = vrot.slane %v2117_v20, 5  ;;  %v2125_v38 = vrot.slane %v2123_v24, 5  ;;  %v4094_v43 = vsel %vm201_vm0, %v4051_v27, 0  ;;  %v3762_v8 = vld [vmem:[%s3828_s23 + $0xb8] ss:$8 sps:$4 sm:$0xff]  }
  0x63   : > { %v730_v33 = vsel %vm3904_vm4, %v725_v29, %v729_v19  ;;  %v4100_v47 = vsel %vm201_vm0, %v3152_v35, 0  ;;  %v4104_v48 = vsel %vm201_vm0, %v4083_v39, 0  ;;  %v1088_v27 = vshrl.u32 %v3136_v21, 16  ;;  %v3140_v18 = vld [vmem:[%s3828_s23 + $0xa0] sm:$0xf] }
  0x64   : > { %v3097_v36 = vcombine.low %v716_v28, %v730_v33  ;;  %v2120_v37 = vor.u32 %v2119_v32, %v2116_v23  ;;  %v2112_v40 = vsel %vm3904_vm4, %v2107_v30, %v2111_v31  ;;  %v1091_v52 = vshll.u32 %v3136_v21, 16  ;;  %v3763_v19 = vld [vmem:[%s3828_s23 + $0xc0] ss:$8 sps:$4 sm:$0xff]   ;;  %v3141_v28 = vld [vmem:[%s3828_s23 + $0xa4] sm:$0x1] }
  0x65   : > { %v1097_v54 = vshll.u32 %v3137_v49, 16  ;;  %v1102_v55 = vshrl.u32 %v3138_v50, 16  ;;  %v1105_v56 = vshll.u32 %v3138_v50, 16  ;;  %v1111_v57 = vshll.u32 %v3139_v51, 16  ;;  %v3765_v29 = vld [vmem:[%s3828_s23 + $0xd8] ss:$8 sps:$4 sm:$0xff]  }
  0x66   : > { %3473 = vmatmul.mubr.msk.bf16.gmra.mrb[4].mxu1 %vm188_vm1, %v3097_v36  ;;  %v2121_v25 = vrot.slane %v2120_v37, 4  ;;  %v1090_v58 = vrot.slane %v1088_v27, 4  ;;  %v1093_v61 = vrot.slane %v1091_v52, 5  ;;  %v2484_v6 = vshrl.u32 %v3304_v26, 16  ;;  %v3142_v32 = vld [vmem:[%s3828_s23 + $0xa8] sm:$0xf] }
  0x67   : > { %3478 = vmatprep.mubr.msk.bf16.mxu1 %vm188_vm1, %v3757_v34  ;;  %v1099_v63 = vrot.slane %v1097_v54, 5  ;;  %v1104_v0 = vrot.slane %v1102_v55, 4  ;;  %v1107_v1 = vrot.slane %v1105_v56, 5  ;;  %v1113_v2 = vrot.slane %v1111_v57, 5  ;;  %v3308_v21 = vld [vmem:[%s3828_s23 + $0xa8] sm:$0xf] }
  0x68   : > { %v2126_v45 = vsel %vm3904_vm4, %v2121_v25, %v2125_v38  ;;  %v1094_v60 = vor.u32 %v1093_v61, %v1090_v58  ;;  %v2487_v7 = vshll.u32 %v3304_v26, 16  ;;  %v2493_v44 = vshll.u32 %v3305_v62, 16  ;;  %v3143_v38 = vld [vmem:[%s3828_s23 + $0xac] sm:$0x1]  ;;  %v3764_v52 = vld [vmem:[%s3828_s23 + $0xc8] ss:$8 sps:$4 sm:$0xff]  }
  0x69   : > { %v3265_v13 = vcombine.low %v2112_v40, %v2126_v45  ;;  %v1108_v9 = vor.u32 %v1107_v1, %v1104_v0  ;;  %v2498_v10 = vshrl.u32 %v3306_v3, 16  ;;  %v2501_v11 = vshll.u32 %v3306_v3, 16  ;;  %v3309_v27 = vld [vmem:[%s3828_s23 + $0xac] sm:$0x1]  ;;  %v3310_v57 = vld [vmem:[%s3828_s23 + $0xb0] sm:$0xf] }
  0x6a   : > { %v2507_v12 = vshll.u32 %v3307_v5, 16  ;;  %v1095_v14 = vrot.slane %v1094_v60, 4  ;;  %v2486_v15 = vrot.slane %v2484_v6, 4  ;;  %v2489_v16 = vrot.slane %v2487_v7, 5  ;;  %v3311_v26 = vld [vmem:[%s3828_s23 + $0xb4] sm:$0x1] }
  0x6b   : > { %3553 = vmatmul.mubr.msk.bf16.gmra.mrb[4].mxu0 %vm188_vm1, %v3265_v13  ;;  %v2495_v17 = vrot.slane %v2493_v44, 5  ;;  %v1109_v22 = vrot.slane %v1108_v9, 4  ;;  %v2500_v23 = vrot.slane %v2498_v10, 4  ;;  %v2503_v20 = vrot.slane %v2501_v11, 5  ;;  %v3767_v60 = vld [vmem:[%s3828_s23 + $0xe8] ss:$8 sps:$4 sm:$0xff]  }
  0x6c   : > { %3558 = vmatprep.mubr.msk.bf16.mxu0 %vm188_vm1, %v3758_v41  ;;  %v2509_v24 = vrot.slane %v2507_v12, 5  ;;  %v1100_v30 = vsel %vm3904_vm4, %v1095_v14, %v1099_v63  ;;  %v2490_v31 = vor.u32 %v2489_v16, %v2486_v15  ;;  %v1116_v33 = vshrl.u32 %v3140_v18, 16  ;;  %v3146_v14 = vld [vmem:[%s3828_s23 + $0xb8] sm:$0xf] }
  0x6d   : > { %v1119_v34 = vshll.u32 %v3140_v18, 16  ;;  %v1114_v36 = vsel %vm3904_vm4, %v1109_v22, %v1113_v2  ;;  %v2504_v37 = vor.u32 %v2503_v20, %v2500_v23  ;;  %v1125_v40 = vshll.u32 %v3141_v28, 16  ;;  %v3769_v15 = vld [vmem:[%s3828_s23 + $0xf8] ss:$8 sps:$4 sm:$0xff]   ;;  %v3147_v20 = vld [vmem:[%s3828_s23 + $0xbc] sm:$0x1] }
  0x6e   : > { %3479 = vmatmul.mubr.msk.bf16.vlgmr.msra.gmra.mrb[0].mxu1 %vm188_vm1, %v3759_v46  ;;  %v1130_v25 = vshrl.u32 %v3142_v32, 16  ;;  %v4138_v41 = vcombine.low %v1100_v30, %v1114_v36  ;;  %v1118_v45 = vrot.slane %v1116_v33, 4  ;;  %v1133_v51 = vshll.u32 %v3142_v32, 16  ;;  %v3312_v33 = vld [vmem:[%s3828_s23 + $0xb8] sm:$0xf] }
  0x6f   : > { %3487 = vmatpush3.bf16.msra.mxu1 %v996_v42  ;;  %3482 = vmatprep.mubr.msk.bf16.mxu1 %vm188_vm1, %v3761_v53  ;;  %v2491_v42 = vrot.slane %v2490_v31, 4  ;;  %v1121_v46 = vrot.slane %v1119_v34, 5  ;;  %v2505_v49 = vrot.slane %v2504_v37, 4  ;;  %v1127_v13 = vrot.slane %v1125_v40, 5  ;;  %v3313_v40 = vld [vmem:[%s3828_s23 + $0xbc] sm:$0x1] }
  0x70   : > { %3722 = vmatprep.subr.msk.bf16.mxu1 %vm201_vm0, %v3152_v35  ;;  %v4134_v35 = vld [vmem:[%s4346_s1 + $0xe] sm:$0x3]  ;;  %v1132_v50 = vrot.slane %v1130_v25, 4  ;;  %v1139_v55 = vshll.u32 %v3143_v38, 16  ;;  %v1135_v61 = vrot.slane %v1133_v51, 5  ;;  %v2512_v62 = vshrl.u32 %v3308_v21, 16 }
  0x71   : > { %v2496_v53 = vsel %vm3904_vm4, %v2491_v42, %v2495_v17  ;;  %v1122_v54 = vor.u32 %v1121_v46, %v1118_v45  ;;  %v4156_v56 = vsel %vm201_vm0, %v4134_v35, 0  ;;  %v2510_v58 = vsel %vm3904_vm4, %v2505_v49, %v2509_v24  ;;  %v3314_v25 = vld [vmem:[%s3828_s23 + $0xc0] sm:$0xf]  ;;  %v3768_v42 = vld [vmem:[%s3828_s23 + $0xf0] ss:$8 sps:$4 sm:$0xff]  }
  0x72   : > { %v2515_v63 = vshll.u32 %v3308_v21, 16  ;;  %v4165_v0 = vcombine.low %v2496_v53, %v2510_v58  ;;  %v1141_v2 = vrot.slane %v1139_v55, 5  ;;  %v2521_v3 = vshll.u32 %v3309_v27, 16  ;;  %v3771_v53 = vld [vmem:[%s3828_s23 + $0x108] ss:$8 sps:$4 sm:$0xff]  }
  0x73   : > { %3559 = vmatmul.mubr.msk.bf16.vlgmr.msra.gmra.mrb[0].mxu0 %vm188_vm1, %v3760_v4  ;;  %v1123_v1 = vrot.slane %v1122_v54, 4  ;;  %v3144_v4 = vld [vmem:[%s3828_s23 + $0xb0] sm:$0xf]  ;;  %v1136_v5 = vor.u32 %v1135_v61, %v1132_v50  ;;  %v2514_v6 = vrot.slane %v2512_v62, 4  ;;  %v2526_v44 = vshrl.u32 %v3310_v57, 16 }
  0x74   : > { %3567 = vmatpush3.bf16.msra.mxu0 %v4094_v43  ;;  %3562 = vmatprep.mubr.msk.bf16.mxu0 %vm188_vm1, %v3762_v8  ;;  %v4152_v43 = vld [vmem:[%s4346_s1 + $0x1e] sm:$0x3]  ;;  %v2517_v7 = vrot.slane %v2515_v63, 5  ;;  %v3145_v8 = vld [vmem:[%s3828_s23 + $0xb4] sm:$0x1]  ;;  %v2523_v10 = vrot.slane %v2521_v3, 5 }
  0x75   : > { %3730 = vmatprep.subr.msk.bf16.mxu0 %vm201_vm0, %v4083_v39  ;;  %v3766_v39 = vld [vmem:[%s3828_s23 + $0xe0] ss:$8 sps:$4 sm:$0xff]   ;;  %v1128_v9 = vsel %vm3904_vm4, %v1123_v1, %v1127_v13  ;;  %v2529_v11 = vshll.u32 %v3310_v57, 16  ;;  %v2535_v12 = vshll.u32 %v3311_v26, 16  ;;  %v1137_v16 = vrot.slane %v1136_v5, 4 }
  0x76   : > { %3483 = vmatmul.mubr.msk.bf16.gmra.mrb[4].mxu1 %vm188_vm1, %v3763_v19  ;;  %v2518_v17 = vor.u32 %v2517_v7, %v2514_v6  ;;  %v2528_v18 = vrot.slane %v2526_v44, 4  ;;  %v4176_v19 = vsel %vm201_vm0, %v4152_v43, 0  ;;  %v1144_v24 = vshrl.u32 %v3144_v4, 16  ;;  %v3770_v13 = vld [vmem:[%s3828_s23 + $0x100] ss:$8 sps:$4 sm:$0xff]  }
  0x77   : > { %3488 = vmatprep.mubr.msk.bf16.mxu1 %vm188_vm1, %v3765_v29  ;;  %v2531_v22 = vrot.slane %v2529_v11, 5  ;;  %v2537_v23 = vrot.slane %v2535_v12, 5  ;;  %v1147_v28 = vshll.u32 %v3144_v4, 16  ;;  %v1142_v29 = vsel %vm3904_vm4, %v1137_v16, %v1141_v2  ;;  %v3315_v55 = vld [vmem:[%s3828_s23 + $0xc4] sm:$0x1] }
  0x78   : > { %v2519_v30 = vrot.slane %v2518_v17, 4  ;;  %v1153_v31 = vshll.u32 %v3145_v8, 16  ;;  %v1158_v32 = vshrl.u32 %v3146_v14, 16  ;;  %v4184_v34 = vcombine.low %v1128_v9, %v1142_v29  ;;  %v3148_v63 = vld [vmem:[%s3828_s23 + $0xc0] sm:$0xf] }
  0x79   : > { %v2532_v36 = vor.u32 %v2531_v22, %v2528_v18  ;;  %v1146_v37 = vrot.slane %v1144_v24, 4  ;;  %v1149_v38 = vrot.slane %v1147_v28, 5  ;;  %v1161_v49 = vshll.u32 %v3146_v14, 16  ;;  %v3316_v18 = vld [vmem:[%s3828_s23 + $0xc8] sm:$0xf] }
  0x7a   : > { %v2524_v45 = vsel %vm3904_vm4, %v2519_v30, %v2523_v10  ;;  %v1155_v46 = vrot.slane %v1153_v31, 5  ;;  %v1160_v21 = vrot.slane %v1158_v32, 4  ;;  %v1167_v27 = vshll.u32 %v3147_v20, 16  ;;  %v3151_v10 = vld [vmem:[%s3828_s23 + $0xcc] sm:$0x1] }
  0x7b   : > { %3563 = vmatmul.mubr.msk.bf16.gmra.mrb[4].mxu0 %vm188_vm1, %v3764_v52  ;;  %v2533_v50 = vrot.slane %v2532_v36, 4  ;;  %v1150_v51 = vor.u32 %v1149_v38, %v1146_v37  ;;  %v2540_v52 = vshrl.u32 %v3312_v33, 16  ;;  %v1163_v54 = vrot.slane %v1161_v49, 5  ;;  %v3317_v24 = vld [vmem:[%s3828_s23 + $0xcc] sm:$0x1] }
  0x7c   : > { %3568 = vmatprep.mubr.msk.bf16.mxu0 %vm188_vm1, %v3766_v39  ;;  %v2543_v57 = vshll.u32 %v3312_v33, 16  ;;  %v2549_v39 = vshll.u32 %v3313_v40, 16  ;;  %v2554_v58 = vshrl.u32 %v3314_v25, 16  ;;  %v1169_v26 = vrot.slane %v1167_v27, 5  ;;  %v3772_v28 = vld [vmem:[%s3828_s23 + $0x110] ss:$8 sps:$4 sm:$0xff]  }
  0x7d   : > { %v1151_v61 = vrot.slane %v1150_v51, 4  ;;  %v2542_v62 = vrot.slane %v2540_v52, 4  ;;  %v1164_v2 = vor.u32 %v1163_v54, %v1160_v21  ;;  %v2557_v7 = vshll.u32 %v3314_v25, 16  ;;  %v3318_v32 = vld [vmem:[%s3828_s23 + $0xd0] sm:$0xf] }
  0x7e   : > { %3489 = vmatmul.mubr.msk.bf16.vlgmr.msra.gmra.mrb[0].mxu1 %vm188_vm1, %v3767_v60  ;;  %v2545_v3 = vrot.slane %v2543_v57, 5  ;;  %v2551_v4 = vrot.slane %v2549_v39, 5  ;;  %v3150_v60 = vld [vmem:[%s3828_s23 + $0xc8] sm:$0xf]  ;;  %v2556_v6 = vrot.slane %v2554_v58, 4  ;;  %v2563_v44 = vshll.u32 %v3315_v55, 16 }
  0x7f   : > { %3497 = vmatpush3.bf16.msra.mxu1 %v4100_v47  ;;  %3492 = vmatprep.mubr.msk.bf16.mxu1 %vm188_vm1, %v3769_v15  ;;  %v2538_v47 = vsel %vm3904_vm4, %v2533_v50, %v2537_v23  ;;  %v1156_v5 = vsel %vm3904_vm4, %v1151_v61, %v1155_v46  ;;  %v1165_v8 = vrot.slane %v1164_v2, 4  ;;  %v1172_v11 = vshrl.u32 %v3148_v63, 16  ;;  %v3319_v40 = vld [vmem:[%s3828_s23 + $0xd4] sm:$0x1]  ;;  %v3161_v21 = vld [vmem:[%s3828_s23 + $0xd8] sm:$0xf] }
  0x80   : > { %3723 = vmatprep.subr.msk.bf16.mxu1 %vm201_vm0, %v4134_v35  ;;  %v4202_v1 = vcombine.low %v2524_v45, %v2538_v47  ;;  %v3149_v35 = vld [vmem:[%s3828_s23 + $0xc4] sm:$0x1]  ;;  %v2546_v9 = vor.u32 %v2545_v3, %v2542_v62  ;;  %v1175_v12 = vshll.u32 %v3148_v63, 16  ;;  %v2559_v14 = vrot.slane %v2557_v7, 5  ;;  %v3162_v51 = vld [vmem:[%s3828_s23 + $0xdc] sm:$0x1] }
  0x81   : > { %v2565_v15 = vrot.slane %v2563_v44, 5  ;;  %v1181_v16 = vshll.u32 %v3149_v35, 16  ;;  %v1186_v17 = vshrl.u32 %v3150_v60, 16  ;;  %v1174_v23 = vrot.slane %v1172_v11, 4  ;;  %v3163_v55 = vld [vmem:[%s3828_s23 + $0xe0] sm:$0xf] }
  0x82   : > { %v2547_v22 = vrot.slane %v2546_v9, 4  ;;  %v1177_v20 = vrot.slane %v1175_v12, 5  ;;  %v2560_v29 = vor.u32 %v2559_v14, %v2556_v6  ;;  %v1189_v37 = vshll.u32 %v3150_v60, 16  ;;  %v3164_v63 = vld [vmem:[%s3828_s23 + $0xe4] sm:$0x1] }
  0x83   : > { %3569 = vmatmul.mubr.msk.bf16.vlgmr.msra.gmra.mrb[0].mxu0 %vm188_vm1, %v3768_v42  ;;  %v1183_v30 = vrot.slane %v1181_v16, 5  ;;  %v1188_v31 = vrot.slane %v1186_v17, 4  ;;  %v1195_v38 = vshll.u32 %v3151_v10, 16  ;;  %v2568_v42 = vshrl.u32 %v3316_v18, 16  ;;  %v3329_v60 = vld [vmem:[%s3828_s23 + $0xe0] sm:$0xf] }
  0x84   : > { %3577 = vmatpush3.bf16.msra.mxu0 %v4104_v48  ;;  %3572 = vmatprep.mubr.msk.bf16.mxu0 %vm188_vm1, %v3770_v13  ;;  %v1170_v48 = vsel %vm3904_vm4, %v1165_v8, %v1169_v26  ;;  %v2552_v33 = vsel %vm3904_vm4, %v2547_v22, %v2551_v4  ;;  %v1178_v36 = vor.u32 %v1177_v20, %v1174_v23  ;;  %v2561_v25 = vrot.slane %v2560_v29, 4  ;;  %v3330_v8 = vld [vmem:[%s3828_s23 + $0xe4] sm:$0x1]  ;;  %v3331_v12 = vld [vmem:[%s3828_s23 + $0xe8] sm:$0xf] }
  0x85   : > { %3731 = vmatprep.subr.msk.bf16.mxu0 %vm201_vm0, %v4152_v43  ;;  %v3155_v43 = vcombine.low %v1156_v5, %v1170_v48  ;;  %v2571_v45 = vshll.u32 %v3316_v18, 16  ;;  %v2577_v46 = vshll.u32 %v3317_v24, 16  ;;  %v1191_v49 = vrot.slane %v1189_v37, 5  ;;  %v3332_v24 = vld [vmem:[%s3828_s23 + $0xec] sm:$0x1] }
  0x86   : > { %3493 = vmatmul.mubr.msk.bf16.gmra.mrb[4].mxu1 %vm188_vm1, %v3771_v53  ;;  %v1197_v13 = vrot.slane %v1195_v38, 5  ;;  %v2582_v50 = vshrl.u32 %v3318_v32, 16  ;;  %v2566_v27 = vsel %vm3904_vm4, %v2561_v25, %v2565_v15  ;;  %v2570_v52 = vrot.slane %v2568_v42, 4  ;;  %v3167_v25 = vld [vmem:[%s3828_s23 + $0xf0] sm:$0xf] }
  0x87   : > { %3498 = vmatprep.mubr.msk.bf16.mxu1 %vm188_vm1, %v4138_v41  ;;  %v1179_v41 = vrot.slane %v1178_v36, 4  ;;  %v2573_v53 = vrot.slane %v2571_v45, 5  ;;  %v2579_v54 = vrot.slane %v2577_v46, 5  ;;  %v3323_v57 = vcombine.low %v2552_v33, %v2566_v27  ;;  %v3165_v33 = vld [vmem:[%s3828_s23 + $0xe8] sm:$0xf] }
  0x88   : > { %v1192_v58 = vor.u32 %v1191_v49, %v1188_v31  ;;  %v2584_v47 = vrot.slane %v2582_v50, 4  ;;  %v2585_v26 = vshll.u32 %v3318_v32, 16  ;;  %v2591_v62 = vshll.u32 %v3319_v40, 16  ;;  %v3166_v40 = vld [vmem:[%s3828_s23 + $0xec] sm:$0x1] }
  0x89   : > { %v1184_v39 = vsel %vm3904_vm4, %v1179_v41, %v1183_v30  ;;  %v2574_v61 = vor.u32 %v2573_v53, %v2570_v52  ;;  %v1318_v2 = vshrl.u32 %v3161_v21, 16  ;;  %v1321_v4 = vshll.u32 %v3161_v21, 16  ;;  %v3168_v27 = vld [vmem:[%s3828_s23 + $0xf4] sm:$0x1] }
  0x8a   : > { %v1193_v3 = vrot.slane %v1192_v58, 4  ;;  %v1327_v35 = vshll.u32 %v3162_v51, 16  ;;  %v2587_v6 = vrot.slane %v2585_v26, 5  ;;  %v2593_v7 = vrot.slane %v2591_v62, 5  ;;  %v3334_v62 = vld [vmem:[%s3828_s23 + $0xf4] sm:$0x1] }
  0x8b   : > { %3573 = vmatmul.mubr.msk.bf16.gmra.mrb[4].mxu0 %vm188_vm1, %v3772_v28  ;;  %v2575_v5 = vrot.slane %v2574_v61, 4  ;;  %v1320_v44 = vrot.slane %v1318_v2, 4  ;;  %v1335_v16 = vshll.u32 %v3163_v55, 16  ;;  %v1341_v18 = vshll.u32 %v3164_v63, 16  ;;  %v3335_v63 = vld [vmem:[%s3828_s23 + $0xf8] sm:$0xf] }
  0x8c   : > { %3578 = vmatprep.mubr.msk.bf16.mxu0 %vm188_vm1, %v4165_v0  ;;  %v1332_v0 = vshrl.u32 %v3163_v55, 16  ;;  %v1198_v9 = vsel %vm3904_vm4, %v1193_v3, %v1197_v13  ;;  %v1329_v10 = vrot.slane %v1327_v35, 5  ;;  %v2714_v48 = vshrl.u32 %v3329_v60, 16 }
  0x8d   : > { %v3156_v14 = vcombine.low %v1184_v39, %v1198_v9  ;;  %v2580_v15 = vsel %vm3904_vm4, %v2575_v5, %v2579_v54  ;;  %v2717_v22 = vshll.u32 %v3329_v60, 16  ;;  %v1337_v20 = vrot.slane %v1335_v16, 5  ;;  %v3333_v39 = vld [vmem:[%s3828_s23 + $0xf0] sm:$0xf]  ;;  %v3171_v16 = vld [vmem:[%s3828_s23 + $0x100] sm:$0xf] }
  0x8e   : > { %3499 = vmatmul.mubr.msk.bf16.vlgmr.msra.gmra.mrb[0].mxu1 %vm188_vm1, %v4184_v34  ;;  %v1323_v34 = vrot.slane %v1321_v4, 5  ;;  %v1334_v11 = vrot.slane %v1332_v0, 4  ;;  %v2723_v28 = vshll.u32 %v3330_v8, 16  ;;  %v1343_v30 = vrot.slane %v1341_v18, 5  ;;  %v3336_v0 = vld [vmem:[%s3828_s23 + $0xfc] sm:$0x1] }
  0x8f   : > { %3507 = vmatpush3.bf16.msra.mxu1 %v4156_v56  ;;  %3502 = vmatprep.mubr.msk.bf16.mxu1 %vm188_vm1, %v3155_v43  ;;  %v2588_v56 = vor.u32 %v2587_v6, %v2584_v47  ;;  %v2728_v43 = vshrl.u32 %v3331_v12, 16  ;;  %v2716_v31 = vrot.slane %v2714_v48, 4  ;;  %v2719_v32 = vrot.slane %v2717_v22, 5 }
  0x90   : > { %v1324_v17 = vor.u32 %v1323_v34, %v1320_v44  ;;  %v2725_v37 = vrot.slane %v2723_v28, 5  ;;  %v2731_v46 = vshll.u32 %v3331_v12, 16  ;;  %v2737_v41 = vshll.u32 %v3332_v24, 16  ;;  %v3169_v44 = vld [vmem:[%s3828_s23 + $0xf8] sm:$0xf] }
  0x91   : > { %v2589_v23 = vrot.slane %v2588_v56, 4  ;;  %v2730_v38 = vrot.slane %v2728_v43, 4  ;;  %v2720_v45 = vor.u32 %v2719_v32, %v2716_v31  ;;  %v1346_v49 = vshrl.u32 %v3165_v33, 16 }
  0x92   : > { %v1325_v29 = vrot.slane %v1324_v17, 4  ;;  %v1349_v13 = vshll.u32 %v3165_v33, 16  ;;  %v2733_v51 = vrot.slane %v2731_v46, 5  ;;  %v1355_v52 = vshll.u32 %v3166_v40, 16 }
  0x93   : > { %3579 = vmatmul.mubr.msk.bf16.vlgmr.msra.gmra.mrb[0].mxu0 %vm188_vm1, %v4202_v1  ;;  %v2594_v36 = vsel %vm3904_vm4, %v2589_v23, %v2593_v7  ;;  %v1338_v1 = vor.u32 %v1337_v20, %v1334_v11  ;;  %v2721_v50 = vrot.slane %v2720_v45, 4  ;;  %v1360_v53 = vshrl.u32 %v3167_v25, 16  ;;  %v3170_v11 = vld [vmem:[%s3828_s23 + $0xfc] sm:$0x1]  ;;  %v3339_v45 = vld [vmem:[%s3828_s23 + $0x108] sm:$0xf] }
  0x94   : > { %3587 = vmatpush3.bf16.msra.mxu0 %v4176_v19  ;;  %3582 = vmatprep.mubr.msk.bf16.mxu0 %vm188_vm1, %v3323_v57  ;;  %v3324_v42 = vcombine.low %v2580_v15, %v2594_v36  ;;  %v1330_v19 = vsel %vm3904_vm4, %v1325_v29, %v1329_v10  ;;  %v1348_v55 = vrot.slane %v1346_v49, 4  ;;  %v1351_v57 = vrot.slane %v1349_v13, 5  ;;  %v3172_v29 = vld [vmem:[%s3828_s23 + $0x104] sm:$0x1] }
  0x95   : > { %v1339_v21 = vrot.slane %v1338_v1, 4  ;;  %v2734_v47 = vor.u32 %v2733_v51, %v2730_v38  ;;  %v2739_v61 = vrot.slane %v2737_v41, 5  ;;  %v1357_v26 = vrot.slane %v1355_v52, 5  ;;  %v3337_v38 = vld [vmem:[%s3828_s23 + $0x100] sm:$0xf] }
  0x96   : > { %3503 = vmatmul.mubr.msk.bf16.gmra.mrb[4].mxu1 %vm188_vm1, %v3156_v14  ;;  %v1352_v2 = vor.u32 %v1351_v57, %v1348_v55  ;;  %v1362_v3 = vrot.slane %v1360_v53, 4  ;;  %v1363_v4 = vshll.u32 %v3167_v25, 16  ;;  %v1369_v35 = vshll.u32 %v3168_v27, 16  ;;  %v3338_v13 = vld [vmem:[%s3828_s23 + $0x104] sm:$0x1] }
  0x97   : > { %v1344_v54 = vsel %vm3904_vm4, %v1339_v21, %v1343_v30  ;;  %v2726_v60 = vsel %vm3904_vm4, %v2721_v50, %v2725_v37  ;;  %v2735_v5 = vrot.slane %v2734_v47, 4  ;;  %v2742_v6 = vshrl.u32 %v3333_v39, 16  ;;  %v3340_v57 = vld [vmem:[%s3828_s23 + $0x10c] sm:$0x1] }
  0x98   : > { %v3178_v58 = vcombine.low %v1330_v19, %v1344_v54  ;;  %v2745_v7 = vshll.u32 %v3333_v39, 16  ;;  %v1353_v8 = vrot.slane %v1352_v2, 4  ;;  %v1365_v9 = vrot.slane %v1363_v4, 5 }
  0x99   : > { %v2751_v34 = vshll.u32 %v3334_v62, 16  ;;  %v2756_v10 = vshrl.u32 %v3335_v63, 16  ;;  %v2740_v12 = vsel %vm3904_vm4, %v2735_v5, %v2739_v61  ;;  %v1371_v14 = vrot.slane %v1369_v35, 5  ;;  %v3173_v62 = vld [vmem:[%s3828_s23 + $0x108] sm:$0xf] }
  0x9a   : > { %3508 = vmatprep.mubr.msk.bf16.mxu1 %vm188_vm1, %v3178_v58  ;;  %v2744_v15 = vrot.slane %v2742_v6, 4  ;;  %v2747_v56 = vrot.slane %v2745_v7, 5  ;;  %v3346_v17 = vcombine.low %v2726_v60, %v2740_v12  ;;  %v1358_v18 = vsel %vm3904_vm4, %v1353_v8, %v1357_v26  ;;  %v3175_v35 = vld [vmem:[%s3828_s23 + $0x110] sm:$0xf]  ;;  %v3174_v7 = vld [vmem:[%s3828_s23 + $0x10c] sm:$0x1] }
  0x9b   : > { %3583 = vmatmul.mubr.msk.bf16.gmra.mrb[4].mxu0 %vm188_vm1, %v3324_v42  ;;  %v1366_v48 = vor.u32 %v1365_v9, %v1362_v3  ;;  %v2758_v22 = vrot.slane %v2756_v10, 4  ;;  %v2759_v20 = vshll.u32 %v3335_v63, 16  ;;  %v2765_v24 = vshll.u32 %v3336_v0, 16 }
  0x9c   : > { %v2748_v23 = vor.u32 %v2747_v56, %v2744_v15  ;;  %v1374_v28 = vshrl.u32 %v3169_v44, 16  ;;  %3588 = vmatprep.mubr.msk.bf16.mxu0 %vm188_vm1, %v3346_v17  ;;  %v1377_v30 = vshll.u32 %v3169_v44, 16  ;;  %v1383_v31 = vshll.u32 %v3170_v11, 16 }
  0x9d   : > { %v1367_v43 = vrot.slane %v1366_v48, 4  ;;  %v1388_v32 = vshrl.u32 %v3171_v16, 16  ;;  %v2753_v36 = vrot.slane %v2751_v34, 5  ;;  %v2761_v1 = vrot.slane %v2759_v20, 5  ;;  %v3341_v48 = vld [vmem:[%s3828_s23 + $0x110] sm:$0xf] }
  0x9e   : > { %v2749_v33 = vrot.slane %v2748_v23, 4  ;;  %v1376_v37 = vrot.slane %v1374_v28, 4  ;;  %v2767_v25 = vrot.slane %v2765_v24, 5  ;;  %v1379_v42 = vrot.slane %v1377_v30, 5  ;;  %v3343_v24 = vld [vmem:[%s3828_s23 + $0x118] sm:$0xf] }
  0x9f   : > { %v1372_v40 = vsel %vm3904_vm4, %v1367_v43, %v1371_v14  ;;  %v1385_v19 = vrot.slane %v1383_v31, 5  ;;  %v2762_v21 = vor.u32 %v2761_v1, %v2758_v22  ;;  %v1390_v41 = vrot.slane %v1388_v32, 4  ;;  %v3176_v14 = vld [vmem:[%s3828_s23 + $0x114] sm:$0x1] }
  0xa0   : > { %v3179_v46 = vcombine.low %v1358_v18, %v1372_v40  ;;  %v1391_v49 = vshll.u32 %v3171_v16, 16  ;;  %v1380_v50 = vor.u32 %v1379_v42, %v1376_v37  ;;  %v1397_v51 = vshll.u32 %v3172_v29, 16  ;;  %v3342_v31 = vld [vmem:[%s3828_s23 + $0x114] sm:$0x1] }
  0xa1   : > { %v2770_v27 = vshrl.u32 %v3337_v38, 16  ;;  %v2773_v52 = vshll.u32 %v3337_v38, 16  ;;  %v2754_v53 = vsel %vm3904_vm4, %v2749_v33, %v2753_v36  ;;  %v2763_v54 = vrot.slane %v2762_v21, 4 }
  0xa2   : > { %3509 = vmatmul.mubr.msk.bf16.vlgmr.msra.gmra.mrb[0].mxu1 %vm188_vm1, %v3179_v46  ;;  %v1393_v55 = vrot.slane %v1391_v49, 5  ;;  %v2784_v39 = vshrl.u32 %v3339_v45, 16  ;;  %v1381_v58 = vrot.slane %v1380_v50, 4  ;;  %v2779_v26 = vshll.u32 %v3338_v13, 16 }
  0xa3   : > { %v2772_v47 = vrot.slane %v2770_v27, 4  ;;  %v2775_v61 = vrot.slane %v2773_v52, 5  ;;  %v2768_v63 = vsel %vm3904_vm4, %v2763_v54, %v2767_v25  ;;  %v1399_v3 = vrot.slane %v1397_v51, 5  ;;  %v3344_v25 = vld [vmem:[%s3828_s23 + $0x11c] sm:$0x1] }
  0xa4   : > { %v1394_v2 = vor.u32 %v1393_v55, %v1390_v41  ;;  %v2786_v4 = vrot.slane %v2784_v39, 4  ;;  %v3347_v0 = vcombine.low %v2754_v53, %v2768_v63  ;;  %v1386_v60 = vsel %vm3904_vm4, %v1381_v58, %v1385_v19 }
  0xa5   : > { %v2776_v5 = vor.u32 %v2775_v61, %v2772_v47  ;;  %v2787_v6 = vshll.u32 %v3339_v45, 16  ;;  %v2793_v8 = vshll.u32 %v3340_v57, 16  ;;  %v1402_v9 = vshrl.u32 %v3173_v62, 16 }
  0xa6   : > { %v1395_v44 = vrot.slane %v1394_v2, 4  ;;  %v1405_v34 = vshll.u32 %v3173_v62, 16  ;;  %3589 = vmatmul.mubr.msk.bf16.vlgmr.msra.gmra.mrb[0].mxu0 %vm188_vm1, %v3347_v0  ;;  %v2781_v11 = vrot.slane %v2779_v26, 5  ;;  %v1416_v15 = vshrl.u32 %v3175_v35, 16 }
  0xa7   : > { %v2777_v10 = vrot.slane %v2776_v5, 4  ;;  %v2789_v12 = vrot.slane %v2787_v6, 5  ;;  %v1404_v16 = vrot.slane %v1402_v9, 4  ;;  %v1411_v18 = vshll.u32 %v3174_v7, 16 }
  0xa8   : > { %v1400_v56 = vsel %vm3904_vm4, %v1395_v44, %v1399_v3  ;;  %v1407_v17 = vrot.slane %v1405_v34, 5  ;;  %v2795_v20 = vrot.slane %v2793_v8, 5  ;;  %v1418_v43 = vrot.slane %v1416_v15, 4 }
  0xa9   : > { %v3180_v22 = vcombine.low %v1386_v60, %v1400_v56  ;;  %v2790_v23 = vor.u32 %v2789_v12, %v2786_v4  ;;  %v1419_v29 = vshll.u32 %v3175_v35, 16  ;;  %v1425_v30 = vshll.u32 %v3176_v14, 16 }
  0xaa   : > { %v1408_v28 = vor.u32 %v1407_v17, %v1404_v16  ;;  %v2782_v32 = vsel %vm3904_vm4, %v2777_v10, %v2781_v11  ;;  %v2798_v36 = vshrl.u32 %v3341_v48, 16  ;;  %v2801_v1 = vshll.u32 %v3341_v48, 16 }
  0xab   : > { %3512 = vmatprep.mubr.msk.bf16.mxu1 %vm188_vm1, %v3180_v22  ;;  %v2791_v33 = vrot.slane %v2790_v23, 4  ;;  %v1413_v38 = vrot.slane %v1411_v18, 5  ;;  %v1421_v40 = vrot.slane %v1419_v29, 5  ;;  %v2812_v42 = vshrl.u32 %v3343_v24, 16 }
  0xac   : > { %v1409_v37 = vrot.slane %v1408_v28, 4  ;;  %v2800_v45 = vrot.slane %v2798_v36, 4  ;;  %v2803_v46 = vrot.slane %v2801_v1, 5  ;;  %v2807_v21 = vshll.u32 %v3342_v31, 16 }
  0xad   : > { %v2796_v19 = vsel %vm3904_vm4, %v2791_v33, %v2795_v20  ;;  %v1422_v49 = vor.u32 %v1421_v40, %v1418_v43  ;;  %v1427_v13 = vrot.slane %v1425_v30, 5  ;;  %v2814_v51 = vrot.slane %v2812_v42, 4 }
  0xae   : > { %v3348_v41 = vcombine.low %v2782_v32, %v2796_v19  ;;  %v2804_v50 = vor.u32 %v2803_v46, %v2800_v45  ;;  %v2815_v27 = vshll.u32 %v3343_v24, 16  ;;  %v2821_v52 = vshll.u32 %v3344_v25, 16 }
  0xaf   : > { %v1414_v53 = vsel %vm3904_vm4, %v1409_v37, %v1413_v38  ;;  %v1423_v54 = vrot.slane %v1422_v49, 4  ;;  %v2809_v57 = vrot.slane %v2807_v21, 5 }
  0xb0   : > { %3592 = vmatprep.mubr.msk.bf16.mxu0 %vm188_vm1, %v3348_v41  ;;  %v2805_v55 = vrot.slane %v2804_v50, 4  ;;  %v2817_v39 = vrot.slane %v2815_v27, 5  ;;  %v2823_v26 = vrot.slane %v2821_v52, 5 }
  0xb1   : > { %v1428_v58 = vsel %vm3904_vm4, %v1423_v54, %v1427_v13 }
  0xb2   : > { %v3181_v47 = vcombine.low %v1414_v53, %v1428_v58  ;;  %v2818_v61 = vor.u32 %v2817_v39, %v2814_v51  ;;  %v2810_v62 = vsel %vm3904_vm4, %v2805_v55, %v2809_v57 }
  0xb4   : > { %3513 = vmatmul.mubr.msk.bf16.gmra.mrb[4].mxu1 %vm188_vm1, %v3181_v47  ;;  %v2819_v63 = vrot.slane %v2818_v61, 4 }
  0xb6   : > { %v2824_v2 = vsel %vm3904_vm4, %v2819_v63, %v2823_v26 }
  0xb7   : > { %v3349_v3 = vcombine.low %v2810_v62, %v2824_v2 }
  0xb9   : > { %3593 = vmatmul.mubr.msk.bf16.gmra.mrb[4].mxu0 %vm188_vm1, %v3349_v3 }
 0x175   : > { %v3510_v4 = vpop.f32.mrb[0].mxu1 }
 0x176   : > { %v1492_v35 = vpop.f32.mrb[1].mxu1 }
 0x177   : > { %v3511_v0 = vpop.f32.mrb[2].mxu1 }
 0x178   : > { %v1495_v60 = vpop.f32.mrb[3].mxu1 }
 0x179   : > { %v3590_v5 = vpop.f32.mrb[0].mxu0 }
 0x17a   : > { %v3596_v6 = vadd.f32 %v3590_v5, %v3510_v4  ;;  %v2888_v7 = vpop.f32.mrb[1].mxu0 }
 0x17b   : > { %v3597_v44 = vadd.f32 %v2888_v7, %v1492_v35  ;;  %v3591_v8 = vpop.f32.mrb[2].mxu0 }
 0x17c   : > { %v3598_v9 = vadd.f32 %v3591_v8, %v3511_v0  ;;  %v2891_v34 = vpop.f32.mrb[3].mxu0  ;;  %v2951_v12 = vmul.f32 %v3596_v6, %v3596_v6  ;;  %v2931_v16 = vsel %vm2927_vm5, %v3596_v6, 0.0 }
 0x17d   : > { %v2949_v10 = vmul.f32 %v3597_v44, %v3597_v44  ;;  %v3599_v11 = vadd.f32 %v2891_v34, %v1495_v60  ;;  %v2928_v59 = vsel %vm2927_vm5, %v3597_v44, 0.0 }
 0x17e   : > { %v2952_v18 = vmul.f32 %v3598_v9, %v3598_v9  ;;  %v2960_v20 = vsel %vm2927_vm5, %v2951_v12, 0.0  ;;  %v2933_v24 = vsel %vm2927_vm5, %v3598_v9, 0.0 }
 0x17f   : > { %v2929_v14 = vsel %vm2927_vm5, %v3599_v11, 0.0  ;;  %v2950_v15 = vmul.f32 %v3599_v11, %v3599_v11  ;;  %v2957_v17 = vsel %vm2927_vm5, %v2949_v10, 0.0 }
 0x180   : > { %v2930_v56 = vadd.f32 %v2929_v14, %v2928_v59  ;;  %v2962_v29 = vsel %vm2927_vm5, %v2952_v18, 0.0 }
 0x181   : > { %v2958_v48 = vsel %vm2927_vm5, %v2950_v15, 0.0 }
 0x182   : > { %v2932_v22 = vadd.f32 %v2931_v16, %v2930_v56  ;;  %v2959_v23 = vadd.f32 %v2958_v48, %v2957_v17 }
 0x184   : > { %v2961_v28 = vadd.f32 %v2960_v20, %v2959_v23  ;;  %v2934_v43 = vadd.f32 %v2933_v24, %v2932_v22 }
 0x186   : > { %v2963_v30 = vadd.f32 %v2962_v29, %v2961_v28 }
 0x187   : > { %v3514_v31 = vpop.f32.mrb[4].mxu1 }
 0x188   : > { %v1508_v32 = vpop.f32.mrb[5].mxu1 }
 0x189   : > { %v3515_v33 = vpop.f32.mrb[6].mxu1 }
 0x18a   : > { %v1511_v36 = vpop.f32.mrb[7].mxu1 }
 0x18c   : > { %v3594_v1 = vpop.f32.mrb[4].mxu0 }
 0x18d   : > { %v3600_v37 = vadd.f32 %v3594_v1, %v3514_v31  ;;  %v2904_v38 = vpop.f32.mrb[5].mxu0 }
 0x18e   : > { %v3601_v40 = vadd.f32 %v2904_v38, %v1508_v32  ;;  %v3595_v25 = vpop.f32.mrb[6].mxu0 }
 0x18f   : > { %v3602_v42 = vadd.f32 %v3595_v25, %v3515_v33  ;;  %v2907_v19 = vpop.f32.mrb[7].mxu0  ;;  %v2955_v49 = vmul.f32 %v3600_v37, %v3600_v37  ;;  %v2939_v53 = vsel %vm2927_vm5, %v3600_v37, 0.0 }
 0x190   : > { %v2935_v45 = vsel %vm2927_vm5, %v3601_v40, 0.0  ;;  %v2953_v46 = vmul.f32 %v3601_v40, %v3601_v40  ;;  %v3603_v21 = vadd.f32 %v2907_v19, %v1511_v36 }
 0x191   : > { %v2936_v41 = vadd.f32 %v2935_v45, %v2934_v43  ;;  %v2956_v54 = vmul.f32 %v3602_v42, %v3602_v42  ;;  %v2968_v58 = vsel %vm2927_vm5, %v2955_v49, 0.0  ;;  %v2941_v47 = vsel %vm2927_vm5, %v3602_v42, 0.0 }
 0x192   : > { %v2964_v13 = vsel %vm2927_vm5, %v2953_v46, 0.0  ;;  %v2937_v50 = vsel %vm2927_vm5, %v3603_v21, 0.0  ;;  %v2954_v51 = vmul.f32 %v3603_v21, %v3603_v21 }
 0x193   : > { %v2965_v27 = vadd.f32 %v2964_v13, %v2963_v30  ;;  %v2938_v52 = vadd.f32 %v2937_v50, %v2936_v41  ;;  %v2970_v62 = vsel %vm2927_vm5, %v2956_v54, 0.0 }
 0x194   : > { %v2966_v55 = vsel %vm2927_vm5, %v2954_v51, 0.0 }
 0x195   : > { %v2940_v57 = vadd.f32 %v2939_v53, %v2938_v52  ;;  %v2967_v39 = vadd.f32 %v2966_v55, %v2965_v27 }
 0x197   : > { %v2942_v61 = vadd.f32 %v2941_v47, %v2940_v57  ;;  %v2969_v26 = vadd.f32 %v2968_v58, %v2967_v39 }
 0x199   : > { %v2943_v63 = vrot.slane %v2942_v61, 4  ;;  %v2971_v2 = vadd.f32 %v2970_v62, %v2969_v26 }
 0x19b   : > { %v2944_v3 = vadd.f32 %v2943_v63, %v2942_v61  ;;  %v2972_v4 = vrot.slane %v2971_v2, 4 }
 0x19d   : > { %v2945_v35 = vrot.slane %v2944_v3, 2  ;;  %v2973_v0 = vadd.f32 %v2972_v4, %v2971_v2 }
 0x19f   : > { %v2946_v60 = vadd.f32 %v2945_v35, %v2944_v3  ;;  %v2974_v5 = vrot.slane %v2973_v0, 2 }
 0x1a1   : > { %v2947_v6 = vrot.slane %v2946_v60, 1  ;;  %v2975_v7 = vadd.f32 %v2974_v5, %v2973_v0 }
 0x1a3   : > { %v2976_v44 = vrot.slane %v2975_v7, 1  ;;  %v2948_v8 = vadd.f32 %v2947_v6, %v2946_v60 }
 0x1a5   : > { %v2977_v9 = vadd.f32 %v2976_v44, %v2975_v7 }
 0x1a7   : > { %v2979_v34 = vsel %vm2978_vm6, %v2948_v8, %v2977_v9 }
 0x1a8   : > { %2981 = vst.msk [vmem:[%s146_s25] sm:$0x3] %vm2980_vm7, %v2979_v34 }
 0x1a9 PF: > { %s12_s9 = sadd.s32 1, %s3779_s9  }
 0x1aa   : > { %p9_p5 = scmp.ge.s32.totalorder %s12_s9, 4  }
 0x1ac   :  { %11 = sbr.rel (!%p9_p5) target bundleno = 1 (0x1), region = 80 }

// kernel: discriminator_cnn_block.3
= control target key start
LH: loop header
LB: loop body
LE: loop exit
PB: predicated region body
PF: predicated region fallthrough
CT: control target
= control target key end

     0   :  { %s3876_s15 = smov 0   ;;  %s4433_s0 = inlined_call_operand.vmem [shape: bf16[8,9,9,4], index: 0, kind: input, shape index: {}]   ;;  %s4434_s1 = inlined_call_operand.vmem [shape: bf16[16,4,8], index: 1, kind: input, shape index: {}]   ;;  %s4435_s2 = inlined_call_operand.vmem [shape: f32[1,8], index: 2, kind: input, shape index: {}]   ;;  %s4436_s3 = inlined_call_operand.vmem [shape: f32[1,8], index: 3, kind: input, shape index: {}]   ;;  %s4437_s4 = inlined_call_operand.vmem [shape: f32[2,8,8,8], index: 4, kind: output, shape index: {}]  }
   0x1 LB: > { %s3882_s16 = sadd.s32 4294967295, %s3849_s15   ;;  %p3105_p0 = scmp.ge.s32.totalorder %s3849_s15, 1  ;;  %s3849_s15 = sphi %s3876_s15, %s14_s15  }
   0x2   : > { %p164_p1 = scmp.lt.s32.totalorder %s3849_s15, 3 }
   0x4   : > { %p165_p2 = pnand %p3105_p0, %p164_p1 }
   0x5   : > { %v3118_v0 = vld [vmem:[%s4434_s1 + $0x2] sm:$0x3] (!%p165_p2)  ;;  %vm257_vm0 = vcmask (!%p165_p2), 1041408   ;;  %v3261_v1 = vld [vmem:[%s4434_s1 + $0x10] sm:$0x3] (!%p165_p2)  ;;  %s3106_s21 = sshll.u32 (!%p165_p2), %s3882_s16, 2 }
   0x6   : > { %168 = sbr.rel (%p165_p2) target bundleno = 410 (0x19a), region = 36  ;;  %3786 = vmatprep.subr.msk.bf16.mxu1 (!%p165_p2), %vm257_vm0, %v3118_v0  ;;  %3794 = vmatprep.subr.msk.bf16.mxu0 (!%p165_p2), %vm257_vm0, %v3261_v1  ;;  %v259_v2 = vsel (!%p165_p2), %vm257_vm0, %v3118_v0, 0  ;;  %v1631_v3 = vsel (!%p165_p2), %vm257_vm0, %v3261_v1, 0  ;;  %p192_p3 = scmp.lt.s32.totalorder (!%p165_p2), %s3106_s21, 7  ;;  %v212_v4 = vld [vmem:[%s4434_s1] sm:$0x3] (!%p165_p2) }
   0x7   : > { %3507 = vmatpush3.bf16.msra.mxu1 (!%p165_p2), %v259_v2  ;;  %3587 = vmatpush3.bf16.msra.mxu0 (!%p165_p2), %v1631_v3  ;;  %v3278_v5 = vld [vmem:[%s4434_s1 + $0x12] sm:$0x3] (!%p165_p2)  ;;  %vm244_vm1 = vcmask (!%p165_p2), 31744   ;;  %v359_v6 = vsel (!%p165_p2), %vm257_vm0, %v212_v4, 0  ;;  %v3135_v10 = vld [vmem:[%s4434_s1 + $0x4] sm:$0x3] (!%p165_p2) }
   0x8   : > { %3787 = vmatprep.subr.msk.bf16.mxu1 (!%p165_p2), %vm257_vm0, %v212_v4  ;;  %3795 = vmatprep.subr.msk.bf16.mxu0 (!%p165_p2), %vm257_vm0, %v3278_v5  ;;  %v1750_v7 = vsel (!%p165_p2), %vm257_vm0, %v3278_v5, 0  ;;  %v3303_v13 = vld [vmem:[%s4434_s1 + $0x14] sm:$0x3] (!%p165_p2)  ;;  %v584_v16 = vsel (!%p165_p2), %vm257_vm0, %v3135_v10, 0  ;;  %v3160_v18 = vld [vmem:[%s4434_s1 + $0x6] sm:$0x3] (!%p165_p2) }
   0x9   : > { %v3941_v20 = vld [vmem:[%s4434_s1 + $0x16] sm:$0x3] (!%p165_p2)  ;;  %v3946_v21 = vld [vmem:[%s4434_s1 + $0x8] sm:$0x3] (!%p165_p2)  ;;  %vm442_vm2 = vsmask.f32 (!%p165_p2), 3328 }
   0xa   : > { %vm443_vm3 = vsmask.f32 (!%p165_p2), 7440  ;;  %v1980_v24 = vsel (!%p165_p2), %vm257_vm0, %v3303_v13, 0  ;;  %v3953_v25 = vsel (!%p165_p2), %vm257_vm0, %v3160_v18, 0  ;;  %v3959_v26 = vsel (!%p165_p2), %vm257_vm0, %v3941_v20, 0  ;;  %p198_p4 = scmp.lt.s32.totalorder (!%p165_p2), %s3882_s16, 1 }
   0xb   : > { %v3963_v27 = vsel (!%p165_p2), %vm257_vm0, %v3946_v21, 0  ;;  %vm3984_vm4 = vmor (!%p165_p2), %vm442_vm2, %vm443_vm3  ;;  %v3422_v59 = vld [vmem:[%s4436_s3] ss:$0 sm:$0xff] (!%p165_p2)  ;;  %vm3037_vm6 = vcmask (!%p165_p2), 64512  }
   0xd   : > { %s4441_s21 = smov (!%p192_p3, %s3106_s21), 7  ;;  %s4443_s16 = smov (!%p198_p4, %s3882_s16), 1 }
   0xe   : > { %s3802_s26 = smul.u32 72, %s4441_s21  ;;  %s3425_s8 = sshll.u32 %s4443_s16, 6 }
   0xf   : > { %s4412_s11 = scalar_lea.vmem %s4437_s4, %s3425_s8 }
  0x10   : > { %s3908_s29 = scalar_lea.vmem %s4433_s0, %s3802_s26 }
  0x11   : > { %v3811_v8 = vld [vmem:[%s3908_s29 + $0x48] ss:$8 sps:$4 sm:$0xff]   ;;  %v3813_v11 = vld [vmem:[%s3908_s29 + $0x58] ss:$8 sps:$4 sm:$0xff]   ;;  %v427_v32 = vld [vmem:[%s3908_s29 + $0x4] sm:$0x1] }
  0x12   : > { %v3812_v9 = vld [vmem:[%s3908_s29 + $0x8] ss:$8 sps:$4 sm:$0xff]   ;;  %3508 = vmatprep.mubr.msk.bf16.mxu1 %vm244_vm1, %v3811_v8  ;;  %v3814_v12 = vld [vmem:[%s3908_s29 + $0x18] ss:$8 sps:$4 sm:$0xff]   ;;  %v429_v35 = vld [vmem:[%s3908_s29 + $0xc] sm:$0x1] }
  0x13   : > { %3588 = vmatprep.mubr.msk.bf16.mxu0 %vm244_vm1, %v3812_v9  ;;  %3509 = vmatmul.mubr.msk.bf16.vlgmr.msra.gmra.mrb[0].mxu1 %vm244_vm1, %v3813_v11  ;;  %v3815_v14 = vld [vmem:[%s3908_s29 + $0x68] ss:$8 sps:$4 sm:$0xff]   ;;  %v3817_v17 = vld [vmem:[%s3908_s29 + $0x78] ss:$8 sps:$4 sm:$0xff]   ;;  %v455_v38 = vshll.u32 %v427_v32, 16  ;;  %v469_v41 = vshll.u32 %v429_v35, 16 }
  0x14   : > { %3517 = vmatpush3.bf16.msra.mxu1 %v359_v6  ;;  %3589 = vmatmul.mubr.msk.bf16.vlgmr.msra.gmra.mrb[0].mxu0 %vm244_vm1, %v3814_v12  ;;  %v3816_v15 = vld [vmem:[%s3908_s29 + $0x28] ss:$8 sps:$4 sm:$0xff]   ;;  %v3818_v19 = vld [vmem:[%s3908_s29 + $0x38] ss:$8 sps:$4 sm:$0xff]   ;;  %v3288_v43 = vld [vmem:[%s3908_s29 + $0xc] sm:$0x1] }
  0x15   : > { %3597 = vmatpush3.bf16.msra.mxu0 %v1750_v7  ;;  %3512 = vmatprep.mubr.msk.bf16.mxu1 %vm244_vm1, %v3815_v14  ;;  %v3819_v22 = vld [vmem:[%s3908_s29] ss:$8 sps:$4 sm:$0xff]   ;;  %v3820_v23 = vld [vmem:[%s3908_s29 + $0x50] ss:$8 sps:$4 sm:$0xff]   ;;  %v457_v46 = vrot.slane %v455_v38, 5  ;;  %v471_v50 = vrot.slane %v469_v41, 5 }
  0x16   : > { %3592 = vmatprep.mubr.msk.bf16.mxu0 %vm244_vm1, %v3816_v15  ;;  %3788 = vmatprep.subr.msk.bf16.mxu1 %vm257_vm0, %v3135_v10  ;;  %v3821_v28 = vld [vmem:[%s3908_s29 + $0x10] ss:$8 sps:$4 sm:$0xff]   ;;  %v3822_v29 = vld [vmem:[%s3908_s29 + $0x60] ss:$8 sps:$4 sm:$0xff]   ;;  %v3290_v51 = vld [vmem:[%s3908_s29 + $0x14] sm:$0x1] }
  0x17   : > { %3796 = vmatprep.subr.msk.bf16.mxu0 %vm257_vm0, %v3303_v13  ;;  %v3823_v30 = vld [vmem:[%s3908_s29 + $0x20] ss:$8 sps:$4 sm:$0xff]   ;;  %v3824_v34 = vld [vmem:[%s3908_s29 + $0x70] ss:$8 sps:$4 sm:$0xff]   ;;  %v1851_v55 = vshll.u32 %v3288_v43, 16  ;;  %v1865_v63 = vshll.u32 %v3290_v51, 16 }
  0x18   : > { %v426_v31 = vld [vmem:[%s3908_s29] sm:$0xf]  ;;  %v428_v33 = vld [vmem:[%s3908_s29 + $0x8] sm:$0xf]  ;;  %v3289_v48 = vld [vmem:[%s3908_s29 + $0x10] sm:$0xf] }
  0x19   : > { %v446_v36 = vshrl.u32 %v426_v31, 16  ;;  %v449_v37 = vshll.u32 %v426_v31, 16  ;;  %v460_v39 = vshrl.u32 %v428_v33, 16  ;;  %v463_v40 = vshll.u32 %v428_v33, 16  ;;  %v3287_v42 = vld [vmem:[%s3908_s29 + $0x8] sm:$0xf] }
  0x1a   : > { %v1842_v52 = vshrl.u32 %v3287_v42, 16  ;;  %v1845_v53 = vshll.u32 %v3287_v42, 16  ;;  %v1856_v56 = vshrl.u32 %v3289_v48, 16  ;;  %v1859_v57 = vshll.u32 %v3289_v48, 16  ;;  %v430_v58 = vld [vmem:[%s3908_s29 + $0x10] sm:$0xf] }
  0x1b   : > { %3513 = vmatmul.mubr.msk.bf16.gmra.mrb[4].mxu1 %vm244_vm1, %v3817_v17  ;;  %v448_v44 = vrot.slane %v446_v36, 4  ;;  %v451_v45 = vrot.slane %v449_v37, 5  ;;  %v462_v47 = vrot.slane %v460_v39, 4  ;;  %v465_v49 = vrot.slane %v463_v40, 5  ;;  %v431_v0 = vld [vmem:[%s3908_s29 + $0x14] sm:$0x1] }
  0x1c   : > { %3593 = vmatmul.mubr.msk.bf16.gmra.mrb[4].mxu0 %vm244_vm1, %v3818_v19  ;;  %3518 = vmatprep.mubr.msk.bf16.mxu1 %vm244_vm1, %v3819_v22  ;;  %v1844_v61 = vrot.slane %v1842_v52, 4  ;;  %v1847_v62 = vrot.slane %v1845_v53, 5  ;;  %v1853_v2 = vrot.slane %v1851_v55, 5  ;;  %v1858_v3 = vrot.slane %v1856_v56, 4  ;;  %v432_v5 = vld [vmem:[%s3908_s29 + $0x18] sm:$0xf] }
  0x1d   : > { %3598 = vmatprep.mubr.msk.bf16.mxu0 %vm244_vm1, %v3820_v23  ;;  %v452_v54 = vor.u32 %v451_v45, %v448_v44  ;;  %v466_v60 = vor.u32 %v465_v49, %v462_v47  ;;  %v1861_v4 = vrot.slane %v1859_v57, 5  ;;  %v3825_v6 = vld [vmem:[%s3908_s29 + $0x30] ss:$8 sps:$4 sm:$0xff]   ;;  %v1867_v9 = vrot.slane %v1865_v63, 5  ;;  %v3826_v11 = vld [vmem:[%s3908_s29 + $0x80] ss:$8 sps:$4 sm:$0xff]  }
  0x1e   : > { %v1848_v8 = vor.u32 %v1847_v62, %v1844_v61  ;;  %v474_v10 = vshrl.u32 %v430_v58, 16  ;;  %v433_v14 = vld [vmem:[%s3908_s29 + $0x1c] sm:$0x1]  ;;  %v477_v15 = vshll.u32 %v430_v58, 16  ;;  %v488_v22 = vshrl.u32 %v432_v5, 16 }
  0x1f   : > { %v453_v1 = vrot.slane %v452_v54, 4  ;;  %v467_v7 = vrot.slane %v466_v60, 4  ;;  %v1862_v13 = vor.u32 %v1861_v4, %v1858_v3  ;;  %v3291_v23 = vld [vmem:[%s3908_s29 + $0x18] sm:$0xf]  ;;  %v491_v33 = vshll.u32 %v432_v5, 16 }
  0x20   : > { %v476_v19 = vrot.slane %v474_v10, 4  ;;  %v490_v32 = vrot.slane %v488_v22, 4  ;;  %v3293_v35 = vld [vmem:[%s3908_s29 + $0x20] sm:$0xf]  ;;  %v3294_v38 = vld [vmem:[%s3908_s29 + $0x24] sm:$0x1] }
  0x21   : > { %v458_v12 = vsel %vm3984_vm4, %v453_v1, %v457_v46  ;;  %v472_v17 = vsel %vm3984_vm4, %v467_v7, %v471_v50  ;;  %v1870_v39 = vshrl.u32 %v3291_v23, 16  ;;  %v1873_v40 = vshll.u32 %v3291_v23, 16  ;;  %v434_v45 = vld [vmem:[%s3908_s29 + $0x20] sm:$0xf]  ;;  %v435_v50 = vld [vmem:[%s3908_s29 + $0x24] sm:$0x1] }
  0x22   : > { %v493_v42 = vrot.slane %v491_v33, 5  ;;  %v1884_v49 = vshrl.u32 %v3293_v35, 16  ;;  %v1887_v53 = vshll.u32 %v3293_v35, 16  ;;  %v1893_v54 = vshll.u32 %v3294_v38, 16  ;;  %v436_v55 = vld [vmem:[%s3908_s29 + $0x28] sm:$0xf] }
  0x23   : > { %3519 = vmatmul.mubr.msk.bf16.vlgmr.msra.gmra.mrb[0].mxu1 %vm244_vm1, %v3821_v28  ;;  %v479_v28 = vrot.slane %v477_v15, 5  ;;  %v1872_v47 = vrot.slane %v1870_v39, 4  ;;  %v1875_v48 = vrot.slane %v1873_v40, 5  ;;  %v502_v60 = vshrl.u32 %v434_v45, 16  ;;  %v3298_v23 = vld [vmem:[%s3908_s29 + $0x34] sm:$0x1] }
  0x24   : > { %3527 = vmatpush3.bf16.msra.mxu1 %v584_v16  ;;  %3599 = vmatmul.mubr.msk.bf16.vlgmr.msra.gmra.mrb[0].mxu0 %vm244_vm1, %v3822_v29  ;;  %v483_v16 = vshll.u32 %v431_v0, 16  ;;  %v494_v51 = vor.u32 %v493_v42, %v490_v32  ;;  %v1886_v58 = vrot.slane %v1884_v49, 4  ;;  %v1889_v62 = vrot.slane %v1887_v53, 5  ;;  %v437_v0 = vld [vmem:[%s3908_s29 + $0x2c] sm:$0x1] }
  0x25   : > { %3607 = vmatpush3.bf16.msra.mxu0 %v1980_v24  ;;  %3522 = vmatprep.mubr.msk.bf16.mxu1 %vm244_vm1, %v3823_v30  ;;  %v1863_v24 = vrot.slane %v1862_v13, 4  ;;  %v3292_v30 = vld [vmem:[%s3908_s29 + $0x1c] sm:$0x1]  ;;  %v480_v37 = vor.u32 %v479_v28, %v476_v19  ;;  %v1876_v57 = vor.u32 %v1875_v48, %v1872_v47  ;;  %v1895_v63 = vrot.slane %v1893_v54, 5  ;;  %v439_v35 = vld [vmem:[%s3908_s29 + $0x34] sm:$0x1] }
  0x26   : > { %3602 = vmatprep.mubr.msk.bf16.mxu0 %vm244_vm1, %v3824_v34  ;;  %3789 = vmatprep.subr.msk.bf16.mxu1 %vm257_vm0, %v3160_v18  ;;  %v1849_v18 = vrot.slane %v1848_v8, 4  ;;  %v485_v29 = vrot.slane %v483_v16, 5  ;;  %v497_v34 = vshll.u32 %v433_v14, 16  ;;  %v1879_v44 = vshll.u32 %v3292_v30, 16  ;;  %v440_v40 = vld [vmem:[%s3908_s29 + $0x38] sm:$0xf] }
  0x27   : > { %3797 = vmatprep.subr.msk.bf16.mxu0 %vm257_vm0, %v3941_v20  ;;  %v3136_v20 = vcombine.low %v458_v12, %v472_v17  ;;  %v1868_v36 = vsel %vm3984_vm4, %v1863_v24, %v1867_v9  ;;  %v481_v46 = vrot.slane %v480_v37, 4  ;;  %v495_v61 = vrot.slane %v494_v51, 4  ;;  %v3297_v12 = vld [vmem:[%s3908_s29 + $0x30] sm:$0xf]  ;;  %v441_v47 = vld [vmem:[%s3908_s29 + $0x3c] sm:$0x1] }
  0x28   : > { %v1854_v31 = vsel %vm3984_vm4, %v1849_v18, %v1853_v2  ;;  %v499_v43 = vrot.slane %v497_v34, 5  ;;  %v1881_v52 = vrot.slane %v1879_v44, 5  ;;  %v505_v1 = vshll.u32 %v434_v45, 16  ;;  %v438_v34 = vld [vmem:[%s3908_s29 + $0x30] sm:$0xf] }
  0x29   : > { %v3304_v41 = vcombine.low %v1854_v31, %v1868_v36  ;;  %v486_v56 = vsel %vm3984_vm4, %v481_v46, %v485_v29  ;;  %v1877_v2 = vrot.slane %v1876_v57, 4  ;;  %v504_v3 = vrot.slane %v502_v60, 4  ;;  %v4041_v44 = vld [vmem:[%s4434_s1 + $0x18] sm:$0x3] }
  0x2a   : > { %v511_v4 = vshll.u32 %v435_v50, 16  ;;  %v516_v5 = vshrl.u32 %v436_v55, 16  ;;  %v500_v7 = vsel %vm3984_vm4, %v495_v61, %v499_v43  ;;  %v1890_v8 = vor.u32 %v1889_v62, %v1886_v58  ;;  %v3299_v53 = vld [vmem:[%s3908_s29 + $0x38] sm:$0xf]  ;;  %v3300_v58 = vld [vmem:[%s3908_s29 + $0x3c] sm:$0x1] }
  0x2b   : > { %3523 = vmatmul.mubr.msk.bf16.gmra.mrb[4].mxu1 %vm244_vm1, %v3825_v6  ;;  %v3295_v6 = vld [vmem:[%s3908_s29 + $0x28] sm:$0xf]  ;;  %v507_v9 = vrot.slane %v505_v1, 5  ;;  %v519_v10 = vshll.u32 %v436_v55, 16  ;;  %v3137_v13 = vcombine.low %v486_v56, %v500_v7  ;;  %v1882_v14 = vsel %vm3984_vm4, %v1877_v2, %v1881_v52 }
  0x2c   : > { %3603 = vmatmul.mubr.msk.bf16.gmra.mrb[4].mxu0 %vm244_vm1, %v3826_v11  ;;  %3528 = vmatprep.mubr.msk.bf16.mxu1 %vm244_vm1, %v3136_v20  ;;  %v3296_v11 = vld [vmem:[%s3908_s29 + $0x2c] sm:$0x1]  ;;  %v513_v15 = vrot.slane %v511_v4, 5  ;;  %v518_v16 = vrot.slane %v516_v5, 4  ;;  %v1891_v17 = vrot.slane %v1890_v8, 4  ;;  %v525_v22 = vshll.u32 %v437_v0, 16 }
  0x2d   : > { %3608 = vmatprep.mubr.msk.bf16.mxu0 %vm244_vm1, %v3304_v41  ;;  %v508_v18 = vor.u32 %v507_v9, %v504_v3  ;;  %v521_v19 = vrot.slane %v519_v10, 5  ;;  %v1898_v20 = vshrl.u32 %v3295_v6, 16  ;;  %v1901_v24 = vshll.u32 %v3295_v6, 16  ;;  %v3302_v6 = vld [vmem:[%s3908_s29 + $0x44] sm:$0x1] }
  0x2e   : > { %v1907_v28 = vshll.u32 %v3296_v11, 16  ;;  %v1912_v29 = vshrl.u32 %v3297_v12, 16  ;;  %v1896_v30 = vsel %vm3984_vm4, %v1891_v17, %v1895_v63  ;;  %v527_v33 = vrot.slane %v525_v22, 5  ;;  %v3301_v63 = vld [vmem:[%s3908_s29 + $0x40] sm:$0xf] }
  0x2f   : > { %v509_v31 = vrot.slane %v508_v18, 4  ;;  %v522_v32 = vor.u32 %v521_v19, %v518_v16  ;;  %v3305_v36 = vcombine.low %v1882_v14, %v1896_v30  ;;  %v1900_v37 = vrot.slane %v1898_v20, 4  ;;  %v3145_v18 = vld [vmem:[%s3908_s29 + $0x4c] sm:$0x1] }
  0x30   : > { %v1903_v38 = vrot.slane %v1901_v24, 5  ;;  %v1909_v39 = vrot.slane %v1907_v28, 5  ;;  %v1914_v42 = vrot.slane %v1912_v29, 4  ;;  %v1915_v43 = vshll.u32 %v3297_v12, 16  ;;  %v3146_v24 = vld [vmem:[%s3908_s29 + $0x50] sm:$0xf] }
  0x31   : > { %v523_v41 = vrot.slane %v522_v32, 4  ;;  %v1921_v46 = vshll.u32 %v3298_v23, 16  ;;  %v530_v48 = vshrl.u32 %v438_v34, 16  ;;  %v539_v51 = vshll.u32 %v439_v35, 16 }
  0x32   : > { %v1904_v45 = vor.u32 %v1903_v38, %v1900_v37  ;;  %v1917_v50 = vrot.slane %v1915_v43, 5  ;;  %v544_v52 = vshrl.u32 %v440_v40, 16  ;;  %v547_v1 = vshll.u32 %v440_v40, 16 }
  0x33   : > { %3529 = vmatmul.mubr.msk.bf16.vlgmr.msra.gmra.mrb[0].mxu1 %vm244_vm1, %v3137_v13  ;;  %v528_v49 = vsel %vm3984_vm4, %v523_v41, %v527_v33  ;;  %v1923_v56 = vrot.slane %v1921_v46, 5  ;;  %v532_v57 = vrot.slane %v530_v48, 4  ;;  %v553_v2 = vshll.u32 %v441_v47, 16  ;;  %v3144_v13 = vld [vmem:[%s3908_s29 + $0x48] sm:$0xf] }
  0x34   : > { %3537 = vmatpush3.bf16.msra.mxu1 %v3953_v25  ;;  %v514_v25 = vsel %vm3984_vm4, %v509_v31, %v513_v15  ;;  %3609 = vmatmul.mubr.msk.bf16.vlgmr.msra.gmra.mrb[0].mxu0 %vm244_vm1, %v3305_v36  ;;  %v1905_v55 = vrot.slane %v1904_v45, 4  ;;  %v1918_v60 = vor.u32 %v1917_v50, %v1914_v42  ;;  %v546_v62 = vrot.slane %v544_v52, 4  ;;  %v3314_v46 = vld [vmem:[%s3908_s29 + $0x58] sm:$0xf]  ;;  %v3313_v50 = vld [vmem:[%s3908_s29 + $0x54] sm:$0x1] }
  0x35   : > { %3790 = vmatprep.subr.msk.bf16.mxu1 %vm257_vm0, %v3946_v21  ;;  %v533_v21 = vshll.u32 %v438_v34, 16  ;;  %3617 = vmatpush3.bf16.msra.mxu0 %v3959_v26  ;;  %v3138_v54 = vcombine.low %v514_v25, %v528_v49  ;;  %v541_v26 = vrot.slane %v539_v51, 5  ;;  %v1926_v3 = vshrl.u32 %v3299_v53, 16  ;;  %v3147_v34 = vld [vmem:[%s3908_s29 + $0x54] sm:$0x1] }
  0x36   : > { %3798 = vmatprep.subr.msk.bf16.mxu0 %vm257_vm0, %v4041_v44  ;;  %v1910_v0 = vsel %vm3984_vm4, %v1905_v55, %v1909_v39  ;;  %v1919_v4 = vrot.slane %v1918_v60, 4  ;;  %v1929_v7 = vshll.u32 %v3299_v53, 16  ;;  %v1935_v8 = vshll.u32 %v3300_v58, 16  ;;  %v3312_v25 = vld [vmem:[%s3908_s29 + $0x50] sm:$0xf] }
  0x37   : > { %v535_v61 = vrot.slane %v533_v21, 5  ;;  %3532 = vmatprep.mubr.msk.bf16.mxu1 %vm244_vm1, %v3138_v54  ;;  %v549_v9 = vrot.slane %v547_v1, 5  ;;  %v555_v10 = vrot.slane %v553_v2, 5  ;;  %v1928_v11 = vrot.slane %v1926_v3, 4 }
  0x38   : > { %v1940_v12 = vshrl.u32 %v3301_v63, 16  ;;  %v1924_v14 = vsel %vm3984_vm4, %v1919_v4, %v1923_v56  ;;  %v1931_v16 = vrot.slane %v1929_v7, 5  ;;  %v1937_v17 = vrot.slane %v1935_v8, 5  ;;  %v3315_v56 = vld [vmem:[%s3908_s29 + $0x5c] sm:$0x1] }
  0x39   : > { %v536_v5 = vor.u32 %v535_v61, %v532_v57  ;;  %v3306_v19 = vcombine.low %v1910_v0, %v1924_v14  ;;  %v550_v22 = vor.u32 %v549_v9, %v546_v62  ;;  %v1943_v20 = vshll.u32 %v3301_v63, 16  ;;  %v3148_v0 = vld [vmem:[%s3908_s29 + $0x58] sm:$0xf] }
  0x3a   : > { %v1942_v23 = vrot.slane %v1940_v12, 4  ;;  %v1932_v29 = vor.u32 %v1931_v16, %v1928_v11  ;;  %v1949_v30 = vshll.u32 %v3302_v6, 16  ;;  %v676_v31 = vshrl.u32 %v3144_v13, 16  ;;  %v3150_v6 = vld [vmem:[%s3908_s29 + $0x60] sm:$0xf] }
  0x3b   : > { %v537_v15 = vrot.slane %v536_v5, 4  ;;  %3612 = vmatprep.mubr.msk.bf16.mxu0 %vm244_vm1, %v3306_v19  ;;  %v551_v32 = vrot.slane %v550_v22, 4  ;;  %v1945_v33 = vrot.slane %v1943_v20, 5  ;;  %v679_v35 = vshll.u32 %v3144_v13, 16  ;;  %v3149_v5 = vld [vmem:[%s3908_s29 + $0x5c] sm:$0x1] }
  0x3c   : > { %v685_v36 = vshll.u32 %v3145_v18, 16  ;;  %v1933_v37 = vrot.slane %v1932_v29, 4  ;;  %v1951_v38 = vrot.slane %v1949_v30, 5  ;;  %v678_v39 = vrot.slane %v676_v31, 4  ;;  %v3151_v12 = vld [vmem:[%s3908_s29 + $0x64] sm:$0x1] }
  0x3d   : > { %v542_v28 = vsel %vm3984_vm4, %v537_v15, %v541_v26  ;;  %v690_v40 = vshrl.u32 %v3146_v24, 16  ;;  %v556_v41 = vsel %vm3984_vm4, %v551_v32, %v555_v10  ;;  %v1946_v42 = vor.u32 %v1945_v33, %v1942_v23  ;;  %v3316_v19 = vld [vmem:[%s3908_s29 + $0x60] sm:$0xf]  ;;  %v3318_v33 = vld [vmem:[%s3908_s29 + $0x68] sm:$0xf] }
  0x3e   : > { %v681_v43 = vrot.slane %v679_v35, 5  ;;  %v687_v45 = vrot.slane %v685_v36, 5  ;;  %v3139_v47 = vcombine.low %v542_v28, %v556_v41  ;;  %v1938_v48 = vsel %vm3984_vm4, %v1933_v37, %v1937_v17  ;;  %v3317_v28 = vld [vmem:[%s3908_s29 + $0x64] sm:$0x1] }
  0x3f   : > { %v692_v21 = vrot.slane %v690_v40, 4  ;;  %v693_v49 = vshll.u32 %v3146_v24, 16  ;;  %v1947_v51 = vrot.slane %v1946_v42, 4  ;;  %v699_v53 = vshll.u32 %v3147_v34, 16 }
  0x40   : > { %v682_v52 = vor.u32 %v681_v43, %v678_v39  ;;  %v2072_v54 = vshrl.u32 %v3312_v25, 16  ;;  %3533 = vmatmul.mubr.msk.bf16.gmra.mrb[4].mxu1 %vm244_vm1, %v3139_v47  ;;  %v2075_v57 = vshll.u32 %v3312_v25, 16  ;;  %v2086_v58 = vshrl.u32 %v3314_v46, 16  ;;  %v3152_v39 = vld [vmem:[%s3908_s29 + $0x68] sm:$0xf] }
  0x41   : > { %v695_v55 = vrot.slane %v693_v49, 5  ;;  %v4077_v60 = vsel %vm257_vm0, %v4041_v44, 0  ;;  %v1952_v61 = vsel %vm3984_vm4, %v1947_v51, %v1951_v38  ;;  %v2081_v63 = vshll.u32 %v3313_v50, 16  ;;  %v3319_v38 = vld [vmem:[%s3908_s29 + $0x6c] sm:$0x1] }
  0x42   : > { %v683_v26 = vrot.slane %v682_v52, 4  ;;  %v2074_v62 = vrot.slane %v2072_v54, 4  ;;  %v3307_v1 = vcombine.low %v1938_v48, %v1952_v61  ;;  %v701_v3 = vrot.slane %v699_v53, 5  ;;  %v3153_v43 = vld [vmem:[%s3908_s29 + $0x6c] sm:$0x1] }
  0x43   : > { %v696_v2 = vor.u32 %v695_v55, %v692_v21  ;;  %v2077_v4 = vrot.slane %v2075_v57, 5  ;;  %v2088_v44 = vrot.slane %v2086_v58, 4  ;;  %v2089_v8 = vshll.u32 %v3314_v46, 16  ;;  %v3154_v52 = vld [vmem:[%s3908_s29 + $0x70] sm:$0xf] }
  0x44   : > { %v688_v7 = vsel %vm3984_vm4, %v683_v26, %v687_v45  ;;  %v2095_v9 = vshll.u32 %v3315_v56, 16  ;;  %3613 = vmatmul.mubr.msk.bf16.gmra.mrb[4].mxu0 %vm244_vm1, %v3307_v1  ;;  %v704_v13 = vshrl.u32 %v3148_v0, 16  ;;  %v707_v14 = vshll.u32 %v3148_v0, 16  ;;  %v3155_v26 = vld [vmem:[%s3908_s29 + $0x74] sm:$0x1] }
  0x45   : > { %v697_v10 = vrot.slane %v696_v2, 4  ;;  %v2078_v11 = vor.u32 %v2077_v4, %v2074_v62  ;;  %v2083_v15 = vrot.slane %v2081_v63, 5  ;;  %v2091_v16 = vrot.slane %v2089_v8, 5  ;;  %v3320_v63 = vld [vmem:[%s3908_s29 + $0x70] sm:$0xf] }
  0x46   : > { %v713_v17 = vshll.u32 %v3149_v5, 16  ;;  %v718_v18 = vshrl.u32 %v3150_v6, 16  ;;  %v706_v20 = vrot.slane %v704_v13, 4  ;;  %v709_v24 = vrot.slane %v707_v14, 5  ;;  %v4114_v13 = vld [vmem:[%s4434_s1 + $0xa] sm:$0x3] }
  0x47   : > { %v702_v22 = vsel %vm3984_vm4, %v697_v10, %v701_v3  ;;  %v2079_v23 = vrot.slane %v2078_v11, 4  ;;  %v2092_v30 = vor.u32 %v2091_v16, %v2088_v44  ;;  %v2097_v31 = vrot.slane %v2095_v9, 5  ;;  %v3321_v44 = vld [vmem:[%s3908_s29 + $0x74] sm:$0x1] }
  0x48   : > { %v3161_v29 = vcombine.low %v688_v7, %v702_v22  ;;  %v715_v32 = vrot.slane %v713_v17, 5  ;;  %v710_v34 = vor.u32 %v709_v24, %v706_v20  ;;  %v720_v35 = vrot.slane %v718_v18, 4  ;;  %v3323_v22 = vld [vmem:[%s3908_s29 + $0x7c] sm:$0x1]  ;;  %v3156_v24 = vld [vmem:[%s3908_s29 + $0x78] sm:$0xf] }
  0x49   : > { %v721_v36 = vshll.u32 %v3150_v6, 16  ;;  %v727_v37 = vshll.u32 %v3151_v12, 16  ;;  %v2084_v40 = vsel %vm3984_vm4, %v2079_v23, %v2083_v15  ;;  %v2093_v25 = vrot.slane %v2092_v30, 4  ;;  %v3322_v12 = vld [vmem:[%s3908_s29 + $0x78] sm:$0xf] }
  0x4a   : > { %3538 = vmatprep.mubr.msk.bf16.mxu1 %vm244_vm1, %v3161_v29  ;;  %v2100_v41 = vshrl.u32 %v3316_v19, 16  ;;  %v2103_v42 = vshll.u32 %v3316_v19, 16  ;;  %v711_v45 = vrot.slane %v710_v34, 4  ;;  %v2109_v47 = vshll.u32 %v3317_v28, 16 }
  0x4b   : > { %v723_v46 = vrot.slane %v721_v36, 5  ;;  %v2114_v48 = vshrl.u32 %v3318_v33, 16  ;;  %v2098_v21 = vsel %vm3984_vm4, %v2093_v25, %v2097_v31  ;;  %v729_v49 = vrot.slane %v727_v37, 5  ;;  %v3157_v36 = vld [vmem:[%s3908_s29 + $0x7c] sm:$0x1] }
  0x4c   : > { %v2102_v50 = vrot.slane %v2100_v41, 4  ;;  %v2105_v51 = vrot.slane %v2103_v42, 5  ;;  %v3329_v53 = vcombine.low %v2084_v40, %v2098_v21  ;;  %v716_v54 = vsel %vm3984_vm4, %v711_v45, %v715_v32  ;;  %v3158_v25 = vld [vmem:[%s3908_s29 + $0x80] sm:$0xf] }
  0x4d   : > { %v724_v55 = vor.u32 %v723_v46, %v720_v35  ;;  %v2116_v56 = vrot.slane %v2114_v48, 4  ;;  %v2117_v58 = vshll.u32 %v3318_v33, 16  ;;  %v2123_v61 = vshll.u32 %v3319_v38, 16  ;;  %v3159_v46 = vld [vmem:[%s3908_s29 + $0x84] sm:$0x1] }
  0x4e   : > { %v2106_v57 = vor.u32 %v2105_v51, %v2102_v50  ;;  %v732_v62 = vshrl.u32 %v3152_v39, 16  ;;  %3618 = vmatprep.mubr.msk.bf16.mxu0 %vm244_vm1, %v3329_v53  ;;  %v735_v1 = vshll.u32 %v3152_v39, 16  ;;  %v741_v2 = vshll.u32 %v3153_v43, 16  ;;  %v3324_v50 = vld [vmem:[%s3908_s29 + $0x80] sm:$0xf] }
  0x4f   : > { %v725_v0 = vrot.slane %v724_v55, 4  ;;  %v746_v3 = vshrl.u32 %v3154_v52, 16  ;;  %v2111_v5 = vrot.slane %v2109_v47, 5  ;;  %v2119_v6 = vrot.slane %v2117_v58, 5 }
  0x50   : > { %v2107_v4 = vrot.slane %v2106_v57, 4  ;;  %v734_v7 = vrot.slane %v732_v62, 4  ;;  %v2125_v9 = vrot.slane %v2123_v61, 5  ;;  %v737_v10 = vrot.slane %v735_v1, 5  ;;  %v3326_v61 = vld [vmem:[%s3908_s29 + $0x88] sm:$0xf] }
  0x51   : > { %v730_v8 = vsel %vm3984_vm4, %v725_v0, %v729_v49  ;;  %v743_v11 = vrot.slane %v741_v2, 5  ;;  %v2120_v15 = vor.u32 %v2119_v6, %v2116_v56  ;;  %v748_v16 = vrot.slane %v746_v3, 4  ;;  %v3327_v6 = vld [vmem:[%s3908_s29 + $0x8c] sm:$0x1] }
  0x52   : > { %v3162_v14 = vcombine.low %v716_v54, %v730_v8  ;;  %v749_v17 = vshll.u32 %v3154_v52, 16  ;;  %v738_v18 = vor.u32 %v737_v10, %v734_v7  ;;  %v755_v19 = vshll.u32 %v3155_v26, 16 }
  0x53   : > { %v2128_v23 = vshrl.u32 %v3320_v63, 16  ;;  %v2131_v20 = vshll.u32 %v3320_v63, 16  ;;  %v2112_v28 = vsel %vm3984_vm4, %v2107_v4, %v2111_v5  ;;  %v2121_v29 = vrot.slane %v2120_v15, 4  ;;  %v3325_v4 = vld [vmem:[%s3908_s29 + $0x84] sm:$0x1] }
  0x54   : > { %3539 = vmatmul.mubr.msk.bf16.vlgmr.msra.gmra.mrb[0].mxu1 %vm244_vm1, %v3162_v14  ;;  %v751_v30 = vrot.slane %v749_v17, 5  ;;  %v2142_v31 = vshrl.u32 %v3322_v12, 16  ;;  %v739_v32 = vrot.slane %v738_v18, 4  ;;  %v2137_v35 = vshll.u32 %v3321_v44, 16 }
  0x55   : > { %3547 = vmatpush3.bf16.msra.mxu1 %v3963_v27  ;;  %v2130_v33 = vrot.slane %v2128_v23, 4  ;;  %v2133_v34 = vrot.slane %v2131_v20, 5  ;;  %v2126_v37 = vsel %vm3984_vm4, %v2121_v29, %v2125_v9  ;;  %v757_v39 = vrot.slane %v755_v19, 5  ;;  %v4131_v27 = vld [vmem:[%s4434_s1 + $0x1a] sm:$0x3] }
  0x56   : > { %v752_v38 = vor.u32 %v751_v30, %v748_v16  ;;  %v2144_v40 = vrot.slane %v2142_v31, 4  ;;  %3791 = vmatprep.subr.msk.bf16.mxu1 %vm257_vm0, %v4114_v13  ;;  %v3330_v41 = vcombine.low %v2112_v28, %v2126_v37  ;;  %v744_v42 = vsel %vm3984_vm4, %v739_v32, %v743_v11 }
  0x57   : > { %v2134_v43 = vor.u32 %v2133_v34, %v2130_v33  ;;  %v2145_v45 = vshll.u32 %v3322_v12, 16  ;;  %v2151_v48 = vshll.u32 %v3323_v22, 16  ;;  %v760_v21 = vshrl.u32 %v3156_v24, 16  ;;  %v3827_v34 = vld [vmem:[%s3908_s29 + $0x90] ss:$8 sps:$4 sm:$0xff]  }
  0x58   : > { %v753_v47 = vrot.slane %v752_v38, 4  ;;  %v763_v49 = vshll.u32 %v3156_v24, 16  ;;  %3619 = vmatmul.mubr.msk.bf16.vlgmr.msra.gmra.mrb[0].mxu0 %vm244_vm1, %v3330_v41  ;;  %v2139_v52 = vrot.slane %v2137_v35, 5  ;;  %v774_v54 = vshrl.u32 %v3158_v25, 16  ;;  %v3219_v35 = vld [vmem:[%s4434_s1 + $0xc] sm:$0x3] }
  0x59   : > { %v2135_v51 = vrot.slane %v2134_v43, 4  ;;  %v2147_v53 = vrot.slane %v2145_v45, 5  ;;  %3627 = vmatpush3.bf16.msra.mxu0 %v4077_v60  ;;  %v762_v56 = vrot.slane %v760_v21, 4  ;;  %v769_v58 = vshll.u32 %v3157_v36, 16  ;;  %v3828_v41 = vld [vmem:[%s3908_s29 + $0x98] ss:$8 sps:$4 sm:$0xff]  }
  0x5a   : > { %v758_v55 = vsel %vm3984_vm4, %v753_v47, %v757_v39  ;;  %v765_v57 = vrot.slane %v763_v49, 5  ;;  %v2153_v63 = vrot.slane %v2151_v48, 5  ;;  %3799 = vmatprep.subr.msk.bf16.mxu0 %vm257_vm0, %v4131_v27  ;;  %v776_v1 = vrot.slane %v774_v54, 4  ;;  %v4163_v39 = vld [vmem:[%s4434_s1 + $0x1c] sm:$0x3] }
  0x5b   : > { %v3163_v26 = vcombine.low %v744_v42, %v758_v55  ;;  %v2148_v62 = vor.u32 %v2147_v53, %v2144_v40  ;;  %v777_v2 = vshll.u32 %v3158_v25, 16  ;;  %v783_v3 = vshll.u32 %v3159_v46, 16  ;;  %v3829_v46 = vld [vmem:[%s3908_s29 + $0xa0] ss:$8 sps:$4 sm:$0xff]   ;;  %v3203_v21 = vld [vmem:[%s3908_s29 + $0x90] sm:$0xf] }
  0x5c   : > { %v766_v0 = vor.u32 %v765_v57, %v762_v56  ;;  %v2140_v60 = vsel %vm3984_vm4, %v2135_v51, %v2139_v52  ;;  %v2156_v7 = vshrl.u32 %v3324_v50, 16  ;;  %v2159_v44 = vshll.u32 %v3324_v50, 16  ;;  %v3204_v49 = vld [vmem:[%s3908_s29 + $0x94] sm:$0x1]  ;;  %v3205_v50 = vld [vmem:[%s3908_s29 + $0x98] sm:$0xf] }
  0x5d   : > { %3542 = vmatprep.mubr.msk.bf16.mxu1 %vm244_vm1, %v3163_v26  ;;  %v2149_v5 = vrot.slane %v2148_v62, 4  ;;  %v771_v9 = vrot.slane %v769_v58, 5  ;;  %v779_v10 = vrot.slane %v777_v2, 5  ;;  %v2170_v11 = vshrl.u32 %v3326_v61, 16  ;;  %v3206_v51 = vld [vmem:[%s3908_s29 + $0x9c] sm:$0x1] }
  0x5e   : > { %v767_v8 = vrot.slane %v766_v0, 4  ;;  %v2158_v14 = vrot.slane %v2156_v7, 4  ;;  %v2161_v15 = vrot.slane %v2159_v44, 5  ;;  %v2165_v16 = vshll.u32 %v3325_v4, 16  ;;  %v3831_v53 = vld [vmem:[%s3908_s29 + $0xb0] ss:$8 sps:$4 sm:$0xff]  }
  0x5f   : > { %v2154_v12 = vsel %vm3984_vm4, %v2149_v5, %v2153_v63  ;;  %v780_v18 = vor.u32 %v779_v10, %v776_v1  ;;  %v785_v19 = vrot.slane %v783_v3, 5  ;;  %v2172_v23 = vrot.slane %v2170_v11, 4  ;;  %v3371_v26 = vld [vmem:[%s3908_s29 + $0x98] sm:$0xf]  ;;  %v3372_v62 = vld [vmem:[%s3908_s29 + $0x9c] sm:$0x1] }
  0x60   : > { %v3331_v17 = vcombine.low %v2140_v60, %v2154_v12  ;;  %v2162_v22 = vor.u32 %v2161_v15, %v2158_v14  ;;  %v2173_v20 = vshll.u32 %v3326_v61, 16  ;;  %v2179_v24 = vshll.u32 %v3327_v6, 16  ;;  %v3373_v3 = vld [vmem:[%s3908_s29 + $0xa0] sm:$0xf]  ;;  %v3830_v4 = vld [vmem:[%s3908_s29 + $0xa8] ss:$8 sps:$4 sm:$0xff]  }
  0x61   : > { %v772_v28 = vsel %vm3984_vm4, %v767_v8, %v771_v9  ;;  %v781_v29 = vrot.slane %v780_v18, 4  ;;  %v2167_v31 = vrot.slane %v2165_v16, 5  ;;  %v1052_v42 = vsel %vm257_vm0, %v4114_v13, 0  ;;  %v3374_v5 = vld [vmem:[%s3908_s29 + $0xa4] sm:$0x1] }
  0x62   : > { %3622 = vmatprep.mubr.msk.bf16.mxu0 %vm244_vm1, %v3331_v17  ;;  %v2163_v30 = vrot.slane %v2162_v22, 4  ;;  %v2175_v32 = vrot.slane %v2173_v20, 5  ;;  %v2181_v38 = vrot.slane %v2179_v24, 5  ;;  %v4174_v43 = vsel %vm257_vm0, %v4131_v27, 0  ;;  %v3832_v8 = vld [vmem:[%s3908_s29 + $0xb8] ss:$8 sps:$4 sm:$0xff]  }
  0x63   : > { %v786_v33 = vsel %vm3984_vm4, %v781_v29, %v785_v19  ;;  %v4180_v47 = vsel %vm257_vm0, %v3219_v35, 0  ;;  %v4184_v48 = vsel %vm257_vm0, %v4163_v39, 0  ;;  %v1144_v27 = vshrl.u32 %v3203_v21, 16  ;;  %v3207_v18 = vld [vmem:[%s3908_s29 + $0xa0] sm:$0xf] }
  0x64   : > { %v3164_v36 = vcombine.low %v772_v28, %v786_v33  ;;  %v2176_v37 = vor.u32 %v2175_v32, %v2172_v23  ;;  %v2168_v40 = vsel %vm3984_vm4, %v2163_v30, %v2167_v31  ;;  %v1147_v52 = vshll.u32 %v3203_v21, 16  ;;  %v3833_v19 = vld [vmem:[%s3908_s29 + $0xc0] ss:$8 sps:$4 sm:$0xff]   ;;  %v3208_v28 = vld [vmem:[%s3908_s29 + $0xa4] sm:$0x1] }
  0x65   : > { %v1153_v54 = vshll.u32 %v3204_v49, 16  ;;  %v1158_v55 = vshrl.u32 %v3205_v50, 16  ;;  %v1161_v56 = vshll.u32 %v3205_v50, 16  ;;  %v1167_v57 = vshll.u32 %v3206_v51, 16  ;;  %v3835_v29 = vld [vmem:[%s3908_s29 + $0xd8] ss:$8 sps:$4 sm:$0xff]  }
  0x66   : > { %3543 = vmatmul.mubr.msk.bf16.gmra.mrb[4].mxu1 %vm244_vm1, %v3164_v36  ;;  %v2177_v25 = vrot.slane %v2176_v37, 4  ;;  %v1146_v58 = vrot.slane %v1144_v27, 4  ;;  %v1149_v61 = vrot.slane %v1147_v52, 5  ;;  %v2540_v6 = vshrl.u32 %v3371_v26, 16  ;;  %v3209_v32 = vld [vmem:[%s3908_s29 + $0xa8] sm:$0xf] }
  0x67   : > { %3548 = vmatprep.mubr.msk.bf16.mxu1 %vm244_vm1, %v3827_v34  ;;  %v1155_v63 = vrot.slane %v1153_v54, 5  ;;  %v1160_v0 = vrot.slane %v1158_v55, 4  ;;  %v1163_v1 = vrot.slane %v1161_v56, 5  ;;  %v1169_v2 = vrot.slane %v1167_v57, 5  ;;  %v3375_v21 = vld [vmem:[%s3908_s29 + $0xa8] sm:$0xf] }
  0x68   : > { %v2182_v45 = vsel %vm3984_vm4, %v2177_v25, %v2181_v38  ;;  %v1150_v60 = vor.u32 %v1149_v61, %v1146_v58  ;;  %v2543_v7 = vshll.u32 %v3371_v26, 16  ;;  %v2549_v44 = vshll.u32 %v3372_v62, 16  ;;  %v3210_v38 = vld [vmem:[%s3908_s29 + $0xac] sm:$0x1]  ;;  %v3834_v52 = vld [vmem:[%s3908_s29 + $0xc8] ss:$8 sps:$4 sm:$0xff]  }
  0x69   : > { %v3332_v13 = vcombine.low %v2168_v40, %v2182_v45  ;;  %v1164_v9 = vor.u32 %v1163_v1, %v1160_v0  ;;  %v2554_v10 = vshrl.u32 %v3373_v3, 16  ;;  %v2557_v11 = vshll.u32 %v3373_v3, 16  ;;  %v3376_v27 = vld [vmem:[%s3908_s29 + $0xac] sm:$0x1]  ;;  %v3377_v57 = vld [vmem:[%s3908_s29 + $0xb0] sm:$0xf] }
  0x6a   : > { %v2563_v12 = vshll.u32 %v3374_v5, 16  ;;  %v1151_v14 = vrot.slane %v1150_v60, 4  ;;  %v2542_v15 = vrot.slane %v2540_v6, 4  ;;  %v2545_v16 = vrot.slane %v2543_v7, 5  ;;  %v3378_v26 = vld [vmem:[%s3908_s29 + $0xb4] sm:$0x1] }
  0x6b   : > { %3623 = vmatmul.mubr.msk.bf16.gmra.mrb[4].mxu0 %vm244_vm1, %v3332_v13  ;;  %v2551_v17 = vrot.slane %v2549_v44, 5  ;;  %v1165_v22 = vrot.slane %v1164_v9, 4  ;;  %v2556_v23 = vrot.slane %v2554_v10, 4  ;;  %v2559_v20 = vrot.slane %v2557_v11, 5  ;;  %v3837_v60 = vld [vmem:[%s3908_s29 + $0xe8] ss:$8 sps:$4 sm:$0xff]  }
  0x6c   : > { %3628 = vmatprep.mubr.msk.bf16.mxu0 %vm244_vm1, %v3828_v41  ;;  %v2565_v24 = vrot.slane %v2563_v12, 5  ;;  %v1156_v30 = vsel %vm3984_vm4, %v1151_v14, %v1155_v63  ;;  %v2546_v31 = vor.u32 %v2545_v16, %v2542_v15  ;;  %v1172_v33 = vshrl.u32 %v3207_v18, 16  ;;  %v3213_v14 = vld [vmem:[%s3908_s29 + $0xb8] sm:$0xf] }
  0x6d   : > { %v1175_v34 = vshll.u32 %v3207_v18, 16  ;;  %v1170_v36 = vsel %vm3984_vm4, %v1165_v22, %v1169_v2  ;;  %v2560_v37 = vor.u32 %v2559_v20, %v2556_v23  ;;  %v1181_v40 = vshll.u32 %v3208_v28, 16  ;;  %v3839_v15 = vld [vmem:[%s3908_s29 + $0xf8] ss:$8 sps:$4 sm:$0xff]   ;;  %v3214_v20 = vld [vmem:[%s3908_s29 + $0xbc] sm:$0x1] }
  0x6e   : > { %3549 = vmatmul.mubr.msk.bf16.vlgmr.msra.gmra.mrb[0].mxu1 %vm244_vm1, %v3829_v46  ;;  %v1186_v25 = vshrl.u32 %v3209_v32, 16  ;;  %v4218_v41 = vcombine.low %v1156_v30, %v1170_v36  ;;  %v1174_v45 = vrot.slane %v1172_v33, 4  ;;  %v1189_v51 = vshll.u32 %v3209_v32, 16  ;;  %v3379_v33 = vld [vmem:[%s3908_s29 + $0xb8] sm:$0xf] }
  0x6f   : > { %3557 = vmatpush3.bf16.msra.mxu1 %v1052_v42  ;;  %3552 = vmatprep.mubr.msk.bf16.mxu1 %vm244_vm1, %v3831_v53  ;;  %v2547_v42 = vrot.slane %v2546_v31, 4  ;;  %v1177_v46 = vrot.slane %v1175_v34, 5  ;;  %v2561_v49 = vrot.slane %v2560_v37, 4  ;;  %v1183_v13 = vrot.slane %v1181_v40, 5  ;;  %v3380_v40 = vld [vmem:[%s3908_s29 + $0xbc] sm:$0x1] }
  0x70   : > { %3792 = vmatprep.subr.msk.bf16.mxu1 %vm257_vm0, %v3219_v35  ;;  %v4214_v35 = vld [vmem:[%s4434_s1 + $0xe] sm:$0x3]  ;;  %v1188_v50 = vrot.slane %v1186_v25, 4  ;;  %v1195_v55 = vshll.u32 %v3210_v38, 16  ;;  %v1191_v61 = vrot.slane %v1189_v51, 5  ;;  %v2568_v62 = vshrl.u32 %v3375_v21, 16 }
  0x71   : > { %v2552_v53 = vsel %vm3984_vm4, %v2547_v42, %v2551_v17  ;;  %v1178_v54 = vor.u32 %v1177_v46, %v1174_v45  ;;  %v4236_v56 = vsel %vm257_vm0, %v4214_v35, 0  ;;  %v2566_v58 = vsel %vm3984_vm4, %v2561_v49, %v2565_v24  ;;  %v3381_v25 = vld [vmem:[%s3908_s29 + $0xc0] sm:$0xf]  ;;  %v3838_v42 = vld [vmem:[%s3908_s29 + $0xf0] ss:$8 sps:$4 sm:$0xff]  }
  0x72   : > { %v2571_v63 = vshll.u32 %v3375_v21, 16  ;;  %v4245_v0 = vcombine.low %v2552_v53, %v2566_v58  ;;  %v1197_v2 = vrot.slane %v1195_v55, 5  ;;  %v2577_v3 = vshll.u32 %v3376_v27, 16  ;;  %v3841_v53 = vld [vmem:[%s3908_s29 + $0x108] ss:$8 sps:$4 sm:$0xff]  }
  0x73   : > { %3629 = vmatmul.mubr.msk.bf16.vlgmr.msra.gmra.mrb[0].mxu0 %vm244_vm1, %v3830_v4  ;;  %v1179_v1 = vrot.slane %v1178_v54, 4  ;;  %v3211_v4 = vld [vmem:[%s3908_s29 + $0xb0] sm:$0xf]  ;;  %v1192_v5 = vor.u32 %v1191_v61, %v1188_v50  ;;  %v2570_v6 = vrot.slane %v2568_v62, 4  ;;  %v2582_v44 = vshrl.u32 %v3377_v57, 16 }
  0x74   : > { %3637 = vmatpush3.bf16.msra.mxu0 %v4174_v43  ;;  %3632 = vmatprep.mubr.msk.bf16.mxu0 %vm244_vm1, %v3832_v8  ;;  %v4232_v43 = vld [vmem:[%s4434_s1 + $0x1e] sm:$0x3]  ;;  %v2573_v7 = vrot.slane %v2571_v63, 5  ;;  %v3212_v8 = vld [vmem:[%s3908_s29 + $0xb4] sm:$0x1]  ;;  %v2579_v10 = vrot.slane %v2577_v3, 5 }
  0x75   : > { %3800 = vmatprep.subr.msk.bf16.mxu0 %vm257_vm0, %v4163_v39  ;;  %v3836_v39 = vld [vmem:[%s3908_s29 + $0xe0] ss:$8 sps:$4 sm:$0xff]   ;;  %v1184_v9 = vsel %vm3984_vm4, %v1179_v1, %v1183_v13  ;;  %v2585_v11 = vshll.u32 %v3377_v57, 16  ;;  %v2591_v12 = vshll.u32 %v3378_v26, 16  ;;  %v1193_v16 = vrot.slane %v1192_v5, 4 }
  0x76   : > { %3553 = vmatmul.mubr.msk.bf16.gmra.mrb[4].mxu1 %vm244_vm1, %v3833_v19  ;;  %v2574_v17 = vor.u32 %v2573_v7, %v2570_v6  ;;  %v2584_v18 = vrot.slane %v2582_v44, 4  ;;  %v4256_v19 = vsel %vm257_vm0, %v4232_v43, 0  ;;  %v1200_v24 = vshrl.u32 %v3211_v4, 16  ;;  %v3840_v13 = vld [vmem:[%s3908_s29 + $0x100] ss:$8 sps:$4 sm:$0xff]  }
  0x77   : > { %3558 = vmatprep.mubr.msk.bf16.mxu1 %vm244_vm1, %v3835_v29  ;;  %v2587_v22 = vrot.slane %v2585_v11, 5  ;;  %v2593_v23 = vrot.slane %v2591_v12, 5  ;;  %v1203_v28 = vshll.u32 %v3211_v4, 16  ;;  %v1198_v29 = vsel %vm3984_vm4, %v1193_v16, %v1197_v2  ;;  %v3382_v55 = vld [vmem:[%s3908_s29 + $0xc4] sm:$0x1] }
  0x78   : > { %v2575_v30 = vrot.slane %v2574_v17, 4  ;;  %v1209_v31 = vshll.u32 %v3212_v8, 16  ;;  %v1214_v32 = vshrl.u32 %v3213_v14, 16  ;;  %v4264_v34 = vcombine.low %v1184_v9, %v1198_v29  ;;  %v3215_v63 = vld [vmem:[%s3908_s29 + $0xc0] sm:$0xf] }
  0x79   : > { %v2588_v36 = vor.u32 %v2587_v22, %v2584_v18  ;;  %v1202_v37 = vrot.slane %v1200_v24, 4  ;;  %v1205_v38 = vrot.slane %v1203_v28, 5  ;;  %v1217_v49 = vshll.u32 %v3213_v14, 16  ;;  %v3383_v18 = vld [vmem:[%s3908_s29 + $0xc8] sm:$0xf] }
  0x7a   : > { %v2580_v45 = vsel %vm3984_vm4, %v2575_v30, %v2579_v10  ;;  %v1211_v46 = vrot.slane %v1209_v31, 5  ;;  %v1216_v21 = vrot.slane %v1214_v32, 4  ;;  %v1223_v27 = vshll.u32 %v3214_v20, 16  ;;  %v3218_v10 = vld [vmem:[%s3908_s29 + $0xcc] sm:$0x1] }
  0x7b   : > { %3633 = vmatmul.mubr.msk.bf16.gmra.mrb[4].mxu0 %vm244_vm1, %v3834_v52  ;;  %v2589_v50 = vrot.slane %v2588_v36, 4  ;;  %v1206_v51 = vor.u32 %v1205_v38, %v1202_v37  ;;  %v2596_v52 = vshrl.u32 %v3379_v33, 16  ;;  %v1219_v54 = vrot.slane %v1217_v49, 5  ;;  %v3384_v24 = vld [vmem:[%s3908_s29 + $0xcc] sm:$0x1] }
  0x7c   : > { %3638 = vmatprep.mubr.msk.bf16.mxu0 %vm244_vm1, %v3836_v39  ;;  %v2599_v57 = vshll.u32 %v3379_v33, 16  ;;  %v2605_v39 = vshll.u32 %v3380_v40, 16  ;;  %v2610_v58 = vshrl.u32 %v3381_v25, 16  ;;  %v1225_v26 = vrot.slane %v1223_v27, 5  ;;  %v3842_v28 = vld [vmem:[%s3908_s29 + $0x110] ss:$8 sps:$4 sm:$0xff]  }
  0x7d   : > { %v1207_v61 = vrot.slane %v1206_v51, 4  ;;  %v2598_v62 = vrot.slane %v2596_v52, 4  ;;  %v1220_v2 = vor.u32 %v1219_v54, %v1216_v21  ;;  %v2613_v7 = vshll.u32 %v3381_v25, 16  ;;  %v3385_v32 = vld [vmem:[%s3908_s29 + $0xd0] sm:$0xf] }
  0x7e   : > { %3559 = vmatmul.mubr.msk.bf16.vlgmr.msra.gmra.mrb[0].mxu1 %vm244_vm1, %v3837_v60  ;;  %v2601_v3 = vrot.slane %v2599_v57, 5  ;;  %v2607_v4 = vrot.slane %v2605_v39, 5  ;;  %v3217_v60 = vld [vmem:[%s3908_s29 + $0xc8] sm:$0xf]  ;;  %v2612_v6 = vrot.slane %v2610_v58, 4  ;;  %v2619_v44 = vshll.u32 %v3382_v55, 16 }
  0x7f   : > { %3567 = vmatpush3.bf16.msra.mxu1 %v4180_v47  ;;  %3562 = vmatprep.mubr.msk.bf16.mxu1 %vm244_vm1, %v3839_v15  ;;  %v2594_v47 = vsel %vm3984_vm4, %v2589_v50, %v2593_v23  ;;  %v1212_v5 = vsel %vm3984_vm4, %v1207_v61, %v1211_v46  ;;  %v1221_v8 = vrot.slane %v1220_v2, 4  ;;  %v1228_v11 = vshrl.u32 %v3215_v63, 16  ;;  %v3386_v40 = vld [vmem:[%s3908_s29 + $0xd4] sm:$0x1]  ;;  %v3228_v21 = vld [vmem:[%s3908_s29 + $0xd8] sm:$0xf] }
  0x80   : > { %3793 = vmatprep.subr.msk.bf16.mxu1 %vm257_vm0, %v4214_v35  ;;  %v4282_v1 = vcombine.low %v2580_v45, %v2594_v47  ;;  %v3216_v35 = vld [vmem:[%s3908_s29 + $0xc4] sm:$0x1]  ;;  %v2602_v9 = vor.u32 %v2601_v3, %v2598_v62  ;;  %v1231_v12 = vshll.u32 %v3215_v63, 16  ;;  %v2615_v14 = vrot.slane %v2613_v7, 5  ;;  %v3229_v51 = vld [vmem:[%s3908_s29 + $0xdc] sm:$0x1] }
  0x81   : > { %v2621_v15 = vrot.slane %v2619_v44, 5  ;;  %v1237_v16 = vshll.u32 %v3216_v35, 16  ;;  %v1242_v17 = vshrl.u32 %v3217_v60, 16  ;;  %v1230_v23 = vrot.slane %v1228_v11, 4  ;;  %v3230_v55 = vld [vmem:[%s3908_s29 + $0xe0] sm:$0xf] }
  0x82   : > { %v2603_v22 = vrot.slane %v2602_v9, 4  ;;  %v1233_v20 = vrot.slane %v1231_v12, 5  ;;  %v2616_v29 = vor.u32 %v2615_v14, %v2612_v6  ;;  %v1245_v37 = vshll.u32 %v3217_v60, 16  ;;  %v3231_v63 = vld [vmem:[%s3908_s29 + $0xe4] sm:$0x1] }
  0x83   : > { %3639 = vmatmul.mubr.msk.bf16.vlgmr.msra.gmra.mrb[0].mxu0 %vm244_vm1, %v3838_v42  ;;  %v1239_v30 = vrot.slane %v1237_v16, 5  ;;  %v1244_v31 = vrot.slane %v1242_v17, 4  ;;  %v1251_v38 = vshll.u32 %v3218_v10, 16  ;;  %v2624_v42 = vshrl.u32 %v3383_v18, 16  ;;  %v3396_v60 = vld [vmem:[%s3908_s29 + $0xe0] sm:$0xf] }
  0x84   : > { %3647 = vmatpush3.bf16.msra.mxu0 %v4184_v48  ;;  %3642 = vmatprep.mubr.msk.bf16.mxu0 %vm244_vm1, %v3840_v13  ;;  %v1226_v48 = vsel %vm3984_vm4, %v1221_v8, %v1225_v26  ;;  %v2608_v33 = vsel %vm3984_vm4, %v2603_v22, %v2607_v4  ;;  %v1234_v36 = vor.u32 %v1233_v20, %v1230_v23  ;;  %v2617_v25 = vrot.slane %v2616_v29, 4  ;;  %v3397_v8 = vld [vmem:[%s3908_s29 + $0xe4] sm:$0x1]  ;;  %v3398_v12 = vld [vmem:[%s3908_s29 + $0xe8] sm:$0xf] }
  0x85   : > { %3801 = vmatprep.subr.msk.bf16.mxu0 %vm257_vm0, %v4232_v43  ;;  %v3222_v43 = vcombine.low %v1212_v5, %v1226_v48  ;;  %v2627_v45 = vshll.u32 %v3383_v18, 16  ;;  %v2633_v46 = vshll.u32 %v3384_v24, 16  ;;  %v1247_v49 = vrot.slane %v1245_v37, 5  ;;  %v3399_v24 = vld [vmem:[%s3908_s29 + $0xec] sm:$0x1] }
  0x86   : > { %3563 = vmatmul.mubr.msk.bf16.gmra.mrb[4].mxu1 %vm244_vm1, %v3841_v53  ;;  %v1253_v13 = vrot.slane %v1251_v38, 5  ;;  %v2638_v50 = vshrl.u32 %v3385_v32, 16  ;;  %v2622_v27 = vsel %vm3984_vm4, %v2617_v25, %v2621_v15  ;;  %v2626_v52 = vrot.slane %v2624_v42, 4  ;;  %v3234_v25 = vld [vmem:[%s3908_s29 + $0xf0] sm:$0xf] }
  0x87   : > { %3568 = vmatprep.mubr.msk.bf16.mxu1 %vm244_vm1, %v4218_v41  ;;  %v1235_v41 = vrot.slane %v1234_v36, 4  ;;  %v2629_v53 = vrot.slane %v2627_v45, 5  ;;  %v2635_v54 = vrot.slane %v2633_v46, 5  ;;  %v3390_v57 = vcombine.low %v2608_v33, %v2622_v27  ;;  %v3232_v33 = vld [vmem:[%s3908_s29 + $0xe8] sm:$0xf] }
  0x88   : > { %v1248_v58 = vor.u32 %v1247_v49, %v1244_v31  ;;  %v2640_v47 = vrot.slane %v2638_v50, 4  ;;  %v2641_v26 = vshll.u32 %v3385_v32, 16  ;;  %v2647_v62 = vshll.u32 %v3386_v40, 16  ;;  %v3233_v40 = vld [vmem:[%s3908_s29 + $0xec] sm:$0x1] }
  0x89   : > { %v1240_v39 = vsel %vm3984_vm4, %v1235_v41, %v1239_v30  ;;  %v2630_v61 = vor.u32 %v2629_v53, %v2626_v52  ;;  %v1374_v2 = vshrl.u32 %v3228_v21, 16  ;;  %v1377_v4 = vshll.u32 %v3228_v21, 16  ;;  %v3235_v27 = vld [vmem:[%s3908_s29 + $0xf4] sm:$0x1] }
  0x8a   : > { %v1249_v3 = vrot.slane %v1248_v58, 4  ;;  %v1383_v35 = vshll.u32 %v3229_v51, 16  ;;  %v2643_v6 = vrot.slane %v2641_v26, 5  ;;  %v2649_v7 = vrot.slane %v2647_v62, 5  ;;  %v3401_v62 = vld [vmem:[%s3908_s29 + $0xf4] sm:$0x1] }
  0x8b   : > { %3643 = vmatmul.mubr.msk.bf16.gmra.mrb[4].mxu0 %vm244_vm1, %v3842_v28  ;;  %v2631_v5 = vrot.slane %v2630_v61, 4  ;;  %v1376_v44 = vrot.slane %v1374_v2, 4  ;;  %v1391_v16 = vshll.u32 %v3230_v55, 16  ;;  %v1397_v18 = vshll.u32 %v3231_v63, 16  ;;  %v3402_v63 = vld [vmem:[%s3908_s29 + $0xf8] sm:$0xf] }
  0x8c   : > { %3648 = vmatprep.mubr.msk.bf16.mxu0 %vm244_vm1, %v4245_v0  ;;  %v1388_v0 = vshrl.u32 %v3230_v55, 16  ;;  %v1254_v9 = vsel %vm3984_vm4, %v1249_v3, %v1253_v13  ;;  %v1385_v10 = vrot.slane %v1383_v35, 5  ;;  %v2770_v48 = vshrl.u32 %v3396_v60, 16 }
  0x8d   : > { %v3223_v14 = vcombine.low %v1240_v39, %v1254_v9  ;;  %v2636_v15 = vsel %vm3984_vm4, %v2631_v5, %v2635_v54  ;;  %v2773_v22 = vshll.u32 %v3396_v60, 16  ;;  %v1393_v20 = vrot.slane %v1391_v16, 5  ;;  %v3400_v39 = vld [vmem:[%s3908_s29 + $0xf0] sm:$0xf]  ;;  %v3238_v16 = vld [vmem:[%s3908_s29 + $0x100] sm:$0xf] }
  0x8e   : > { %3569 = vmatmul.mubr.msk.bf16.vlgmr.msra.gmra.mrb[0].mxu1 %vm244_vm1, %v4264_v34  ;;  %v1379_v34 = vrot.slane %v1377_v4, 5  ;;  %v1390_v11 = vrot.slane %v1388_v0, 4  ;;  %v2779_v28 = vshll.u32 %v3397_v8, 16  ;;  %v1399_v30 = vrot.slane %v1397_v18, 5  ;;  %v3403_v0 = vld [vmem:[%s3908_s29 + $0xfc] sm:$0x1] }
  0x8f   : > { %3577 = vmatpush3.bf16.msra.mxu1 %v4236_v56  ;;  %3572 = vmatprep.mubr.msk.bf16.mxu1 %vm244_vm1, %v3222_v43  ;;  %v2644_v56 = vor.u32 %v2643_v6, %v2640_v47  ;;  %v2784_v43 = vshrl.u32 %v3398_v12, 16  ;;  %v2772_v31 = vrot.slane %v2770_v48, 4  ;;  %v2775_v32 = vrot.slane %v2773_v22, 5 }
  0x90   : > { %v1380_v17 = vor.u32 %v1379_v34, %v1376_v44  ;;  %v2781_v37 = vrot.slane %v2779_v28, 5  ;;  %v2787_v46 = vshll.u32 %v3398_v12, 16  ;;  %v2793_v41 = vshll.u32 %v3399_v24, 16  ;;  %v3236_v44 = vld [vmem:[%s3908_s29 + $0xf8] sm:$0xf] }
  0x91   : > { %v2645_v23 = vrot.slane %v2644_v56, 4  ;;  %v2786_v38 = vrot.slane %v2784_v43, 4  ;;  %v2776_v45 = vor.u32 %v2775_v32, %v2772_v31  ;;  %v1402_v49 = vshrl.u32 %v3232_v33, 16 }
  0x92   : > { %v1381_v29 = vrot.slane %v1380_v17, 4  ;;  %v1405_v13 = vshll.u32 %v3232_v33, 16  ;;  %v2789_v51 = vrot.slane %v2787_v46, 5  ;;  %v1411_v52 = vshll.u32 %v3233_v40, 16 }
  0x93   : > { %3649 = vmatmul.mubr.msk.bf16.vlgmr.msra.gmra.mrb[0].mxu0 %vm244_vm1, %v4282_v1  ;;  %v2650_v36 = vsel %vm3984_vm4, %v2645_v23, %v2649_v7  ;;  %v1394_v1 = vor.u32 %v1393_v20, %v1390_v11  ;;  %v2777_v50 = vrot.slane %v2776_v45, 4  ;;  %v1416_v53 = vshrl.u32 %v3234_v25, 16  ;;  %v3237_v11 = vld [vmem:[%s3908_s29 + $0xfc] sm:$0x1]  ;;  %v3406_v45 = vld [vmem:[%s3908_s29 + $0x108] sm:$0xf] }
  0x94   : > { %3657 = vmatpush3.bf16.msra.mxu0 %v4256_v19  ;;  %3652 = vmatprep.mubr.msk.bf16.mxu0 %vm244_vm1, %v3390_v57  ;;  %v3391_v42 = vcombine.low %v2636_v15, %v2650_v36  ;;  %v1386_v19 = vsel %vm3984_vm4, %v1381_v29, %v1385_v10  ;;  %v1404_v55 = vrot.slane %v1402_v49, 4  ;;  %v1407_v57 = vrot.slane %v1405_v13, 5  ;;  %v3239_v29 = vld [vmem:[%s3908_s29 + $0x104] sm:$0x1] }
  0x95   : > { %v1395_v21 = vrot.slane %v1394_v1, 4  ;;  %v2790_v47 = vor.u32 %v2789_v51, %v2786_v38  ;;  %v2795_v61 = vrot.slane %v2793_v41, 5  ;;  %v1413_v26 = vrot.slane %v1411_v52, 5  ;;  %v3404_v38 = vld [vmem:[%s3908_s29 + $0x100] sm:$0xf] }
  0x96   : > { %3573 = vmatmul.mubr.msk.bf16.gmra.mrb[4].mxu1 %vm244_vm1, %v3223_v14  ;;  %v1408_v2 = vor.u32 %v1407_v57, %v1404_v55  ;;  %v1418_v3 = vrot.slane %v1416_v53, 4  ;;  %v1419_v4 = vshll.u32 %v3234_v25, 16  ;;  %v1425_v35 = vshll.u32 %v3235_v27, 16  ;;  %v3405_v13 = vld [vmem:[%s3908_s29 + $0x104] sm:$0x1] }
  0x97   : > { %v1400_v54 = vsel %vm3984_vm4, %v1395_v21, %v1399_v30  ;;  %v2782_v60 = vsel %vm3984_vm4, %v2777_v50, %v2781_v37  ;;  %v2791_v5 = vrot.slane %v2790_v47, 4  ;;  %v2798_v6 = vshrl.u32 %v3400_v39, 16  ;;  %v3407_v57 = vld [vmem:[%s3908_s29 + $0x10c] sm:$0x1] }
  0x98   : > { %v3245_v58 = vcombine.low %v1386_v19, %v1400_v54  ;;  %v2801_v7 = vshll.u32 %v3400_v39, 16  ;;  %v1409_v8 = vrot.slane %v1408_v2, 4  ;;  %v1421_v9 = vrot.slane %v1419_v4, 5 }
  0x99   : > { %v2807_v34 = vshll.u32 %v3401_v62, 16  ;;  %v2812_v10 = vshrl.u32 %v3402_v63, 16  ;;  %v2796_v12 = vsel %vm3984_vm4, %v2791_v5, %v2795_v61  ;;  %v1427_v14 = vrot.slane %v1425_v35, 5  ;;  %v3240_v62 = vld [vmem:[%s3908_s29 + $0x108] sm:$0xf] }
  0x9a   : > { %3578 = vmatprep.mubr.msk.bf16.mxu1 %vm244_vm1, %v3245_v58  ;;  %v2800_v15 = vrot.slane %v2798_v6, 4  ;;  %v2803_v56 = vrot.slane %v2801_v7, 5  ;;  %v3413_v17 = vcombine.low %v2782_v60, %v2796_v12  ;;  %v1414_v18 = vsel %vm3984_vm4, %v1409_v8, %v1413_v26  ;;  %v3242_v35 = vld [vmem:[%s3908_s29 + $0x110] sm:$0xf]  ;;  %v3241_v7 = vld [vmem:[%s3908_s29 + $0x10c] sm:$0x1] }
  0x9b   : > { %3653 = vmatmul.mubr.msk.bf16.gmra.mrb[4].mxu0 %vm244_vm1, %v3391_v42  ;;  %v1422_v48 = vor.u32 %v1421_v9, %v1418_v3  ;;  %v2814_v22 = vrot.slane %v2812_v10, 4  ;;  %v2815_v20 = vshll.u32 %v3402_v63, 16  ;;  %v2821_v24 = vshll.u32 %v3403_v0, 16 }
  0x9c   : > { %v2804_v23 = vor.u32 %v2803_v56, %v2800_v15  ;;  %v1430_v28 = vshrl.u32 %v3236_v44, 16  ;;  %3658 = vmatprep.mubr.msk.bf16.mxu0 %vm244_vm1, %v3413_v17  ;;  %v1433_v30 = vshll.u32 %v3236_v44, 16  ;;  %v1439_v31 = vshll.u32 %v3237_v11, 16 }
  0x9d   : > { %v1423_v43 = vrot.slane %v1422_v48, 4  ;;  %v1444_v32 = vshrl.u32 %v3238_v16, 16  ;;  %v2809_v36 = vrot.slane %v2807_v34, 5  ;;  %v2817_v1 = vrot.slane %v2815_v20, 5  ;;  %v3408_v48 = vld [vmem:[%s3908_s29 + $0x110] sm:$0xf] }
  0x9e   : > { %v2805_v33 = vrot.slane %v2804_v23, 4  ;;  %v1432_v37 = vrot.slane %v1430_v28, 4  ;;  %v2823_v25 = vrot.slane %v2821_v24, 5  ;;  %v1435_v42 = vrot.slane %v1433_v30, 5  ;;  %v3410_v24 = vld [vmem:[%s3908_s29 + $0x118] sm:$0xf] }
  0x9f   : > { %v1428_v40 = vsel %vm3984_vm4, %v1423_v43, %v1427_v14  ;;  %v1441_v19 = vrot.slane %v1439_v31, 5  ;;  %v2818_v21 = vor.u32 %v2817_v1, %v2814_v22  ;;  %v1446_v41 = vrot.slane %v1444_v32, 4  ;;  %v3243_v14 = vld [vmem:[%s3908_s29 + $0x114] sm:$0x1] }
  0xa0   : > { %v3246_v46 = vcombine.low %v1414_v18, %v1428_v40  ;;  %v1447_v49 = vshll.u32 %v3238_v16, 16  ;;  %v1436_v50 = vor.u32 %v1435_v42, %v1432_v37  ;;  %v1453_v51 = vshll.u32 %v3239_v29, 16  ;;  %v3409_v31 = vld [vmem:[%s3908_s29 + $0x114] sm:$0x1] }
  0xa1   : > { %v2826_v27 = vshrl.u32 %v3404_v38, 16  ;;  %v2829_v52 = vshll.u32 %v3404_v38, 16  ;;  %v2810_v53 = vsel %vm3984_vm4, %v2805_v33, %v2809_v36  ;;  %v2819_v54 = vrot.slane %v2818_v21, 4 }
  0xa2   : > { %3579 = vmatmul.mubr.msk.bf16.vlgmr.msra.gmra.mrb[0].mxu1 %vm244_vm1, %v3246_v46  ;;  %v1449_v55 = vrot.slane %v1447_v49, 5  ;;  %v2840_v39 = vshrl.u32 %v3406_v45, 16  ;;  %v1437_v58 = vrot.slane %v1436_v50, 4  ;;  %v2835_v26 = vshll.u32 %v3405_v13, 16 }
  0xa3   : > { %v2828_v47 = vrot.slane %v2826_v27, 4  ;;  %v2831_v61 = vrot.slane %v2829_v52, 5  ;;  %v2824_v63 = vsel %vm3984_vm4, %v2819_v54, %v2823_v25  ;;  %v1455_v3 = vrot.slane %v1453_v51, 5  ;;  %v3411_v25 = vld [vmem:[%s3908_s29 + $0x11c] sm:$0x1] }
  0xa4   : > { %v1450_v2 = vor.u32 %v1449_v55, %v1446_v41  ;;  %v2842_v4 = vrot.slane %v2840_v39, 4  ;;  %v3414_v0 = vcombine.low %v2810_v53, %v2824_v63  ;;  %v1442_v60 = vsel %vm3984_vm4, %v1437_v58, %v1441_v19 }
  0xa5   : > { %v2832_v5 = vor.u32 %v2831_v61, %v2828_v47  ;;  %v2843_v6 = vshll.u32 %v3406_v45, 16  ;;  %v2849_v8 = vshll.u32 %v3407_v57, 16  ;;  %v1458_v9 = vshrl.u32 %v3240_v62, 16 }
  0xa6   : > { %v1451_v44 = vrot.slane %v1450_v2, 4  ;;  %v1461_v34 = vshll.u32 %v3240_v62, 16  ;;  %3659 = vmatmul.mubr.msk.bf16.vlgmr.msra.gmra.mrb[0].mxu0 %vm244_vm1, %v3414_v0  ;;  %v2837_v11 = vrot.slane %v2835_v26, 5  ;;  %v1472_v15 = vshrl.u32 %v3242_v35, 16 }
  0xa7   : > { %v2833_v10 = vrot.slane %v2832_v5, 4  ;;  %v2845_v12 = vrot.slane %v2843_v6, 5  ;;  %v1460_v16 = vrot.slane %v1458_v9, 4  ;;  %v1467_v18 = vshll.u32 %v3241_v7, 16  ;;  %v3421_v6 = vld [vmem:[%s4435_s2] ss:$0 sm:$0xff] }
  0xa8   : > { %v1456_v56 = vsel %vm3984_vm4, %v1451_v44, %v1455_v3  ;;  %v1463_v17 = vrot.slane %v1461_v34, 5  ;;  %v2851_v20 = vrot.slane %v2849_v8, 5  ;;  %v1474_v43 = vrot.slane %v1472_v15, 4 }
  0xa9   : > { %v3247_v22 = vcombine.low %v1442_v60, %v1456_v56  ;;  %v2846_v23 = vor.u32 %v2845_v12, %v2842_v4  ;;  %v1475_v29 = vshll.u32 %v3242_v35, 16  ;;  %v1481_v30 = vshll.u32 %v3243_v14, 16 }
  0xaa   : > { %v1464_v28 = vor.u32 %v1463_v17, %v1460_v16  ;;  %v2838_v32 = vsel %vm3984_vm4, %v2833_v10, %v2837_v11  ;;  %v2854_v36 = vshrl.u32 %v3408_v48, 16  ;;  %v2857_v1 = vshll.u32 %v3408_v48, 16 }
  0xab   : > { %3582 = vmatprep.mubr.msk.bf16.mxu1 %vm244_vm1, %v3247_v22  ;;  %v2847_v33 = vrot.slane %v2846_v23, 4  ;;  %v1469_v38 = vrot.slane %v1467_v18, 5  ;;  %v1477_v40 = vrot.slane %v1475_v29, 5  ;;  %v2868_v42 = vshrl.u32 %v3410_v24, 16 }
  0xac   : > { %v1465_v37 = vrot.slane %v1464_v28, 4  ;;  %v2856_v45 = vrot.slane %v2854_v36, 4  ;;  %v2859_v46 = vrot.slane %v2857_v1, 5  ;;  %v2863_v21 = vshll.u32 %v3409_v31, 16 }
  0xad   : > { %v2852_v19 = vsel %vm3984_vm4, %v2847_v33, %v2851_v20  ;;  %v1478_v49 = vor.u32 %v1477_v40, %v1474_v43  ;;  %v1483_v13 = vrot.slane %v1481_v30, 5  ;;  %v2870_v51 = vrot.slane %v2868_v42, 4 }
  0xae   : > { %v3415_v41 = vcombine.low %v2838_v32, %v2852_v19  ;;  %v2860_v50 = vor.u32 %v2859_v46, %v2856_v45  ;;  %v2871_v27 = vshll.u32 %v3410_v24, 16  ;;  %v2877_v52 = vshll.u32 %v3411_v25, 16 }
  0xaf   : > { %v1470_v53 = vsel %vm3984_vm4, %v1465_v37, %v1469_v38  ;;  %v1479_v54 = vrot.slane %v1478_v49, 4  ;;  %v2865_v57 = vrot.slane %v2863_v21, 5 }
  0xb0   : > { %3662 = vmatprep.mubr.msk.bf16.mxu0 %vm244_vm1, %v3415_v41  ;;  %v2861_v55 = vrot.slane %v2860_v50, 4  ;;  %v2873_v39 = vrot.slane %v2871_v27, 5  ;;  %v2879_v26 = vrot.slane %v2877_v52, 5 }
  0xb1   : > { %v1484_v58 = vsel %vm3984_vm4, %v1479_v54, %v1483_v13 }
  0xb2   : > { %v3248_v47 = vcombine.low %v1470_v53, %v1484_v58  ;;  %v2874_v61 = vor.u32 %v2873_v39, %v2870_v51  ;;  %v2866_v62 = vsel %vm3984_vm4, %v2861_v55, %v2865_v57 }
  0xb4   : > { %3583 = vmatmul.mubr.msk.bf16.gmra.mrb[4].mxu1 %vm244_vm1, %v3248_v47  ;;  %v2875_v63 = vrot.slane %v2874_v61, 4 }
  0xb6   : > { %v2880_v2 = vsel %vm3984_vm4, %v2875_v63, %v2879_v26 }
  0xb7   : > { %v3416_v3 = vcombine.low %v2866_v62, %v2880_v2 }
  0xb9   : > { %3663 = vmatmul.mubr.msk.bf16.gmra.mrb[4].mxu0 %vm244_vm1, %v3416_v3 }
 0x175   : > { %v3580_v4 = vpop.f32.mrb[0].mxu1 }
 0x176   : > { %v1548_v35 = vpop.f32.mrb[1].mxu1 }
 0x177   : > { %v3581_v0 = vpop.f32.mrb[2].mxu1 }
 0x178   : > { %v1551_v60 = vpop.f32.mrb[3].mxu1 }
 0x179   : > { %v3660_v5 = vpop.f32.mrb[0].mxu0 }
 0x17a   : > { %v3666_v7 = vadd.f32 %v3660_v5, %v3580_v4  ;;  %v2944_v44 = vpop.f32.mrb[1].mxu0 }
 0x17b   : > { %v3667_v8 = vadd.f32 %v2944_v44, %v1548_v35  ;;  %v3661_v9 = vpop.f32.mrb[2].mxu0 }
 0x17c   : > { %v2992_v34 = vmul.f32 %v3666_v7, %v3421_v6  ;;  %v3668_v10 = vadd.f32 %v3661_v9, %v3581_v0  ;;  %v2947_v11 = vpop.f32.mrb[3].mxu0 }
 0x17d   : > { %v2990_v12 = vmul.f32 %v3667_v8, %v3421_v6  ;;  %v3669_v14 = vadd.f32 %v2947_v11, %v1551_v60 }
 0x17e   : > { %v3007_v15 = vadd.f32 %v3422_v59, %v2992_v34  ;;  %v2993_v56 = vmul.f32 %v3668_v10, %v3421_v6 }
 0x17f   : > { %v3005_v16 = vadd.f32 %v3422_v59, %v2990_v12  ;;  %v2991_v17 = vmul.f32 %v3669_v14, %v3421_v6 }
 0x180   : > { %vm3015_vm5 = vcmp.gt.f32.partialorder %v3007_v15, 0.0  ;;  %v3023_v18 = vmul.f32 0.2, %v3007_v15  ;;  %v3008_v48 = vadd.f32 %v3422_v59, %v2993_v56 }
 0x181   : > { %vm3013_vm7 = vcmp.gt.f32.partialorder %v3005_v16, 0.0  ;;  %v3021_v22 = vmul.f32 0.2, %v3005_v16  ;;  %v3006_v23 = vadd.f32 %v3422_v59, %v2991_v17 }
 0x182   : > { %v3031_v20 = vsel %vm3015_vm5, %v3007_v15, %v3023_v18  ;;  %vm3016_vm8 = vcmp.gt.f32.partialorder %v3008_v48, 0.0  ;;  %v3024_v24 = vmul.f32 0.2, %v3008_v48 }
 0x183   : > { %3040 = vst.msk [vmem:[%s4412_s11 + $0x10] sm:$0xff] %vm3037_vm6, %v3031_v20  ;;  %v3029_v28 = vsel %vm3013_vm7, %v3005_v16, %v3021_v22  ;;  %vm3014_vm9 = vcmp.gt.f32.partialorder %v3006_v23, 0.0  ;;  %v3022_v43 = vmul.f32 0.2, %v3006_v23 }
 0x184   : > { %3038 = vst.msk [vmem:[%s4412_s11] sm:$0xff] %vm3037_vm6, %v3029_v28  ;;  %v3032_v29 = vsel %vm3016_vm8, %v3008_v48, %v3024_v24 }
 0x185   : > { %3041 = vst.msk [vmem:[%s4412_s11 + $0x18] sm:$0xff] %vm3037_vm6, %v3032_v29  ;;  %v3030_v30 = vsel %vm3014_vm9, %v3006_v23, %v3022_v43 }
 0x186   : > { %3039 = vst.msk [vmem:[%s4412_s11 + $0x8] sm:$0xff] %vm3037_vm6, %v3030_v30 }
 0x187   : > { %v3584_v31 = vpop.f32.mrb[4].mxu1 }
 0x188   : > { %v1564_v32 = vpop.f32.mrb[5].mxu1 }
 0x189   : > { %v3585_v33 = vpop.f32.mrb[6].mxu1 }
 0x18a   : > { %v1567_v36 = vpop.f32.mrb[7].mxu1 }
 0x18c   : > { %v3664_v1 = vpop.f32.mrb[4].mxu0 }
 0x18d   : > { %v3670_v37 = vadd.f32 %v3664_v1, %v3584_v31  ;;  %v2960_v38 = vpop.f32.mrb[5].mxu0 }
 0x18e   : > { %v3671_v40 = vadd.f32 %v2960_v38, %v1564_v32  ;;  %v3665_v25 = vpop.f32.mrb[6].mxu0 }
 0x18f   : > { %v2996_v42 = vmul.f32 %v3670_v37, %v3421_v6  ;;  %v3672_v19 = vadd.f32 %v3665_v25, %v3585_v33  ;;  %v2963_v45 = vpop.f32.mrb[7].mxu0 }
 0x190   : > { %v2994_v46 = vmul.f32 %v3671_v40, %v3421_v6  ;;  %v3673_v21 = vadd.f32 %v2963_v45, %v1567_v36 }
 0x191   : > { %v3011_v41 = vadd.f32 %v3422_v59, %v2996_v42  ;;  %v2997_v49 = vmul.f32 %v3672_v19, %v3421_v6 }
 0x192   : > { %v3009_v13 = vadd.f32 %v3422_v59, %v2994_v46  ;;  %v2995_v50 = vmul.f32 %v3673_v21, %v3421_v6 }
 0x193   : > { %vm3019_vm10 = vcmp.gt.f32.partialorder %v3011_v41, 0.0  ;;  %v3027_v51 = vmul.f32 0.2, %v3011_v41  ;;  %v3012_v27 = vadd.f32 %v3422_v59, %v2997_v49 }
 0x194   : > { %vm3017_vm11 = vcmp.gt.f32.partialorder %v3009_v13, 0.0  ;;  %v3025_v52 = vmul.f32 0.2, %v3009_v13  ;;  %v3010_v53 = vadd.f32 %v3422_v59, %v2995_v50 }
 0x195   : > { %v3035_v54 = vsel %vm3019_vm10, %v3011_v41, %v3027_v51  ;;  %vm3020_vm12 = vcmp.gt.f32.partialorder %v3012_v27, 0.0  ;;  %v3028_v55 = vmul.f32 0.2, %v3012_v27 }
 0x196   : > { %3044 = vst.msk [vmem:[%s4412_s11 + $0x30] sm:$0xff] %vm3037_vm6, %v3035_v54  ;;  %v3033_v57 = vsel %vm3017_vm11, %v3009_v13, %v3025_v52  ;;  %vm3018_vm13 = vcmp.gt.f32.partialorder %v3010_v53, 0.0  ;;  %v3026_v39 = vmul.f32 0.2, %v3010_v53 }
 0x197   : > { %3042 = vst.msk [vmem:[%s4412_s11 + $0x20] sm:$0xff] %vm3037_vm6, %v3033_v57  ;;  %v3036_v58 = vsel %vm3020_vm12, %v3012_v27, %v3028_v55 }
 0x198   : > { %3045 = vst.msk [vmem:[%s4412_s11 + $0x38] sm:$0xff] %vm3037_vm6, %v3036_v58  ;;  %v3034_v47 = vsel %vm3018_vm13, %v3010_v53, %v3026_v39 }
 0x199   : > { %3043 = vst.msk [vmem:[%s4412_s11 + $0x28] sm:$0xff] %vm3037_vm6, %v3034_v47 }
 0x19a PF: > { %s14_s15 = sadd.s32 1, %s3849_s15  }
 0x19b   : > { %p11_p5 = scmp.ge.s32.totalorder %s14_s15, 4  }
 0x19d   :  { %13 = sbr.rel (!%p11_p5) target bundleno = 1 (0x1), region = 88 }

</bundles_post_ra>
